<compile_context>
chip_gen: v5e
topology: v5e:2x2
jax: 0.10.0
libtpu: 0.0.40
codegen_flags: <defaults>
</compile_context>

<pallas_src>
import math
import jax
import jax.numpy as jnp
from jax import lax
from jax.experimental import pallas as pl
from jax.experimental.pallas import tpu as pltpu

D_MODEL = 32
N_HEADS = 4
D_HEAD = D_MODEL // N_HEADS
D_FF = 64
N_LAYERS = 2
EPS = 1e-5


# ----------------------------- fused decoder kernel -----------------------------

def decoder_kernel(
    x_ref, mem_ref, tbias_ref, sbias_ref,
    w_sa_qkv_ref, b_sa_qkv_ref, w_sa_o_ref, b_sa_o_ref,
    w_ca_q_ref, b_ca_q_ref, w_ca_kv_ref, b_ca_kv_ref, w_ca_o_ref, b_ca_o_ref,
    ff_w1_ref, ff_b1_ref, ff_w2_ref, ff_b2_ref,
    ln_g_ref, ln_b_ref, fin_g_ref, fin_b_ref,
    o_ref,
):
    # One batch element per grid step (grid=(B,)).
    x = x_ref[0].astype(jnp.float32)          # (S_tgt, D)
    mem = mem_ref[0].astype(jnp.float32)      # (S_src, D)
    tbias = tbias_ref[0]                      # (S_tgt, S_tgt) additive mask bias
    sbias = sbias_ref[0]                      # (S_tgt, S_src) additive mask bias

    def layer_norm(v, g, b):
        # fp32 compute (matches the fp16-safe LayerNorm subclass), biased variance, eps=1e-5.
        m = jnp.mean(v, axis=-1, keepdims=True)
        var = jnp.mean(jnp.square(v - m), axis=-1, keepdims=True)
        return (v - m) * lax.rsqrt(var + EPS) * g + b

    def mha(q, k, v, bias):
        # q: (Sq, D), k/v: (Sk, D), bias: (Sq, Sk).  Heads unrolled statically.
        scale = 1.0 / math.sqrt(D_HEAD)
        head_outs = []
        for h in range(N_HEADS):
            sl = slice(h * D_HEAD, (h + 1) * D_HEAD)
            qh = q[:, sl]
            kh = k[:, sl]
            vh = v[:, sl]
            # scores = qh @ kh^T without materializing a transpose.
            s = lax.dot_general(qh, kh, (((1,), (1,)), ((), ())),
                                preferred_element_type=jnp.float32) * scale
            s = s + bias
            s = s - jnp.max(s, axis=-1, keepdims=True)
            e = jnp.exp(s)
            p = e * pl.reciprocal(jnp.sum(e, axis=-1, keepdims=True), approx=True)
            head_outs.append(jnp.dot(p, vh, preferred_element_type=jnp.float32))
        return jnp.concatenate(head_outs, axis=-1)  # (Sq, D)

    for layer in range(N_LAYERS):
        ln_g = ln_g_ref[layer]   # (3, D)
        ln_b = ln_b_ref[layer]

        # ---- sublayer 1: self-attention (pre-norm residual) ----
        h = layer_norm(x, ln_g[0], ln_b[0])
        qkv = jnp.dot(h, w_sa_qkv_ref[layer],
                      preferred_element_type=jnp.float32) + b_sa_qkv_ref[layer]   # (S, 3D)
        a = mha(qkv[:, :D_MODEL], qkv[:, D_MODEL:2 * D_MODEL], qkv[:, 2 * D_MODEL:], tbias)
        x = x + jnp.dot(a, w_sa_o_ref[layer],
                        preferred_element_type=jnp.float32) + b_sa_o_ref[layer]

        # ---- sublayer 2: source attention over encoder memory ----
        h = layer_norm(x, ln_g[1], ln_b[1])
        q = jnp.dot(h, w_ca_q_ref[layer],
                    preferred_element_type=jnp.float32) + b_ca_q_ref[layer]        # (S, D)
        kv = jnp.dot(mem, w_ca_kv_ref[layer],
                     preferred_element_type=jnp.float32) + b_ca_kv_ref[layer]      # (S_src, 2D)
        a = mha(q, kv[:, :D_MODEL], kv[:, D_MODEL:], sbias)
        x = x + jnp.dot(a, w_ca_o_ref[layer],
                        preferred_element_type=jnp.float32) + b_ca_o_ref[layer]

        # ---- sublayer 3: position-wise feed-forward ----
        h = layer_norm(x, ln_g[2], ln_b[2])
        hf = jnp.dot(h, ff_w1_ref[layer],
                     preferred_element_type=jnp.float32) + ff_b1_ref[layer]
        hf = jnp.maximum(hf, 0.0)  # ReLU
        x = x + jnp.dot(hf, ff_w2_ref[layer],
                        preferred_element_type=jnp.float32) + ff_b2_ref[layer]

    # final fp32 LayerNorm, cast back to input dtype
    o_ref[0] = layer_norm(x, fin_g_ref[0], fin_b_ref[0]).astype(o_ref.dtype)


# ----------------------------- wrapper -----------------------------------

def _rep_spec(shape):
    # full-array block, resident across grid steps
    nd = len(shape)
    return pl.BlockSpec(tuple(shape), lambda b, nd=nd: (0,) * nd)


def _bat_spec(shape):
    # one batch element per grid step
    nd = len(shape)
    return pl.BlockSpec((1,) + tuple(shape[1:]), lambda b, nd=nd: (b,) + (0,) * (nd - 1))


def decoder_forward(params, x, memory, src_mask, tgt_mask):
    B, Sq, D = x.shape
    Sk = memory.shape[1]

    # masked_fill(mask == 0, -1e9) expressed as a tiny per-batch additive bias
    tb = jnp.where(jnp.broadcast_to(tgt_mask, (B, 1, Sq, Sq)) == 0,
                   jnp.float32(-1e9), jnp.float32(0.0))[:, 0]                  # (B, Sq, Sq)
    sb = jnp.where(jnp.broadcast_to(src_mask, (B, 1, Sq, Sk)) == 0,
                   jnp.float32(-1e9), jnp.float32(0.0))[:, 0]                  # (B, Sq, Sk)

    args = (
        x, memory, tb, sb,
        params["w_sa_qkv"], params["b_sa_qkv"], params["w_sa_o"], params["b_sa_o"],
        params["w_ca_q"], params["b_ca_q"], params["w_ca_kv"], params["b_ca_kv"],
        params["w_ca_o"], params["b_ca_o"],
        params["ff_w1"], params["ff_b1"], params["ff_w2"], params["ff_b2"],
        params["ln_g"], params["ln_b"], params["fin_g"], params["fin_b"],
    )
    in_specs = [_bat_spec(x.shape), _bat_spec(memory.shape),
                _bat_spec(tb.shape), _bat_spec(sb.shape)]
    in_specs += [_rep_spec(a.shape) for a in args[4:]]

    return pl.pallas_call(
        decoder_kernel,
        grid=(B,),
        in_specs=in_specs,
        out_specs=_bat_spec((B, Sq, D)),
        out_shape=jax.ShapeDtypeStruct((B, Sq, D), x.dtype),
        compiler_params=pltpu.CompilerParams(dimension_semantics=("parallel",)),
    )(*args)


# ----------------------------- parameter init ------------------------------

def init_params(key):
    ks = jax.random.split(key, 8)

    def w(k, shape):
        return 0.02 * jax.random.normal(k, shape, jnp.float32)

    L, D, Dff = N_LAYERS, D_MODEL, D_FF
    return dict(
        # self-attention: fused QKV projection + output projection
        w_sa_qkv=w(ks[0], (L, D, 3 * D)), b_sa_qkv=jnp.zeros((L, 3 * D), jnp.float32),
        w_sa_o=w(ks[1], (L, D, D)),       b_sa_o=jnp.zeros((L, D), jnp.float32),
        # source attention: Q projection + fused KV projection + output projection
        w_ca_q=w(ks[2], (L, D, D)),       b_ca_q=jnp.zeros((L, D), jnp.float32),
        w_ca_kv=w(ks[3], (L, D, 2 * D)),  b_ca_kv=jnp.zeros((L, 2 * D), jnp.float32),
        w_ca_o=w(ks[4], (L, D, D)),       b_ca_o=jnp.zeros((L, D), jnp.float32),
        # feed-forward
        ff_w1=w(ks[5], (L, D, Dff)),      ff_b1=jnp.zeros((L, Dff), jnp.float32),
        ff_w2=w(ks[6], (L, Dff, D)),      ff_b2=jnp.zeros((L, D), jnp.float32),
        # 3 pre-norm LayerNorms per layer + final LayerNorm
        ln_g=jnp.ones((L, 3, D), jnp.float32), ln_b=jnp.zeros((L, 3, D), jnp.float32),
        fin_g=jnp.ones((1, D), jnp.float32),   fin_b=jnp.zeros((1, D), jnp.float32),
    )


# ----------------------------------- main -----------------------------------

if __name__ == "__main__":
    key = jax.random.PRNGKey(0)
    k_p, k_x, k_m = jax.random.split(key, 3)

    B, S_TGT, S_SRC = 2, 8, 8
    params = init_params(k_p)
    x = jax.random.normal(k_x, (B, S_TGT, D_MODEL), jnp.float32)
    memory = jax.random.normal(k_m, (B, S_SRC, D_MODEL), jnp.float32)

    # tgt_mask: causal (subsequent) mask broadcast over heads; src_mask: all-ones pad mask.
    tgt_mask = jnp.tril(jnp.ones((S_TGT, S_TGT), jnp.float32))[None, None, :, :]
    tgt_mask = jnp.broadcast_to(tgt_mask, (B, 1, S_TGT, S_TGT))
    src_mask = jnp.ones((B, 1, 1, S_SRC), jnp.float32)

    fwd = jax.jit(decoder_forward)
    out = fwd(params, x, memory, src_mask, tgt_mask)
    jax.block_until_ready(out)
    assert out.shape == (B, S_TGT, D_MODEL) and out.dtype == x.dtype
    assert bool(jnp.all(jnp.isfinite(out)))
    print("KERNEL_OK")
</pallas_src>

<mosaic_0001>
module attributes {stable_mosaic.version = 11 : i64} {
  func.func @decoder_kernel(%arg0: i32, %arg1: memref<1x8x32xf32, #tpu.memory_space<vmem>>, %arg2: memref<1x8x32xf32, #tpu.memory_space<vmem>>, %arg3: memref<1x8x8xf32, #tpu.memory_space<vmem>>, %arg4: memref<1x8x8xf32, #tpu.memory_space<vmem>>, %arg5: memref<2x32x96xf32, #tpu.memory_space<vmem>>, %arg6: memref<2x96xf32, #tpu.memory_space<vmem>>, %arg7: memref<2x32x32xf32, #tpu.memory_space<vmem>>, %arg8: memref<2x32xf32, #tpu.memory_space<vmem>>, %arg9: memref<2x32x32xf32, #tpu.memory_space<vmem>>, %arg10: memref<2x32xf32, #tpu.memory_space<vmem>>, %arg11: memref<2x32x64xf32, #tpu.memory_space<vmem>>, %arg12: memref<2x64xf32, #tpu.memory_space<vmem>>, %arg13: memref<2x32x32xf32, #tpu.memory_space<vmem>>, %arg14: memref<2x32xf32, #tpu.memory_space<vmem>>, %arg15: memref<2x32x64xf32, #tpu.memory_space<vmem>>, %arg16: memref<2x64xf32, #tpu.memory_space<vmem>>, %arg17: memref<2x64x32xf32, #tpu.memory_space<vmem>>, %arg18: memref<2x32xf32, #tpu.memory_space<vmem>>, %arg19: memref<2x3x32xf32, #tpu.memory_space<vmem>>, %arg20: memref<2x3x32xf32, #tpu.memory_space<vmem>>, %arg21: memref<1x32xf32, #tpu.memory_space<vmem>>, %arg22: memref<1x32xf32, #tpu.memory_space<vmem>>, %arg23: memref<1x8x32xf32, #tpu.memory_space<vmem>>) attributes {dimension_semantics = [#tpu.dimension_semantics<parallel>], iteration_bounds = array<i64: 2>, scalar_prefetch = 0 : i64, scratch_operands = 0 : i64, tpu.core_type = #tpu.core_type<tc>, window_params = [{transform_indices = @transform_0, window_bounds = array<i64: 1, 8, 32>}, {transform_indices = @transform_1, window_bounds = array<i64: 1, 8, 32>}, {transform_indices = @transform_2, window_bounds = array<i64: 1, 8, 8>}, {transform_indices = @transform_3, window_bounds = array<i64: 1, 8, 8>}, {pipeline_mode = #tpu.pipeline_mode<synchronous>, transform_indices = @transform_4, window_bounds = array<i64: 2, 32, 96>}, {pipeline_mode = #tpu.pipeline_mode<synchronous>, transform_indices = @transform_5, window_bounds = array<i64: 2, 96>}, {pipeline_mode = #tpu.pipeline_mode<synchronous>, transform_indices = @transform_6, window_bounds = array<i64: 2, 32, 32>}, {pipeline_mode = #tpu.pipeline_mode<synchronous>, transform_indices = @transform_7, window_bounds = array<i64: 2, 32>}, {pipeline_mode = #tpu.pipeline_mode<synchronous>, transform_indices = @transform_8, window_bounds = array<i64: 2, 32, 32>}, {pipeline_mode = #tpu.pipeline_mode<synchronous>, transform_indices = @transform_9, window_bounds = array<i64: 2, 32>}, {pipeline_mode = #tpu.pipeline_mode<synchronous>, transform_indices = @transform_10, window_bounds = array<i64: 2, 32, 64>}, {pipeline_mode = #tpu.pipeline_mode<synchronous>, transform_indices = @transform_11, window_bounds = array<i64: 2, 64>}, {pipeline_mode = #tpu.pipeline_mode<synchronous>, transform_indices = @transform_12, window_bounds = array<i64: 2, 32, 32>}, {pipeline_mode = #tpu.pipeline_mode<synchronous>, transform_indices = @transform_13, window_bounds = array<i64: 2, 32>}, {pipeline_mode = #tpu.pipeline_mode<synchronous>, transform_indices = @transform_14, window_bounds = array<i64: 2, 32, 64>}, {pipeline_mode = #tpu.pipeline_mode<synchronous>, transform_indices = @transform_15, window_bounds = array<i64: 2, 64>}, {pipeline_mode = #tpu.pipeline_mode<synchronous>, transform_indices = @transform_16, window_bounds = array<i64: 2, 64, 32>}, {pipeline_mode = #tpu.pipeline_mode<synchronous>, transform_indices = @transform_17, window_bounds = array<i64: 2, 32>}, {pipeline_mode = #tpu.pipeline_mode<synchronous>, transform_indices = @transform_18, window_bounds = array<i64: 2, 3, 32>}, {pipeline_mode = #tpu.pipeline_mode<synchronous>, transform_indices = @transform_19, window_bounds = array<i64: 2, 3, 32>}, {pipeline_mode = #tpu.pipeline_mode<synchronous>, transform_indices = @transform_20, window_bounds = array<i64: 1, 32>}, {pipeline_mode = #tpu.pipeline_mode<synchronous>, transform_indices = @transform_21, window_bounds = array<i64: 1, 32>}, {transform_indices = @transform_22, window_bounds = array<i64: 1, 8, 32>}]} {
    %c0 = arith.constant 0 : index
    %c0_0 = arith.constant 0 : index
    %c0_1 = arith.constant 0 : index
    %0 = vector.load %arg1[%c0, %c0_0, %c0_1] : memref<1x8x32xf32, #tpu.memory_space<vmem>>, vector<1x8x32xf32>
    %1 = vector.shape_cast %0 : vector<1x8x32xf32> to vector<8x32xf32>
    %c0_2 = arith.constant 0 : index
    %c0_3 = arith.constant 0 : index
    %c0_4 = arith.constant 0 : index
    %2 = vector.load %arg2[%c0_2, %c0_3, %c0_4] : memref<1x8x32xf32, #tpu.memory_space<vmem>>, vector<1x8x32xf32>
    %3 = vector.shape_cast %2 : vector<1x8x32xf32> to vector<8x32xf32>
    %c0_5 = arith.constant 0 : index
    %c0_6 = arith.constant 0 : index
    %c0_7 = arith.constant 0 : index
    %4 = vector.load %arg3[%c0_5, %c0_6, %c0_7] : memref<1x8x8xf32, #tpu.memory_space<vmem>>, vector<1x8x8xf32>
    %5 = vector.shape_cast %4 : vector<1x8x8xf32> to vector<8x8xf32>
    %c0_8 = arith.constant 0 : index
    %c0_9 = arith.constant 0 : index
    %c0_10 = arith.constant 0 : index
    %6 = vector.load %arg4[%c0_8, %c0_9, %c0_10] : memref<1x8x8xf32, #tpu.memory_space<vmem>>, vector<1x8x8xf32>
    %7 = vector.shape_cast %6 : vector<1x8x8xf32> to vector<8x8xf32>
    %c0_11 = arith.constant 0 : index
    %c0_12 = arith.constant 0 : index
    %c0_13 = arith.constant 0 : index
    %8 = vector.load %arg19[%c0_11, %c0_12, %c0_13] : memref<2x3x32xf32, #tpu.memory_space<vmem>>, vector<1x3x32xf32>
    %9 = vector.shape_cast %8 : vector<1x3x32xf32> to vector<3x32xf32>
    %c0_14 = arith.constant 0 : index
    %c0_15 = arith.constant 0 : index
    %c0_16 = arith.constant 0 : index
    %10 = vector.load %arg20[%c0_14, %c0_15, %c0_16] : memref<2x3x32xf32, #tpu.memory_space<vmem>>, vector<1x3x32xf32>
    %11 = vector.shape_cast %10 : vector<1x3x32xf32> to vector<3x32xf32>
    %12 = vector.extract_strided_slice %9 {offsets = [0, 0], sizes = [1, 32], strides = [1, 1]} : vector<3x32xf32> to vector<1x32xf32>
    %13 = vector.shape_cast %12 : vector<1x32xf32> to vector<32xf32>
    %14 = vector.extract_strided_slice %11 {offsets = [0, 0], sizes = [1, 32], strides = [1, 1]} : vector<3x32xf32> to vector<1x32xf32>
    %15 = vector.shape_cast %14 : vector<1x32xf32> to vector<32xf32>
    %cst = arith.constant dense<0.000000e+00> : vector<8xf32>
    %16 = vector.multi_reduction <add>, %1, %cst [1] : vector<8x32xf32> to vector<8xf32>
    %17 = vector.shape_cast %16 : vector<8xf32> to vector<8x1xf32>
    %cst_17 = arith.constant 3.200000e+01 : f32
    %18 = vector.broadcast %cst_17 : f32 to vector<8x1xf32>
    %19 = arith.divf %17, %18 : vector<8x1xf32>
    %20 = vector.broadcast %19 : vector<8x1xf32> to vector<8x32xf32>
    %21 = arith.subf %1, %20 : vector<8x32xf32>
    %22 = arith.mulf %21, %21 : vector<8x32xf32>
    %cst_18 = arith.constant dense<0.000000e+00> : vector<8xf32>
    %23 = vector.multi_reduction <add>, %22, %cst_18 [1] : vector<8x32xf32> to vector<8xf32>
    %24 = vector.shape_cast %23 : vector<8xf32> to vector<8x1xf32>
    %cst_19 = arith.constant 3.200000e+01 : f32
    %25 = vector.broadcast %cst_19 : f32 to vector<8x1xf32>
    %26 = arith.divf %24, %25 : vector<8x1xf32>
    %27 = vector.broadcast %19 : vector<8x1xf32> to vector<8x32xf32>
    %28 = arith.subf %1, %27 : vector<8x32xf32>
    %cst_20 = arith.constant 9.99999974E-6 : f32
    %29 = vector.broadcast %cst_20 : f32 to vector<8x1xf32>
    %30 = arith.addf %26, %29 : vector<8x1xf32>
    %31 = math.rsqrt %30 : vector<8x1xf32>
    %32 = vector.broadcast %31 : vector<8x1xf32> to vector<8x32xf32>
    %33 = arith.mulf %28, %32 : vector<8x32xf32>
    %34 = vector.shape_cast %13 : vector<32xf32> to vector<1x32xf32>
    %35 = vector.broadcast %34 : vector<1x32xf32> to vector<8x32xf32>
    %36 = arith.mulf %33, %35 : vector<8x32xf32>
    %37 = vector.shape_cast %15 : vector<32xf32> to vector<1x32xf32>
    %38 = vector.broadcast %37 : vector<1x32xf32> to vector<8x32xf32>
    %39 = arith.addf %36, %38 : vector<8x32xf32>
    %c0_21 = arith.constant 0 : index
    %c0_22 = arith.constant 0 : index
    %c0_23 = arith.constant 0 : index
    %40 = vector.load %arg5[%c0_21, %c0_22, %c0_23] : memref<2x32x96xf32, #tpu.memory_space<vmem>>, vector<1x32x96xf32>
    %41 = vector.shape_cast %40 : vector<1x32x96xf32> to vector<32x96xf32>
    %cst_24 = arith.constant dense<0.000000e+00> : vector<8x96xf32>
    %42 = tpu.matmul %39, %41, %cst_24 {dimension_numbers = #tpu.dot_dimension_numbers<[1], [0], [0], [1], [0, 0, 1, 1], [], []>} : vector<8x32xf32>, vector<32x96xf32>, vector<8x96xf32> -> vector<8x96xf32>
    %c0_25 = arith.constant 0 : index
    %c0_26 = arith.constant 0 : index
    %43 = vector.load %arg6[%c0_25, %c0_26] : memref<2x96xf32, #tpu.memory_space<vmem>>, vector<1x96xf32>
    %44 = vector.shape_cast %43 : vector<1x96xf32> to vector<96xf32>
    %45 = vector.shape_cast %44 : vector<96xf32> to vector<1x96xf32>
    %46 = vector.broadcast %45 : vector<1x96xf32> to vector<8x96xf32>
    %47 = arith.addf %42, %46 : vector<8x96xf32>
    %48 = vector.extract_strided_slice %47 {offsets = [0, 0], sizes = [8, 32], strides = [1, 1]} : vector<8x96xf32> to vector<8x32xf32>
    %49 = vector.extract_strided_slice %47 {offsets = [0, 32], sizes = [8, 32], strides = [1, 1]} : vector<8x96xf32> to vector<8x32xf32>
    %50 = vector.extract_strided_slice %47 {offsets = [0, 64], sizes = [8, 32], strides = [1, 1]} : vector<8x96xf32> to vector<8x32xf32>
    %51 = vector.extract_strided_slice %48 {offsets = [0, 0], sizes = [8, 8], strides = [1, 1]} : vector<8x32xf32> to vector<8x8xf32>
    %52 = vector.extract_strided_slice %49 {offsets = [0, 0], sizes = [8, 8], strides = [1, 1]} : vector<8x32xf32> to vector<8x8xf32>
    %53 = vector.extract_strided_slice %50 {offsets = [0, 0], sizes = [8, 8], strides = [1, 1]} : vector<8x32xf32> to vector<8x8xf32>
    %cst_27 = arith.constant dense<0.000000e+00> : vector<8x8xf32>
    %54 = tpu.matmul %51, %52, %cst_27 {dimension_numbers = #tpu.dot_dimension_numbers<[1], [1], [0], [0], [0, 0, 1, 0], [], []>} : vector<8x8xf32>, vector<8x8xf32>, vector<8x8xf32> -> vector<8x8xf32>
    %cst_28 = arith.constant 0.353553385 : f32
    %55 = vector.broadcast %cst_28 : f32 to vector<8x8xf32>
    %56 = arith.mulf %54, %55 : vector<8x8xf32>
    %57 = arith.addf %56, %5 : vector<8x8xf32>
    %cst_29 = arith.constant dense<0xFF800000> : vector<8xf32>
    %58 = vector.multi_reduction <maximumf>, %57, %cst_29 [1] : vector<8x8xf32> to vector<8xf32>
    %59 = vector.shape_cast %58 : vector<8xf32> to vector<8x1xf32>
    %60 = vector.broadcast %59 : vector<8x1xf32> to vector<8x8xf32>
    %61 = arith.subf %57, %60 : vector<8x8xf32>
    %62 = math.exp %61 : vector<8x8xf32>
    %cst_30 = arith.constant dense<0.000000e+00> : vector<8xf32>
    %63 = vector.multi_reduction <add>, %62, %cst_30 [1] : vector<8x8xf32> to vector<8xf32>
    %64 = vector.shape_cast %63 : vector<8xf32> to vector<8x1xf32>
    %65 = tpu.reciprocal %64 {approx = true} : vector<8x1xf32> -> vector<8x1xf32>
    %66 = vector.broadcast %65 : vector<8x1xf32> to vector<8x8xf32>
    %67 = arith.mulf %62, %66 : vector<8x8xf32>
    %cst_31 = arith.constant dense<0.000000e+00> : vector<8x8xf32>
    %68 = tpu.matmul %67, %53, %cst_31 {dimension_numbers = #tpu.dot_dimension_numbers<[1], [0], [0], [1], [0, 0, 1, 1], [], []>} : vector<8x8xf32>, vector<8x8xf32>, vector<8x8xf32> -> vector<8x8xf32>
    %69 = vector.extract_strided_slice %48 {offsets = [0, 8], sizes = [8, 8], strides = [1, 1]} : vector<8x32xf32> to vector<8x8xf32>
    %70 = vector.extract_strided_slice %49 {offsets = [0, 8], sizes = [8, 8], strides = [1, 1]} : vector<8x32xf32> to vector<8x8xf32>
    %71 = vector.extract_strided_slice %50 {offsets = [0, 8], sizes = [8, 8], strides = [1, 1]} : vector<8x32xf32> to vector<8x8xf32>
    %cst_32 = arith.constant dense<0.000000e+00> : vector<8x8xf32>
    %72 = tpu.matmul %69, %70, %cst_32 {dimension_numbers = #tpu.dot_dimension_numbers<[1], [1], [0], [0], [0, 0, 1, 0], [], []>} : vector<8x8xf32>, vector<8x8xf32>, vector<8x8xf32> -> vector<8x8xf32>
    %cst_33 = arith.constant 0.353553385 : f32
    %73 = vector.broadcast %cst_33 : f32 to vector<8x8xf32>
    %74 = arith.mulf %72, %73 : vector<8x8xf32>
    %75 = arith.addf %74, %5 : vector<8x8xf32>
    %cst_34 = arith.constant dense<0xFF800000> : vector<8xf32>
    %76 = vector.multi_reduction <maximumf>, %75, %cst_34 [1] : vector<8x8xf32> to vector<8xf32>
    %77 = vector.shape_cast %76 : vector<8xf32> to vector<8x1xf32>
    %78 = vector.broadcast %77 : vector<8x1xf32> to vector<8x8xf32>
    %79 = arith.subf %75, %78 : vector<8x8xf32>
    %80 = math.exp %79 : vector<8x8xf32>
    %cst_35 = arith.constant dense<0.000000e+00> : vector<8xf32>
    %81 = vector.multi_reduction <add>, %80, %cst_35 [1] : vector<8x8xf32> to vector<8xf32>
    %82 = vector.shape_cast %81 : vector<8xf32> to vector<8x1xf32>
    %83 = tpu.reciprocal %82 {approx = true} : vector<8x1xf32> -> vector<8x1xf32>
    %84 = vector.broadcast %83 : vector<8x1xf32> to vector<8x8xf32>
    %85 = arith.mulf %80, %84 : vector<8x8xf32>
    %cst_36 = arith.constant dense<0.000000e+00> : vector<8x8xf32>
    %86 = tpu.matmul %85, %71, %cst_36 {dimension_numbers = #tpu.dot_dimension_numbers<[1], [0], [0], [1], [0, 0, 1, 1], [], []>} : vector<8x8xf32>, vector<8x8xf32>, vector<8x8xf32> -> vector<8x8xf32>
    %87 = vector.extract_strided_slice %48 {offsets = [0, 16], sizes = [8, 8], strides = [1, 1]} : vector<8x32xf32> to vector<8x8xf32>
    %88 = vector.extract_strided_slice %49 {offsets = [0, 16], sizes = [8, 8], strides = [1, 1]} : vector<8x32xf32> to vector<8x8xf32>
    %89 = vector.extract_strided_slice %50 {offsets = [0, 16], sizes = [8, 8], strides = [1, 1]} : vector<8x32xf32> to vector<8x8xf32>
    %cst_37 = arith.constant dense<0.000000e+00> : vector<8x8xf32>
    %90 = tpu.matmul %87, %88, %cst_37 {dimension_numbers = #tpu.dot_dimension_numbers<[1], [1], [0], [0], [0, 0, 1, 0], [], []>} : vector<8x8xf32>, vector<8x8xf32>, vector<8x8xf32> -> vector<8x8xf32>
    %cst_38 = arith.constant 0.353553385 : f32
    %91 = vector.broadcast %cst_38 : f32 to vector<8x8xf32>
    %92 = arith.mulf %90, %91 : vector<8x8xf32>
    %93 = arith.addf %92, %5 : vector<8x8xf32>
    %cst_39 = arith.constant dense<0xFF800000> : vector<8xf32>
    %94 = vector.multi_reduction <maximumf>, %93, %cst_39 [1] : vector<8x8xf32> to vector<8xf32>
    %95 = vector.shape_cast %94 : vector<8xf32> to vector<8x1xf32>
    %96 = vector.broadcast %95 : vector<8x1xf32> to vector<8x8xf32>
    %97 = arith.subf %93, %96 : vector<8x8xf32>
    %98 = math.exp %97 : vector<8x8xf32>
    %cst_40 = arith.constant dense<0.000000e+00> : vector<8xf32>
    %99 = vector.multi_reduction <add>, %98, %cst_40 [1] : vector<8x8xf32> to vector<8xf32>
    %100 = vector.shape_cast %99 : vector<8xf32> to vector<8x1xf32>
    %101 = tpu.reciprocal %100 {approx = true} : vector<8x1xf32> -> vector<8x1xf32>
    %102 = vector.broadcast %101 : vector<8x1xf32> to vector<8x8xf32>
    %103 = arith.mulf %98, %102 : vector<8x8xf32>
    %cst_41 = arith.constant dense<0.000000e+00> : vector<8x8xf32>
    %104 = tpu.matmul %103, %89, %cst_41 {dimension_numbers = #tpu.dot_dimension_numbers<[1], [0], [0], [1], [0, 0, 1, 1], [], []>} : vector<8x8xf32>, vector<8x8xf32>, vector<8x8xf32> -> vector<8x8xf32>
    %105 = vector.extract_strided_slice %48 {offsets = [0, 24], sizes = [8, 8], strides = [1, 1]} : vector<8x32xf32> to vector<8x8xf32>
    %106 = vector.extract_strided_slice %49 {offsets = [0, 24], sizes = [8, 8], strides = [1, 1]} : vector<8x32xf32> to vector<8x8xf32>
    %107 = vector.extract_strided_slice %50 {offsets = [0, 24], sizes = [8, 8], strides = [1, 1]} : vector<8x32xf32> to vector<8x8xf32>
    %cst_42 = arith.constant dense<0.000000e+00> : vector<8x8xf32>
    %108 = tpu.matmul %105, %106, %cst_42 {dimension_numbers = #tpu.dot_dimension_numbers<[1], [1], [0], [0], [0, 0, 1, 0], [], []>} : vector<8x8xf32>, vector<8x8xf32>, vector<8x8xf32> -> vector<8x8xf32>
    %cst_43 = arith.constant 0.353553385 : f32
    %109 = vector.broadcast %cst_43 : f32 to vector<8x8xf32>
    %110 = arith.mulf %108, %109 : vector<8x8xf32>
    %111 = arith.addf %110, %5 : vector<8x8xf32>
    %cst_44 = arith.constant dense<0xFF800000> : vector<8xf32>
    %112 = vector.multi_reduction <maximumf>, %111, %cst_44 [1] : vector<8x8xf32> to vector<8xf32>
    %113 = vector.shape_cast %112 : vector<8xf32> to vector<8x1xf32>
    %114 = vector.broadcast %113 : vector<8x1xf32> to vector<8x8xf32>
    %115 = arith.subf %111, %114 : vector<8x8xf32>
    %116 = math.exp %115 : vector<8x8xf32>
    %cst_45 = arith.constant dense<0.000000e+00> : vector<8xf32>
    %117 = vector.multi_reduction <add>, %116, %cst_45 [1] : vector<8x8xf32> to vector<8xf32>
    %118 = vector.shape_cast %117 : vector<8xf32> to vector<8x1xf32>
    %119 = tpu.reciprocal %118 {approx = true} : vector<8x1xf32> -> vector<8x1xf32>
    %120 = vector.broadcast %119 : vector<8x1xf32> to vector<8x8xf32>
    %121 = arith.mulf %116, %120 : vector<8x8xf32>
    %cst_46 = arith.constant dense<0.000000e+00> : vector<8x8xf32>
    %122 = tpu.matmul %121, %107, %cst_46 {dimension_numbers = #tpu.dot_dimension_numbers<[1], [0], [0], [1], [0, 0, 1, 1], [], []>} : vector<8x8xf32>, vector<8x8xf32>, vector<8x8xf32> -> vector<8x8xf32>
    %123 = tpu.concatenate %68, %86, %104, %122 in 1 : vector<8x8xf32>, vector<8x8xf32>, vector<8x8xf32>, vector<8x8xf32> -> vector<8x32xf32>
    %c0_47 = arith.constant 0 : index
    %c0_48 = arith.constant 0 : index
    %c0_49 = arith.constant 0 : index
    %124 = vector.load %arg7[%c0_47, %c0_48, %c0_49] : memref<2x32x32xf32, #tpu.memory_space<vmem>>, vector<1x32x32xf32>
    %125 = vector.shape_cast %124 : vector<1x32x32xf32> to vector<32x32xf32>
    %cst_50 = arith.constant dense<0.000000e+00> : vector<8x32xf32>
    %126 = tpu.matmul %123, %125, %cst_50 {dimension_numbers = #tpu.dot_dimension_numbers<[1], [0], [0], [1], [0, 0, 1, 1], [], []>} : vector<8x32xf32>, vector<32x32xf32>, vector<8x32xf32> -> vector<8x32xf32>
    %127 = arith.addf %1, %126 : vector<8x32xf32>
    %c0_51 = arith.constant 0 : index
    %c0_52 = arith.constant 0 : index
    %128 = vector.load %arg8[%c0_51, %c0_52] : memref<2x32xf32, #tpu.memory_space<vmem>>, vector<1x32xf32>
    %129 = vector.shape_cast %128 : vector<1x32xf32> to vector<32xf32>
    %130 = vector.shape_cast %129 : vector<32xf32> to vector<1x32xf32>
    %131 = vector.broadcast %130 : vector<1x32xf32> to vector<8x32xf32>
    %132 = arith.addf %127, %131 : vector<8x32xf32>
    %133 = vector.extract_strided_slice %9 {offsets = [1, 0], sizes = [1, 32], strides = [1, 1]} : vector<3x32xf32> to vector<1x32xf32>
    %134 = vector.shape_cast %133 : vector<1x32xf32> to vector<32xf32>
    %135 = vector.extract_strided_slice %11 {offsets = [1, 0], sizes = [1, 32], strides = [1, 1]} : vector<3x32xf32> to vector<1x32xf32>
    %136 = vector.shape_cast %135 : vector<1x32xf32> to vector<32xf32>
    %cst_53 = arith.constant dense<0.000000e+00> : vector<8xf32>
    %137 = vector.multi_reduction <add>, %132, %cst_53 [1] : vector<8x32xf32> to vector<8xf32>
    %138 = vector.shape_cast %137 : vector<8xf32> to vector<8x1xf32>
    %cst_54 = arith.constant 3.200000e+01 : f32
    %139 = vector.broadcast %cst_54 : f32 to vector<8x1xf32>
    %140 = arith.divf %138, %139 : vector<8x1xf32>
    %141 = vector.broadcast %140 : vector<8x1xf32> to vector<8x32xf32>
    %142 = arith.subf %132, %141 : vector<8x32xf32>
    %143 = arith.mulf %142, %142 : vector<8x32xf32>
    %cst_55 = arith.constant dense<0.000000e+00> : vector<8xf32>
    %144 = vector.multi_reduction <add>, %143, %cst_55 [1] : vector<8x32xf32> to vector<8xf32>
    %145 = vector.shape_cast %144 : vector<8xf32> to vector<8x1xf32>
    %cst_56 = arith.constant 3.200000e+01 : f32
    %146 = vector.broadcast %cst_56 : f32 to vector<8x1xf32>
    %147 = arith.divf %145, %146 : vector<8x1xf32>
    %148 = vector.broadcast %140 : vector<8x1xf32> to vector<8x32xf32>
    %149 = arith.subf %132, %148 : vector<8x32xf32>
    %cst_57 = arith.constant 9.99999974E-6 : f32
    %150 = vector.broadcast %cst_57 : f32 to vector<8x1xf32>
    %151 = arith.addf %147, %150 : vector<8x1xf32>
    %152 = math.rsqrt %151 : vector<8x1xf32>
    %153 = vector.broadcast %152 : vector<8x1xf32> to vector<8x32xf32>
    %154 = arith.mulf %149, %153 : vector<8x32xf32>
    %155 = vector.shape_cast %134 : vector<32xf32> to vector<1x32xf32>
    %156 = vector.broadcast %155 : vector<1x32xf32> to vector<8x32xf32>
    %157 = arith.mulf %154, %156 : vector<8x32xf32>
    %158 = vector.shape_cast %136 : vector<32xf32> to vector<1x32xf32>
    %159 = vector.broadcast %158 : vector<1x32xf32> to vector<8x32xf32>
    %160 = arith.addf %157, %159 : vector<8x32xf32>
    %c0_58 = arith.constant 0 : index
    %c0_59 = arith.constant 0 : index
    %c0_60 = arith.constant 0 : index
    %161 = vector.load %arg9[%c0_58, %c0_59, %c0_60] : memref<2x32x32xf32, #tpu.memory_space<vmem>>, vector<1x32x32xf32>
    %162 = vector.shape_cast %161 : vector<1x32x32xf32> to vector<32x32xf32>
    %cst_61 = arith.constant dense<0.000000e+00> : vector<8x32xf32>
    %163 = tpu.matmul %160, %162, %cst_61 {dimension_numbers = #tpu.dot_dimension_numbers<[1], [0], [0], [1], [0, 0, 1, 1], [], []>} : vector<8x32xf32>, vector<32x32xf32>, vector<8x32xf32> -> vector<8x32xf32>
    %c0_62 = arith.constant 0 : index
    %c0_63 = arith.constant 0 : index
    %164 = vector.load %arg10[%c0_62, %c0_63] : memref<2x32xf32, #tpu.memory_space<vmem>>, vector<1x32xf32>
    %165 = vector.shape_cast %164 : vector<1x32xf32> to vector<32xf32>
    %166 = vector.shape_cast %165 : vector<32xf32> to vector<1x32xf32>
    %167 = vector.broadcast %166 : vector<1x32xf32> to vector<8x32xf32>
    %168 = arith.addf %163, %167 : vector<8x32xf32>
    %c0_64 = arith.constant 0 : index
    %c0_65 = arith.constant 0 : index
    %c0_66 = arith.constant 0 : index
    %169 = vector.load %arg11[%c0_64, %c0_65, %c0_66] : memref<2x32x64xf32, #tpu.memory_space<vmem>>, vector<1x32x64xf32>
    %170 = vector.shape_cast %169 : vector<1x32x64xf32> to vector<32x64xf32>
    %cst_67 = arith.constant dense<0.000000e+00> : vector<8x64xf32>
    %171 = tpu.matmul %3, %170, %cst_67 {dimension_numbers = #tpu.dot_dimension_numbers<[1], [0], [0], [1], [0, 0, 1, 1], [], []>} : vector<8x32xf32>, vector<32x64xf32>, vector<8x64xf32> -> vector<8x64xf32>
    %c0_68 = arith.constant 0 : index
    %c0_69 = arith.constant 0 : index
    %172 = vector.load %arg12[%c0_68, %c0_69] : memref<2x64xf32, #tpu.memory_space<vmem>>, vector<1x64xf32>
    %173 = vector.shape_cast %172 : vector<1x64xf32> to vector<64xf32>
    %174 = vector.shape_cast %173 : vector<64xf32> to vector<1x64xf32>
    %175 = vector.broadcast %174 : vector<1x64xf32> to vector<8x64xf32>
    %176 = arith.addf %171, %175 : vector<8x64xf32>
    %177 = vector.extract_strided_slice %176 {offsets = [0, 0], sizes = [8, 32], strides = [1, 1]} : vector<8x64xf32> to vector<8x32xf32>
    %178 = vector.extract_strided_slice %176 {offsets = [0, 32], sizes = [8, 32], strides = [1, 1]} : vector<8x64xf32> to vector<8x32xf32>
    %179 = vector.extract_strided_slice %168 {offsets = [0, 0], sizes = [8, 8], strides = [1, 1]} : vector<8x32xf32> to vector<8x8xf32>
    %180 = vector.extract_strided_slice %177 {offsets = [0, 0], sizes = [8, 8], strides = [1, 1]} : vector<8x32xf32> to vector<8x8xf32>
    %181 = vector.extract_strided_slice %178 {offsets = [0, 0], sizes = [8, 8], strides = [1, 1]} : vector<8x32xf32> to vector<8x8xf32>
    %cst_70 = arith.constant dense<0.000000e+00> : vector<8x8xf32>
    %182 = tpu.matmul %179, %180, %cst_70 {dimension_numbers = #tpu.dot_dimension_numbers<[1], [1], [0], [0], [0, 0, 1, 0], [], []>} : vector<8x8xf32>, vector<8x8xf32>, vector<8x8xf32> -> vector<8x8xf32>
    %cst_71 = arith.constant 0.353553385 : f32
    %183 = vector.broadcast %cst_71 : f32 to vector<8x8xf32>
    %184 = arith.mulf %182, %183 : vector<8x8xf32>
    %185 = arith.addf %184, %7 : vector<8x8xf32>
    %cst_72 = arith.constant dense<0xFF800000> : vector<8xf32>
    %186 = vector.multi_reduction <maximumf>, %185, %cst_72 [1] : vector<8x8xf32> to vector<8xf32>
    %187 = vector.shape_cast %186 : vector<8xf32> to vector<8x1xf32>
    %188 = vector.broadcast %187 : vector<8x1xf32> to vector<8x8xf32>
    %189 = arith.subf %185, %188 : vector<8x8xf32>
    %190 = math.exp %189 : vector<8x8xf32>
    %cst_73 = arith.constant dense<0.000000e+00> : vector<8xf32>
    %191 = vector.multi_reduction <add>, %190, %cst_73 [1] : vector<8x8xf32> to vector<8xf32>
    %192 = vector.shape_cast %191 : vector<8xf32> to vector<8x1xf32>
    %193 = tpu.reciprocal %192 {approx = true} : vector<8x1xf32> -> vector<8x1xf32>
    %194 = vector.broadcast %193 : vector<8x1xf32> to vector<8x8xf32>
    %195 = arith.mulf %190, %194 : vector<8x8xf32>
    %cst_74 = arith.constant dense<0.000000e+00> : vector<8x8xf32>
    %196 = tpu.matmul %195, %181, %cst_74 {dimension_numbers = #tpu.dot_dimension_numbers<[1], [0], [0], [1], [0, 0, 1, 1], [], []>} : vector<8x8xf32>, vector<8x8xf32>, vector<8x8xf32> -> vector<8x8xf32>
    %197 = vector.extract_strided_slice %168 {offsets = [0, 8], sizes = [8, 8], strides = [1, 1]} : vector<8x32xf32> to vector<8x8xf32>
    %198 = vector.extract_strided_slice %177 {offsets = [0, 8], sizes = [8, 8], strides = [1, 1]} : vector<8x32xf32> to vector<8x8xf32>
    %199 = vector.extract_strided_slice %178 {offsets = [0, 8], sizes = [8, 8], strides = [1, 1]} : vector<8x32xf32> to vector<8x8xf32>
    %cst_75 = arith.constant dense<0.000000e+00> : vector<8x8xf32>
    %200 = tpu.matmul %197, %198, %cst_75 {dimension_numbers = #tpu.dot_dimension_numbers<[1], [1], [0], [0], [0, 0, 1, 0], [], []>} : vector<8x8xf32>, vector<8x8xf32>, vector<8x8xf32> -> vector<8x8xf32>
    %cst_76 = arith.constant 0.353553385 : f32
    %201 = vector.broadcast %cst_76 : f32 to vector<8x8xf32>
    %202 = arith.mulf %200, %201 : vector<8x8xf32>
    %203 = arith.addf %202, %7 : vector<8x8xf32>
    %cst_77 = arith.constant dense<0xFF800000> : vector<8xf32>
    %204 = vector.multi_reduction <maximumf>, %203, %cst_77 [1] : vector<8x8xf32> to vector<8xf32>
    %205 = vector.shape_cast %204 : vector<8xf32> to vector<8x1xf32>
    %206 = vector.broadcast %205 : vector<8x1xf32> to vector<8x8xf32>
    %207 = arith.subf %203, %206 : vector<8x8xf32>
    %208 = math.exp %207 : vector<8x8xf32>
    %cst_78 = arith.constant dense<0.000000e+00> : vector<8xf32>
    %209 = vector.multi_reduction <add>, %208, %cst_78 [1] : vector<8x8xf32> to vector<8xf32>
    %210 = vector.shape_cast %209 : vector<8xf32> to vector<8x1xf32>
    %211 = tpu.reciprocal %210 {approx = true} : vector<8x1xf32> -> vector<8x1xf32>
    %212 = vector.broadcast %211 : vector<8x1xf32> to vector<8x8xf32>
    %213 = arith.mulf %208, %212 : vector<8x8xf32>
    %cst_79 = arith.constant dense<0.000000e+00> : vector<8x8xf32>
    %214 = tpu.matmul %213, %199, %cst_79 {dimension_numbers = #tpu.dot_dimension_numbers<[1], [0], [0], [1], [0, 0, 1, 1], [], []>} : vector<8x8xf32>, vector<8x8xf32>, vector<8x8xf32> -> vector<8x8xf32>
    %215 = vector.extract_strided_slice %168 {offsets = [0, 16], sizes = [8, 8], strides = [1, 1]} : vector<8x32xf32> to vector<8x8xf32>
    %216 = vector.extract_strided_slice %177 {offsets = [0, 16], sizes = [8, 8], strides = [1, 1]} : vector<8x32xf32> to vector<8x8xf32>
    %217 = vector.extract_strided_slice %178 {offsets = [0, 16], sizes = [8, 8], strides = [1, 1]} : vector<8x32xf32> to vector<8x8xf32>
    %cst_80 = arith.constant dense<0.000000e+00> : vector<8x8xf32>
    %218 = tpu.matmul %215, %216, %cst_80 {dimension_numbers = #tpu.dot_dimension_numbers<[1], [1], [0], [0], [0, 0, 1, 0], [], []>} : vector<8x8xf32>, vector<8x8xf32>, vector<8x8xf32> -> vector<8x8xf32>
    %cst_81 = arith.constant 0.353553385 : f32
    %219 = vector.broadcast %cst_81 : f32 to vector<8x8xf32>
    %220 = arith.mulf %218, %219 : vector<8x8xf32>
    %221 = arith.addf %220, %7 : vector<8x8xf32>
    %cst_82 = arith.constant dense<0xFF800000> : vector<8xf32>
    %222 = vector.multi_reduction <maximumf>, %221, %cst_82 [1] : vector<8x8xf32> to vector<8xf32>
    %223 = vector.shape_cast %222 : vector<8xf32> to vector<8x1xf32>
    %224 = vector.broadcast %223 : vector<8x1xf32> to vector<8x8xf32>
    %225 = arith.subf %221, %224 : vector<8x8xf32>
    %226 = math.exp %225 : vector<8x8xf32>
    %cst_83 = arith.constant dense<0.000000e+00> : vector<8xf32>
    %227 = vector.multi_reduction <add>, %226, %cst_83 [1] : vector<8x8xf32> to vector<8xf32>
    %228 = vector.shape_cast %227 : vector<8xf32> to vector<8x1xf32>
    %229 = tpu.reciprocal %228 {approx = true} : vector<8x1xf32> -> vector<8x1xf32>
    %230 = vector.broadcast %229 : vector<8x1xf32> to vector<8x8xf32>
    %231 = arith.mulf %226, %230 : vector<8x8xf32>
    %cst_84 = arith.constant dense<0.000000e+00> : vector<8x8xf32>
    %232 = tpu.matmul %231, %217, %cst_84 {dimension_numbers = #tpu.dot_dimension_numbers<[1], [0], [0], [1], [0, 0, 1, 1], [], []>} : vector<8x8xf32>, vector<8x8xf32>, vector<8x8xf32> -> vector<8x8xf32>
    %233 = vector.extract_strided_slice %168 {offsets = [0, 24], sizes = [8, 8], strides = [1, 1]} : vector<8x32xf32> to vector<8x8xf32>
    %234 = vector.extract_strided_slice %177 {offsets = [0, 24], sizes = [8, 8], strides = [1, 1]} : vector<8x32xf32> to vector<8x8xf32>
    %235 = vector.extract_strided_slice %178 {offsets = [0, 24], sizes = [8, 8], strides = [1, 1]} : vector<8x32xf32> to vector<8x8xf32>
    %cst_85 = arith.constant dense<0.000000e+00> : vector<8x8xf32>
    %236 = tpu.matmul %233, %234, %cst_85 {dimension_numbers = #tpu.dot_dimension_numbers<[1], [1], [0], [0], [0, 0, 1, 0], [], []>} : vector<8x8xf32>, vector<8x8xf32>, vector<8x8xf32> -> vector<8x8xf32>
    %cst_86 = arith.constant 0.353553385 : f32
    %237 = vector.broadcast %cst_86 : f32 to vector<8x8xf32>
    %238 = arith.mulf %236, %237 : vector<8x8xf32>
    %239 = arith.addf %238, %7 : vector<8x8xf32>
    %cst_87 = arith.constant dense<0xFF800000> : vector<8xf32>
    %240 = vector.multi_reduction <maximumf>, %239, %cst_87 [1] : vector<8x8xf32> to vector<8xf32>
    %241 = vector.shape_cast %240 : vector<8xf32> to vector<8x1xf32>
    %242 = vector.broadcast %241 : vector<8x1xf32> to vector<8x8xf32>
    %243 = arith.subf %239, %242 : vector<8x8xf32>
    %244 = math.exp %243 : vector<8x8xf32>
    %cst_88 = arith.constant dense<0.000000e+00> : vector<8xf32>
    %245 = vector.multi_reduction <add>, %244, %cst_88 [1] : vector<8x8xf32> to vector<8xf32>
    %246 = vector.shape_cast %245 : vector<8xf32> to vector<8x1xf32>
    %247 = tpu.reciprocal %246 {approx = true} : vector<8x1xf32> -> vector<8x1xf32>
    %248 = vector.broadcast %247 : vector<8x1xf32> to vector<8x8xf32>
    %249 = arith.mulf %244, %248 : vector<8x8xf32>
    %cst_89 = arith.constant dense<0.000000e+00> : vector<8x8xf32>
    %250 = tpu.matmul %249, %235, %cst_89 {dimension_numbers = #tpu.dot_dimension_numbers<[1], [0], [0], [1], [0, 0, 1, 1], [], []>} : vector<8x8xf32>, vector<8x8xf32>, vector<8x8xf32> -> vector<8x8xf32>
    %251 = tpu.concatenate %196, %214, %232, %250 in 1 : vector<8x8xf32>, vector<8x8xf32>, vector<8x8xf32>, vector<8x8xf32> -> vector<8x32xf32>
    %c0_90 = arith.constant 0 : index
    %c0_91 = arith.constant 0 : index
    %c0_92 = arith.constant 0 : index
    %252 = vector.load %arg13[%c0_90, %c0_91, %c0_92] : memref<2x32x32xf32, #tpu.memory_space<vmem>>, vector<1x32x32xf32>
    %253 = vector.shape_cast %252 : vector<1x32x32xf32> to vector<32x32xf32>
    %cst_93 = arith.constant dense<0.000000e+00> : vector<8x32xf32>
    %254 = tpu.matmul %251, %253, %cst_93 {dimension_numbers = #tpu.dot_dimension_numbers<[1], [0], [0], [1], [0, 0, 1, 1], [], []>} : vector<8x32xf32>, vector<32x32xf32>, vector<8x32xf32> -> vector<8x32xf32>
    %255 = arith.addf %132, %254 : vector<8x32xf32>
    %c0_94 = arith.constant 0 : index
    %c0_95 = arith.constant 0 : index
    %256 = vector.load %arg14[%c0_94, %c0_95] : memref<2x32xf32, #tpu.memory_space<vmem>>, vector<1x32xf32>
    %257 = vector.shape_cast %256 : vector<1x32xf32> to vector<32xf32>
    %258 = vector.shape_cast %257 : vector<32xf32> to vector<1x32xf32>
    %259 = vector.broadcast %258 : vector<1x32xf32> to vector<8x32xf32>
    %260 = arith.addf %255, %259 : vector<8x32xf32>
    %261 = vector.extract_strided_slice %9 {offsets = [2, 0], sizes = [1, 32], strides = [1, 1]} : vector<3x32xf32> to vector<1x32xf32>
    %262 = vector.shape_cast %261 : vector<1x32xf32> to vector<32xf32>
    %263 = vector.extract_strided_slice %11 {offsets = [2, 0], sizes = [1, 32], strides = [1, 1]} : vector<3x32xf32> to vector<1x32xf32>
    %264 = vector.shape_cast %263 : vector<1x32xf32> to vector<32xf32>
    %cst_96 = arith.constant dense<0.000000e+00> : vector<8xf32>
    %265 = vector.multi_reduction <add>, %260, %cst_96 [1] : vector<8x32xf32> to vector<8xf32>
    %266 = vector.shape_cast %265 : vector<8xf32> to vector<8x1xf32>
    %cst_97 = arith.constant 3.200000e+01 : f32
    %267 = vector.broadcast %cst_97 : f32 to vector<8x1xf32>
    %268 = arith.divf %266, %267 : vector<8x1xf32>
    %269 = vector.broadcast %268 : vector<8x1xf32> to vector<8x32xf32>
    %270 = arith.subf %260, %269 : vector<8x32xf32>
    %271 = arith.mulf %270, %270 : vector<8x32xf32>
    %cst_98 = arith.constant dense<0.000000e+00> : vector<8xf32>
    %272 = vector.multi_reduction <add>, %271, %cst_98 [1] : vector<8x32xf32> to vector<8xf32>
    %273 = vector.shape_cast %272 : vector<8xf32> to vector<8x1xf32>
    %cst_99 = arith.constant 3.200000e+01 : f32
    %274 = vector.broadcast %cst_99 : f32 to vector<8x1xf32>
    %275 = arith.divf %273, %274 : vector<8x1xf32>
    %276 = vector.broadcast %268 : vector<8x1xf32> to vector<8x32xf32>
    %277 = arith.subf %260, %276 : vector<8x32xf32>
    %cst_100 = arith.constant 9.99999974E-6 : f32
    %278 = vector.broadcast %cst_100 : f32 to vector<8x1xf32>
    %279 = arith.addf %275, %278 : vector<8x1xf32>
    %280 = math.rsqrt %279 : vector<8x1xf32>
    %281 = vector.broadcast %280 : vector<8x1xf32> to vector<8x32xf32>
    %282 = arith.mulf %277, %281 : vector<8x32xf32>
    %283 = vector.shape_cast %262 : vector<32xf32> to vector<1x32xf32>
    %284 = vector.broadcast %283 : vector<1x32xf32> to vector<8x32xf32>
    %285 = arith.mulf %282, %284 : vector<8x32xf32>
    %286 = vector.shape_cast %264 : vector<32xf32> to vector<1x32xf32>
    %287 = vector.broadcast %286 : vector<1x32xf32> to vector<8x32xf32>
    %288 = arith.addf %285, %287 : vector<8x32xf32>
    %c0_101 = arith.constant 0 : index
    %c0_102 = arith.constant 0 : index
    %c0_103 = arith.constant 0 : index
    %289 = vector.load %arg15[%c0_101, %c0_102, %c0_103] : memref<2x32x64xf32, #tpu.memory_space<vmem>>, vector<1x32x64xf32>
    %290 = vector.shape_cast %289 : vector<1x32x64xf32> to vector<32x64xf32>
    %cst_104 = arith.constant dense<0.000000e+00> : vector<8x64xf32>
    %291 = tpu.matmul %288, %290, %cst_104 {dimension_numbers = #tpu.dot_dimension_numbers<[1], [0], [0], [1], [0, 0, 1, 1], [], []>} : vector<8x32xf32>, vector<32x64xf32>, vector<8x64xf32> -> vector<8x64xf32>
    %c0_105 = arith.constant 0 : index
    %c0_106 = arith.constant 0 : index
    %292 = vector.load %arg16[%c0_105, %c0_106] : memref<2x64xf32, #tpu.memory_space<vmem>>, vector<1x64xf32>
    %293 = vector.shape_cast %292 : vector<1x64xf32> to vector<64xf32>
    %294 = vector.shape_cast %293 : vector<64xf32> to vector<1x64xf32>
    %295 = vector.broadcast %294 : vector<1x64xf32> to vector<8x64xf32>
    %296 = arith.addf %291, %295 : vector<8x64xf32>
    %cst_107 = arith.constant 0.000000e+00 : f32
    %297 = vector.broadcast %cst_107 : f32 to vector<8x64xf32>
    %298 = arith.maximumf %296, %297 : vector<8x64xf32>
    %c0_108 = arith.constant 0 : index
    %c0_109 = arith.constant 0 : index
    %c0_110 = arith.constant 0 : index
    %299 = vector.load %arg17[%c0_108, %c0_109, %c0_110] : memref<2x64x32xf32, #tpu.memory_space<vmem>>, vector<1x64x32xf32>
    %300 = vector.shape_cast %299 : vector<1x64x32xf32> to vector<64x32xf32>
    %cst_111 = arith.constant dense<0.000000e+00> : vector<8x32xf32>
    %301 = tpu.matmul %298, %300, %cst_111 {dimension_numbers = #tpu.dot_dimension_numbers<[1], [0], [0], [1], [0, 0, 1, 1], [], []>} : vector<8x64xf32>, vector<64x32xf32>, vector<8x32xf32> -> vector<8x32xf32>
    %302 = arith.addf %260, %301 : vector<8x32xf32>
    %c0_112 = arith.constant 0 : index
    %c0_113 = arith.constant 0 : index
    %303 = vector.load %arg18[%c0_112, %c0_113] : memref<2x32xf32, #tpu.memory_space<vmem>>, vector<1x32xf32>
    %304 = vector.shape_cast %303 : vector<1x32xf32> to vector<32xf32>
    %305 = vector.shape_cast %304 : vector<32xf32> to vector<1x32xf32>
    %306 = vector.broadcast %305 : vector<1x32xf32> to vector<8x32xf32>
    %307 = arith.addf %302, %306 : vector<8x32xf32>
    %c1 = arith.constant 1 : index
    %c0_114 = arith.constant 0 : index
    %c0_115 = arith.constant 0 : index
    %308 = vector.load %arg19[%c1, %c0_114, %c0_115] : memref<2x3x32xf32, #tpu.memory_space<vmem>>, vector<1x3x32xf32>
    %309 = vector.shape_cast %308 : vector<1x3x32xf32> to vector<3x32xf32>
    %c1_116 = arith.constant 1 : index
    %c0_117 = arith.constant 0 : index
    %c0_118 = arith.constant 0 : index
    %310 = vector.load %arg20[%c1_116, %c0_117, %c0_118] : memref<2x3x32xf32, #tpu.memory_space<vmem>>, vector<1x3x32xf32>
    %311 = vector.shape_cast %310 : vector<1x3x32xf32> to vector<3x32xf32>
    %312 = vector.extract_strided_slice %309 {offsets = [0, 0], sizes = [1, 32], strides = [1, 1]} : vector<3x32xf32> to vector<1x32xf32>
    %313 = vector.shape_cast %312 : vector<1x32xf32> to vector<32xf32>
    %314 = vector.extract_strided_slice %311 {offsets = [0, 0], sizes = [1, 32], strides = [1, 1]} : vector<3x32xf32> to vector<1x32xf32>
    %315 = vector.shape_cast %314 : vector<1x32xf32> to vector<32xf32>
    %cst_119 = arith.constant dense<0.000000e+00> : vector<8xf32>
    %316 = vector.multi_reduction <add>, %307, %cst_119 [1] : vector<8x32xf32> to vector<8xf32>
    %317 = vector.shape_cast %316 : vector<8xf32> to vector<8x1xf32>
    %cst_120 = arith.constant 3.200000e+01 : f32
    %318 = vector.broadcast %cst_120 : f32 to vector<8x1xf32>
    %319 = arith.divf %317, %318 : vector<8x1xf32>
    %320 = vector.broadcast %319 : vector<8x1xf32> to vector<8x32xf32>
    %321 = arith.subf %307, %320 : vector<8x32xf32>
    %322 = arith.mulf %321, %321 : vector<8x32xf32>
    %cst_121 = arith.constant dense<0.000000e+00> : vector<8xf32>
    %323 = vector.multi_reduction <add>, %322, %cst_121 [1] : vector<8x32xf32> to vector<8xf32>
    %324 = vector.shape_cast %323 : vector<8xf32> to vector<8x1xf32>
    %cst_122 = arith.constant 3.200000e+01 : f32
    %325 = vector.broadcast %cst_122 : f32 to vector<8x1xf32>
    %326 = arith.divf %324, %325 : vector<8x1xf32>
    %327 = vector.broadcast %319 : vector<8x1xf32> to vector<8x32xf32>
    %328 = arith.subf %307, %327 : vector<8x32xf32>
    %cst_123 = arith.constant 9.99999974E-6 : f32
    %329 = vector.broadcast %cst_123 : f32 to vector<8x1xf32>
    %330 = arith.addf %326, %329 : vector<8x1xf32>
    %331 = math.rsqrt %330 : vector<8x1xf32>
    %332 = vector.broadcast %331 : vector<8x1xf32> to vector<8x32xf32>
    %333 = arith.mulf %328, %332 : vector<8x32xf32>
    %334 = vector.shape_cast %313 : vector<32xf32> to vector<1x32xf32>
    %335 = vector.broadcast %334 : vector<1x32xf32> to vector<8x32xf32>
    %336 = arith.mulf %333, %335 : vector<8x32xf32>
    %337 = vector.shape_cast %315 : vector<32xf32> to vector<1x32xf32>
    %338 = vector.broadcast %337 : vector<1x32xf32> to vector<8x32xf32>
    %339 = arith.addf %336, %338 : vector<8x32xf32>
    %c1_124 = arith.constant 1 : index
    %c0_125 = arith.constant 0 : index
    %c0_126 = arith.constant 0 : index
    %340 = vector.load %arg5[%c1_124, %c0_125, %c0_126] : memref<2x32x96xf32, #tpu.memory_space<vmem>>, vector<1x32x96xf32>
    %341 = vector.shape_cast %340 : vector<1x32x96xf32> to vector<32x96xf32>
    %cst_127 = arith.constant dense<0.000000e+00> : vector<8x96xf32>
    %342 = tpu.matmul %339, %341, %cst_127 {dimension_numbers = #tpu.dot_dimension_numbers<[1], [0], [0], [1], [0, 0, 1, 1], [], []>} : vector<8x32xf32>, vector<32x96xf32>, vector<8x96xf32> -> vector<8x96xf32>
    %c1_128 = arith.constant 1 : index
    %c0_129 = arith.constant 0 : index
    %343 = vector.load %arg6[%c1_128, %c0_129] : memref<2x96xf32, #tpu.memory_space<vmem>>, vector<1x96xf32>
    %344 = vector.shape_cast %343 : vector<1x96xf32> to vector<96xf32>
    %345 = vector.shape_cast %344 : vector<96xf32> to vector<1x96xf32>
    %346 = vector.broadcast %345 : vector<1x96xf32> to vector<8x96xf32>
    %347 = arith.addf %342, %346 : vector<8x96xf32>
    %348 = vector.extract_strided_slice %347 {offsets = [0, 0], sizes = [8, 32], strides = [1, 1]} : vector<8x96xf32> to vector<8x32xf32>
    %349 = vector.extract_strided_slice %347 {offsets = [0, 32], sizes = [8, 32], strides = [1, 1]} : vector<8x96xf32> to vector<8x32xf32>
    %350 = vector.extract_strided_slice %347 {offsets = [0, 64], sizes = [8, 32], strides = [1, 1]} : vector<8x96xf32> to vector<8x32xf32>
    %351 = vector.extract_strided_slice %348 {offsets = [0, 0], sizes = [8, 8], strides = [1, 1]} : vector<8x32xf32> to vector<8x8xf32>
    %352 = vector.extract_strided_slice %349 {offsets = [0, 0], sizes = [8, 8], strides = [1, 1]} : vector<8x32xf32> to vector<8x8xf32>
    %353 = vector.extract_strided_slice %350 {offsets = [0, 0], sizes = [8, 8], strides = [1, 1]} : vector<8x32xf32> to vector<8x8xf32>
    %cst_130 = arith.constant dense<0.000000e+00> : vector<8x8xf32>
    %354 = tpu.matmul %351, %352, %cst_130 {dimension_numbers = #tpu.dot_dimension_numbers<[1], [1], [0], [0], [0, 0, 1, 0], [], []>} : vector<8x8xf32>, vector<8x8xf32>, vector<8x8xf32> -> vector<8x8xf32>
    %cst_131 = arith.constant 0.353553385 : f32
    %355 = vector.broadcast %cst_131 : f32 to vector<8x8xf32>
    %356 = arith.mulf %354, %355 : vector<8x8xf32>
    %357 = arith.addf %356, %5 : vector<8x8xf32>
    %cst_132 = arith.constant dense<0xFF800000> : vector<8xf32>
    %358 = vector.multi_reduction <maximumf>, %357, %cst_132 [1] : vector<8x8xf32> to vector<8xf32>
    %359 = vector.shape_cast %358 : vector<8xf32> to vector<8x1xf32>
    %360 = vector.broadcast %359 : vector<8x1xf32> to vector<8x8xf32>
    %361 = arith.subf %357, %360 : vector<8x8xf32>
    %362 = math.exp %361 : vector<8x8xf32>
    %cst_133 = arith.constant dense<0.000000e+00> : vector<8xf32>
    %363 = vector.multi_reduction <add>, %362, %cst_133 [1] : vector<8x8xf32> to vector<8xf32>
    %364 = vector.shape_cast %363 : vector<8xf32> to vector<8x1xf32>
    %365 = tpu.reciprocal %364 {approx = true} : vector<8x1xf32> -> vector<8x1xf32>
    %366 = vector.broadcast %365 : vector<8x1xf32> to vector<8x8xf32>
    %367 = arith.mulf %362, %366 : vector<8x8xf32>
    %cst_134 = arith.constant dense<0.000000e+00> : vector<8x8xf32>
    %368 = tpu.matmul %367, %353, %cst_134 {dimension_numbers = #tpu.dot_dimension_numbers<[1], [0], [0], [1], [0, 0, 1, 1], [], []>} : vector<8x8xf32>, vector<8x8xf32>, vector<8x8xf32> -> vector<8x8xf32>
    %369 = vector.extract_strided_slice %348 {offsets = [0, 8], sizes = [8, 8], strides = [1, 1]} : vector<8x32xf32> to vector<8x8xf32>
    %370 = vector.extract_strided_slice %349 {offsets = [0, 8], sizes = [8, 8], strides = [1, 1]} : vector<8x32xf32> to vector<8x8xf32>
    %371 = vector.extract_strided_slice %350 {offsets = [0, 8], sizes = [8, 8], strides = [1, 1]} : vector<8x32xf32> to vector<8x8xf32>
    %cst_135 = arith.constant dense<0.000000e+00> : vector<8x8xf32>
    %372 = tpu.matmul %369, %370, %cst_135 {dimension_numbers = #tpu.dot_dimension_numbers<[1], [1], [0], [0], [0, 0, 1, 0], [], []>} : vector<8x8xf32>, vector<8x8xf32>, vector<8x8xf32> -> vector<8x8xf32>
    %cst_136 = arith.constant 0.353553385 : f32
    %373 = vector.broadcast %cst_136 : f32 to vector<8x8xf32>
    %374 = arith.mulf %372, %373 : vector<8x8xf32>
    %375 = arith.addf %374, %5 : vector<8x8xf32>
    %cst_137 = arith.constant dense<0xFF800000> : vector<8xf32>
    %376 = vector.multi_reduction <maximumf>, %375, %cst_137 [1] : vector<8x8xf32> to vector<8xf32>
    %377 = vector.shape_cast %376 : vector<8xf32> to vector<8x1xf32>
    %378 = vector.broadcast %377 : vector<8x1xf32> to vector<8x8xf32>
    %379 = arith.subf %375, %378 : vector<8x8xf32>
    %380 = math.exp %379 : vector<8x8xf32>
    %cst_138 = arith.constant dense<0.000000e+00> : vector<8xf32>
    %381 = vector.multi_reduction <add>, %380, %cst_138 [1] : vector<8x8xf32> to vector<8xf32>
    %382 = vector.shape_cast %381 : vector<8xf32> to vector<8x1xf32>
    %383 = tpu.reciprocal %382 {approx = true} : vector<8x1xf32> -> vector<8x1xf32>
    %384 = vector.broadcast %383 : vector<8x1xf32> to vector<8x8xf32>
    %385 = arith.mulf %380, %384 : vector<8x8xf32>
    %cst_139 = arith.constant dense<0.000000e+00> : vector<8x8xf32>
    %386 = tpu.matmul %385, %371, %cst_139 {dimension_numbers = #tpu.dot_dimension_numbers<[1], [0], [0], [1], [0, 0, 1, 1], [], []>} : vector<8x8xf32>, vector<8x8xf32>, vector<8x8xf32> -> vector<8x8xf32>
    %387 = vector.extract_strided_slice %348 {offsets = [0, 16], sizes = [8, 8], strides = [1, 1]} : vector<8x32xf32> to vector<8x8xf32>
    %388 = vector.extract_strided_slice %349 {offsets = [0, 16], sizes = [8, 8], strides = [1, 1]} : vector<8x32xf32> to vector<8x8xf32>
    %389 = vector.extract_strided_slice %350 {offsets = [0, 16], sizes = [8, 8], strides = [1, 1]} : vector<8x32xf32> to vector<8x8xf32>
    %cst_140 = arith.constant dense<0.000000e+00> : vector<8x8xf32>
    %390 = tpu.matmul %387, %388, %cst_140 {dimension_numbers = #tpu.dot_dimension_numbers<[1], [1], [0], [0], [0, 0, 1, 0], [], []>} : vector<8x8xf32>, vector<8x8xf32>, vector<8x8xf32> -> vector<8x8xf32>
    %cst_141 = arith.constant 0.353553385 : f32
    %391 = vector.broadcast %cst_141 : f32 to vector<8x8xf32>
    %392 = arith.mulf %390, %391 : vector<8x8xf32>
    %393 = arith.addf %392, %5 : vector<8x8xf32>
    %cst_142 = arith.constant dense<0xFF800000> : vector<8xf32>
    %394 = vector.multi_reduction <maximumf>, %393, %cst_142 [1] : vector<8x8xf32> to vector<8xf32>
    %395 = vector.shape_cast %394 : vector<8xf32> to vector<8x1xf32>
    %396 = vector.broadcast %395 : vector<8x1xf32> to vector<8x8xf32>
    %397 = arith.subf %393, %396 : vector<8x8xf32>
    %398 = math.exp %397 : vector<8x8xf32>
    %cst_143 = arith.constant dense<0.000000e+00> : vector<8xf32>
    %399 = vector.multi_reduction <add>, %398, %cst_143 [1] : vector<8x8xf32> to vector<8xf32>
    %400 = vector.shape_cast %399 : vector<8xf32> to vector<8x1xf32>
    %401 = tpu.reciprocal %400 {approx = true} : vector<8x1xf32> -> vector<8x1xf32>
    %402 = vector.broadcast %401 : vector<8x1xf32> to vector<8x8xf32>
    %403 = arith.mulf %398, %402 : vector<8x8xf32>
    %cst_144 = arith.constant dense<0.000000e+00> : vector<8x8xf32>
    %404 = tpu.matmul %403, %389, %cst_144 {dimension_numbers = #tpu.dot_dimension_numbers<[1], [0], [0], [1], [0, 0, 1, 1], [], []>} : vector<8x8xf32>, vector<8x8xf32>, vector<8x8xf32> -> vector<8x8xf32>
    %405 = vector.extract_strided_slice %348 {offsets = [0, 24], sizes = [8, 8], strides = [1, 1]} : vector<8x32xf32> to vector<8x8xf32>
    %406 = vector.extract_strided_slice %349 {offsets = [0, 24], sizes = [8, 8], strides = [1, 1]} : vector<8x32xf32> to vector<8x8xf32>
    %407 = vector.extract_strided_slice %350 {offsets = [0, 24], sizes = [8, 8], strides = [1, 1]} : vector<8x32xf32> to vector<8x8xf32>
    %cst_145 = arith.constant dense<0.000000e+00> : vector<8x8xf32>
    %408 = tpu.matmul %405, %406, %cst_145 {dimension_numbers = #tpu.dot_dimension_numbers<[1], [1], [0], [0], [0, 0, 1, 0], [], []>} : vector<8x8xf32>, vector<8x8xf32>, vector<8x8xf32> -> vector<8x8xf32>
    %cst_146 = arith.constant 0.353553385 : f32
    %409 = vector.broadcast %cst_146 : f32 to vector<8x8xf32>
    %410 = arith.mulf %408, %409 : vector<8x8xf32>
    %411 = arith.addf %410, %5 : vector<8x8xf32>
    %cst_147 = arith.constant dense<0xFF800000> : vector<8xf32>
    %412 = vector.multi_reduction <maximumf>, %411, %cst_147 [1] : vector<8x8xf32> to vector<8xf32>
    %413 = vector.shape_cast %412 : vector<8xf32> to vector<8x1xf32>
    %414 = vector.broadcast %413 : vector<8x1xf32> to vector<8x8xf32>
    %415 = arith.subf %411, %414 : vector<8x8xf32>
    %416 = math.exp %415 : vector<8x8xf32>
    %cst_148 = arith.constant dense<0.000000e+00> : vector<8xf32>
    %417 = vector.multi_reduction <add>, %416, %cst_148 [1] : vector<8x8xf32> to vector<8xf32>
    %418 = vector.shape_cast %417 : vector<8xf32> to vector<8x1xf32>
    %419 = tpu.reciprocal %418 {approx = true} : vector<8x1xf32> -> vector<8x1xf32>
    %420 = vector.broadcast %419 : vector<8x1xf32> to vector<8x8xf32>
    %421 = arith.mulf %416, %420 : vector<8x8xf32>
    %cst_149 = arith.constant dense<0.000000e+00> : vector<8x8xf32>
    %422 = tpu.matmul %421, %407, %cst_149 {dimension_numbers = #tpu.dot_dimension_numbers<[1], [0], [0], [1], [0, 0, 1, 1], [], []>} : vector<8x8xf32>, vector<8x8xf32>, vector<8x8xf32> -> vector<8x8xf32>
    %423 = tpu.concatenate %368, %386, %404, %422 in 1 : vector<8x8xf32>, vector<8x8xf32>, vector<8x8xf32>, vector<8x8xf32> -> vector<8x32xf32>
    %c1_150 = arith.constant 1 : index
    %c0_151 = arith.constant 0 : index
    %c0_152 = arith.constant 0 : index
    %424 = vector.load %arg7[%c1_150, %c0_151, %c0_152] : memref<2x32x32xf32, #tpu.memory_space<vmem>>, vector<1x32x32xf32>
    %425 = vector.shape_cast %424 : vector<1x32x32xf32> to vector<32x32xf32>
    %cst_153 = arith.constant dense<0.000000e+00> : vector<8x32xf32>
    %426 = tpu.matmul %423, %425, %cst_153 {dimension_numbers = #tpu.dot_dimension_numbers<[1], [0], [0], [1], [0, 0, 1, 1], [], []>} : vector<8x32xf32>, vector<32x32xf32>, vector<8x32xf32> -> vector<8x32xf32>
    %427 = arith.addf %307, %426 : vector<8x32xf32>
    %c1_154 = arith.constant 1 : index
    %c0_155 = arith.constant 0 : index
    %428 = vector.load %arg8[%c1_154, %c0_155] : memref<2x32xf32, #tpu.memory_space<vmem>>, vector<1x32xf32>
    %429 = vector.shape_cast %428 : vector<1x32xf32> to vector<32xf32>
    %430 = vector.shape_cast %429 : vector<32xf32> to vector<1x32xf32>
    %431 = vector.broadcast %430 : vector<1x32xf32> to vector<8x32xf32>
    %432 = arith.addf %427, %431 : vector<8x32xf32>
    %433 = vector.extract_strided_slice %309 {offsets = [1, 0], sizes = [1, 32], strides = [1, 1]} : vector<3x32xf32> to vector<1x32xf32>
    %434 = vector.shape_cast %433 : vector<1x32xf32> to vector<32xf32>
    %435 = vector.extract_strided_slice %311 {offsets = [1, 0], sizes = [1, 32], strides = [1, 1]} : vector<3x32xf32> to vector<1x32xf32>
    %436 = vector.shape_cast %435 : vector<1x32xf32> to vector<32xf32>
    %cst_156 = arith.constant dense<0.000000e+00> : vector<8xf32>
    %437 = vector.multi_reduction <add>, %432, %cst_156 [1] : vector<8x32xf32> to vector<8xf32>
    %438 = vector.shape_cast %437 : vector<8xf32> to vector<8x1xf32>
    %cst_157 = arith.constant 3.200000e+01 : f32
    %439 = vector.broadcast %cst_157 : f32 to vector<8x1xf32>
    %440 = arith.divf %438, %439 : vector<8x1xf32>
    %441 = vector.broadcast %440 : vector<8x1xf32> to vector<8x32xf32>
    %442 = arith.subf %432, %441 : vector<8x32xf32>
    %443 = arith.mulf %442, %442 : vector<8x32xf32>
    %cst_158 = arith.constant dense<0.000000e+00> : vector<8xf32>
    %444 = vector.multi_reduction <add>, %443, %cst_158 [1] : vector<8x32xf32> to vector<8xf32>
    %445 = vector.shape_cast %444 : vector<8xf32> to vector<8x1xf32>
    %cst_159 = arith.constant 3.200000e+01 : f32
    %446 = vector.broadcast %cst_159 : f32 to vector<8x1xf32>
    %447 = arith.divf %445, %446 : vector<8x1xf32>
    %448 = vector.broadcast %440 : vector<8x1xf32> to vector<8x32xf32>
    %449 = arith.subf %432, %448 : vector<8x32xf32>
    %cst_160 = arith.constant 9.99999974E-6 : f32
    %450 = vector.broadcast %cst_160 : f32 to vector<8x1xf32>
    %451 = arith.addf %447, %450 : vector<8x1xf32>
    %452 = math.rsqrt %451 : vector<8x1xf32>
    %453 = vector.broadcast %452 : vector<8x1xf32> to vector<8x32xf32>
    %454 = arith.mulf %449, %453 : vector<8x32xf32>
    %455 = vector.shape_cast %434 : vector<32xf32> to vector<1x32xf32>
    %456 = vector.broadcast %455 : vector<1x32xf32> to vector<8x32xf32>
    %457 = arith.mulf %454, %456 : vector<8x32xf32>
    %458 = vector.shape_cast %436 : vector<32xf32> to vector<1x32xf32>
    %459 = vector.broadcast %458 : vector<1x32xf32> to vector<8x32xf32>
    %460 = arith.addf %457, %459 : vector<8x32xf32>
    %c1_161 = arith.constant 1 : index
    %c0_162 = arith.constant 0 : index
    %c0_163 = arith.constant 0 : index
    %461 = vector.load %arg9[%c1_161, %c0_162, %c0_163] : memref<2x32x32xf32, #tpu.memory_space<vmem>>, vector<1x32x32xf32>
    %462 = vector.shape_cast %461 : vector<1x32x32xf32> to vector<32x32xf32>
    %cst_164 = arith.constant dense<0.000000e+00> : vector<8x32xf32>
    %463 = tpu.matmul %460, %462, %cst_164 {dimension_numbers = #tpu.dot_dimension_numbers<[1], [0], [0], [1], [0, 0, 1, 1], [], []>} : vector<8x32xf32>, vector<32x32xf32>, vector<8x32xf32> -> vector<8x32xf32>
    %c1_165 = arith.constant 1 : index
    %c0_166 = arith.constant 0 : index
    %464 = vector.load %arg10[%c1_165, %c0_166] : memref<2x32xf32, #tpu.memory_space<vmem>>, vector<1x32xf32>
    %465 = vector.shape_cast %464 : vector<1x32xf32> to vector<32xf32>
    %466 = vector.shape_cast %465 : vector<32xf32> to vector<1x32xf32>
    %467 = vector.broadcast %466 : vector<1x32xf32> to vector<8x32xf32>
    %468 = arith.addf %463, %467 : vector<8x32xf32>
    %c1_167 = arith.constant 1 : index
    %c0_168 = arith.constant 0 : index
    %c0_169 = arith.constant 0 : index
    %469 = vector.load %arg11[%c1_167, %c0_168, %c0_169] : memref<2x32x64xf32, #tpu.memory_space<vmem>>, vector<1x32x64xf32>
    %470 = vector.shape_cast %469 : vector<1x32x64xf32> to vector<32x64xf32>
    %cst_170 = arith.constant dense<0.000000e+00> : vector<8x64xf32>
    %471 = tpu.matmul %3, %470, %cst_170 {dimension_numbers = #tpu.dot_dimension_numbers<[1], [0], [0], [1], [0, 0, 1, 1], [], []>} : vector<8x32xf32>, vector<32x64xf32>, vector<8x64xf32> -> vector<8x64xf32>
    %c1_171 = arith.constant 1 : index
    %c0_172 = arith.constant 0 : index
    %472 = vector.load %arg12[%c1_171, %c0_172] : memref<2x64xf32, #tpu.memory_space<vmem>>, vector<1x64xf32>
    %473 = vector.shape_cast %472 : vector<1x64xf32> to vector<64xf32>
    %474 = vector.shape_cast %473 : vector<64xf32> to vector<1x64xf32>
    %475 = vector.broadcast %474 : vector<1x64xf32> to vector<8x64xf32>
    %476 = arith.addf %471, %475 : vector<8x64xf32>
    %477 = vector.extract_strided_slice %476 {offsets = [0, 0], sizes = [8, 32], strides = [1, 1]} : vector<8x64xf32> to vector<8x32xf32>
    %478 = vector.extract_strided_slice %476 {offsets = [0, 32], sizes = [8, 32], strides = [1, 1]} : vector<8x64xf32> to vector<8x32xf32>
    %479 = vector.extract_strided_slice %468 {offsets = [0, 0], sizes = [8, 8], strides = [1, 1]} : vector<8x32xf32> to vector<8x8xf32>
    %480 = vector.extract_strided_slice %477 {offsets = [0, 0], sizes = [8, 8], strides = [1, 1]} : vector<8x32xf32> to vector<8x8xf32>
    %481 = vector.extract_strided_slice %478 {offsets = [0, 0], sizes = [8, 8], strides = [1, 1]} : vector<8x32xf32> to vector<8x8xf32>
    %cst_173 = arith.constant dense<0.000000e+00> : vector<8x8xf32>
    %482 = tpu.matmul %479, %480, %cst_173 {dimension_numbers = #tpu.dot_dimension_numbers<[1], [1], [0], [0], [0, 0, 1, 0], [], []>} : vector<8x8xf32>, vector<8x8xf32>, vector<8x8xf32> -> vector<8x8xf32>
    %cst_174 = arith.constant 0.353553385 : f32
    %483 = vector.broadcast %cst_174 : f32 to vector<8x8xf32>
    %484 = arith.mulf %482, %483 : vector<8x8xf32>
    %485 = arith.addf %484, %7 : vector<8x8xf32>
    %cst_175 = arith.constant dense<0xFF800000> : vector<8xf32>
    %486 = vector.multi_reduction <maximumf>, %485, %cst_175 [1] : vector<8x8xf32> to vector<8xf32>
    %487 = vector.shape_cast %486 : vector<8xf32> to vector<8x1xf32>
    %488 = vector.broadcast %487 : vector<8x1xf32> to vector<8x8xf32>
    %489 = arith.subf %485, %488 : vector<8x8xf32>
    %490 = math.exp %489 : vector<8x8xf32>
    %cst_176 = arith.constant dense<0.000000e+00> : vector<8xf32>
    %491 = vector.multi_reduction <add>, %490, %cst_176 [1] : vector<8x8xf32> to vector<8xf32>
    %492 = vector.shape_cast %491 : vector<8xf32> to vector<8x1xf32>
    %493 = tpu.reciprocal %492 {approx = true} : vector<8x1xf32> -> vector<8x1xf32>
    %494 = vector.broadcast %493 : vector<8x1xf32> to vector<8x8xf32>
    %495 = arith.mulf %490, %494 : vector<8x8xf32>
    %cst_177 = arith.constant dense<0.000000e+00> : vector<8x8xf32>
    %496 = tpu.matmul %495, %481, %cst_177 {dimension_numbers = #tpu.dot_dimension_numbers<[1], [0], [0], [1], [0, 0, 1, 1], [], []>} : vector<8x8xf32>, vector<8x8xf32>, vector<8x8xf32> -> vector<8x8xf32>
    %497 = vector.extract_strided_slice %468 {offsets = [0, 8], sizes = [8, 8], strides = [1, 1]} : vector<8x32xf32> to vector<8x8xf32>
    %498 = vector.extract_strided_slice %477 {offsets = [0, 8], sizes = [8, 8], strides = [1, 1]} : vector<8x32xf32> to vector<8x8xf32>
    %499 = vector.extract_strided_slice %478 {offsets = [0, 8], sizes = [8, 8], strides = [1, 1]} : vector<8x32xf32> to vector<8x8xf32>
    %cst_178 = arith.constant dense<0.000000e+00> : vector<8x8xf32>
    %500 = tpu.matmul %497, %498, %cst_178 {dimension_numbers = #tpu.dot_dimension_numbers<[1], [1], [0], [0], [0, 0, 1, 0], [], []>} : vector<8x8xf32>, vector<8x8xf32>, vector<8x8xf32> -> vector<8x8xf32>
    %cst_179 = arith.constant 0.353553385 : f32
    %501 = vector.broadcast %cst_179 : f32 to vector<8x8xf32>
    %502 = arith.mulf %500, %501 : vector<8x8xf32>
    %503 = arith.addf %502, %7 : vector<8x8xf32>
    %cst_180 = arith.constant dense<0xFF800000> : vector<8xf32>
    %504 = vector.multi_reduction <maximumf>, %503, %cst_180 [1] : vector<8x8xf32> to vector<8xf32>
    %505 = vector.shape_cast %504 : vector<8xf32> to vector<8x1xf32>
    %506 = vector.broadcast %505 : vector<8x1xf32> to vector<8x8xf32>
    %507 = arith.subf %503, %506 : vector<8x8xf32>
    %508 = math.exp %507 : vector<8x8xf32>
    %cst_181 = arith.constant dense<0.000000e+00> : vector<8xf32>
    %509 = vector.multi_reduction <add>, %508, %cst_181 [1] : vector<8x8xf32> to vector<8xf32>
    %510 = vector.shape_cast %509 : vector<8xf32> to vector<8x1xf32>
    %511 = tpu.reciprocal %510 {approx = true} : vector<8x1xf32> -> vector<8x1xf32>
    %512 = vector.broadcast %511 : vector<8x1xf32> to vector<8x8xf32>
    %513 = arith.mulf %508, %512 : vector<8x8xf32>
    %cst_182 = arith.constant dense<0.000000e+00> : vector<8x8xf32>
    %514 = tpu.matmul %513, %499, %cst_182 {dimension_numbers = #tpu.dot_dimension_numbers<[1], [0], [0], [1], [0, 0, 1, 1], [], []>} : vector<8x8xf32>, vector<8x8xf32>, vector<8x8xf32> -> vector<8x8xf32>
    %515 = vector.extract_strided_slice %468 {offsets = [0, 16], sizes = [8, 8], strides = [1, 1]} : vector<8x32xf32> to vector<8x8xf32>
    %516 = vector.extract_strided_slice %477 {offsets = [0, 16], sizes = [8, 8], strides = [1, 1]} : vector<8x32xf32> to vector<8x8xf32>
    %517 = vector.extract_strided_slice %478 {offsets = [0, 16], sizes = [8, 8], strides = [1, 1]} : vector<8x32xf32> to vector<8x8xf32>
    %cst_183 = arith.constant dense<0.000000e+00> : vector<8x8xf32>
    %518 = tpu.matmul %515, %516, %cst_183 {dimension_numbers = #tpu.dot_dimension_numbers<[1], [1], [0], [0], [0, 0, 1, 0], [], []>} : vector<8x8xf32>, vector<8x8xf32>, vector<8x8xf32> -> vector<8x8xf32>
    %cst_184 = arith.constant 0.353553385 : f32
    %519 = vector.broadcast %cst_184 : f32 to vector<8x8xf32>
    %520 = arith.mulf %518, %519 : vector<8x8xf32>
    %521 = arith.addf %520, %7 : vector<8x8xf32>
    %cst_185 = arith.constant dense<0xFF800000> : vector<8xf32>
    %522 = vector.multi_reduction <maximumf>, %521, %cst_185 [1] : vector<8x8xf32> to vector<8xf32>
    %523 = vector.shape_cast %522 : vector<8xf32> to vector<8x1xf32>
    %524 = vector.broadcast %523 : vector<8x1xf32> to vector<8x8xf32>
    %525 = arith.subf %521, %524 : vector<8x8xf32>
    %526 = math.exp %525 : vector<8x8xf32>
    %cst_186 = arith.constant dense<0.000000e+00> : vector<8xf32>
    %527 = vector.multi_reduction <add>, %526, %cst_186 [1] : vector<8x8xf32> to vector<8xf32>
    %528 = vector.shape_cast %527 : vector<8xf32> to vector<8x1xf32>
    %529 = tpu.reciprocal %528 {approx = true} : vector<8x1xf32> -> vector<8x1xf32>
    %530 = vector.broadcast %529 : vector<8x1xf32> to vector<8x8xf32>
    %531 = arith.mulf %526, %530 : vector<8x8xf32>
    %cst_187 = arith.constant dense<0.000000e+00> : vector<8x8xf32>
    %532 = tpu.matmul %531, %517, %cst_187 {dimension_numbers = #tpu.dot_dimension_numbers<[1], [0], [0], [1], [0, 0, 1, 1], [], []>} : vector<8x8xf32>, vector<8x8xf32>, vector<8x8xf32> -> vector<8x8xf32>
    %533 = vector.extract_strided_slice %468 {offsets = [0, 24], sizes = [8, 8], strides = [1, 1]} : vector<8x32xf32> to vector<8x8xf32>
    %534 = vector.extract_strided_slice %477 {offsets = [0, 24], sizes = [8, 8], strides = [1, 1]} : vector<8x32xf32> to vector<8x8xf32>
    %535 = vector.extract_strided_slice %478 {offsets = [0, 24], sizes = [8, 8], strides = [1, 1]} : vector<8x32xf32> to vector<8x8xf32>
    %cst_188 = arith.constant dense<0.000000e+00> : vector<8x8xf32>
    %536 = tpu.matmul %533, %534, %cst_188 {dimension_numbers = #tpu.dot_dimension_numbers<[1], [1], [0], [0], [0, 0, 1, 0], [], []>} : vector<8x8xf32>, vector<8x8xf32>, vector<8x8xf32> -> vector<8x8xf32>
    %cst_189 = arith.constant 0.353553385 : f32
    %537 = vector.broadcast %cst_189 : f32 to vector<8x8xf32>
    %538 = arith.mulf %536, %537 : vector<8x8xf32>
    %539 = arith.addf %538, %7 : vector<8x8xf32>
    %cst_190 = arith.constant dense<0xFF800000> : vector<8xf32>
    %540 = vector.multi_reduction <maximumf>, %539, %cst_190 [1] : vector<8x8xf32> to vector<8xf32>
    %541 = vector.shape_cast %540 : vector<8xf32> to vector<8x1xf32>
    %542 = vector.broadcast %541 : vector<8x1xf32> to vector<8x8xf32>
    %543 = arith.subf %539, %542 : vector<8x8xf32>
    %544 = math.exp %543 : vector<8x8xf32>
    %cst_191 = arith.constant dense<0.000000e+00> : vector<8xf32>
    %545 = vector.multi_reduction <add>, %544, %cst_191 [1] : vector<8x8xf32> to vector<8xf32>
    %546 = vector.shape_cast %545 : vector<8xf32> to vector<8x1xf32>
    %547 = tpu.reciprocal %546 {approx = true} : vector<8x1xf32> -> vector<8x1xf32>
    %548 = vector.broadcast %547 : vector<8x1xf32> to vector<8x8xf32>
    %549 = arith.mulf %544, %548 : vector<8x8xf32>
    %cst_192 = arith.constant dense<0.000000e+00> : vector<8x8xf32>
    %550 = tpu.matmul %549, %535, %cst_192 {dimension_numbers = #tpu.dot_dimension_numbers<[1], [0], [0], [1], [0, 0, 1, 1], [], []>} : vector<8x8xf32>, vector<8x8xf32>, vector<8x8xf32> -> vector<8x8xf32>
    %551 = tpu.concatenate %496, %514, %532, %550 in 1 : vector<8x8xf32>, vector<8x8xf32>, vector<8x8xf32>, vector<8x8xf32> -> vector<8x32xf32>
    %c1_193 = arith.constant 1 : index
    %c0_194 = arith.constant 0 : index
    %c0_195 = arith.constant 0 : index
    %552 = vector.load %arg13[%c1_193, %c0_194, %c0_195] : memref<2x32x32xf32, #tpu.memory_space<vmem>>, vector<1x32x32xf32>
    %553 = vector.shape_cast %552 : vector<1x32x32xf32> to vector<32x32xf32>
    %cst_196 = arith.constant dense<0.000000e+00> : vector<8x32xf32>
    %554 = tpu.matmul %551, %553, %cst_196 {dimension_numbers = #tpu.dot_dimension_numbers<[1], [0], [0], [1], [0, 0, 1, 1], [], []>} : vector<8x32xf32>, vector<32x32xf32>, vector<8x32xf32> -> vector<8x32xf32>
    %555 = arith.addf %432, %554 : vector<8x32xf32>
    %c1_197 = arith.constant 1 : index
    %c0_198 = arith.constant 0 : index
    %556 = vector.load %arg14[%c1_197, %c0_198] : memref<2x32xf32, #tpu.memory_space<vmem>>, vector<1x32xf32>
    %557 = vector.shape_cast %556 : vector<1x32xf32> to vector<32xf32>
    %558 = vector.shape_cast %557 : vector<32xf32> to vector<1x32xf32>
    %559 = vector.broadcast %558 : vector<1x32xf32> to vector<8x32xf32>
    %560 = arith.addf %555, %559 : vector<8x32xf32>
    %561 = vector.extract_strided_slice %309 {offsets = [2, 0], sizes = [1, 32], strides = [1, 1]} : vector<3x32xf32> to vector<1x32xf32>
    %562 = vector.shape_cast %561 : vector<1x32xf32> to vector<32xf32>
    %563 = vector.extract_strided_slice %311 {offsets = [2, 0], sizes = [1, 32], strides = [1, 1]} : vector<3x32xf32> to vector<1x32xf32>
    %564 = vector.shape_cast %563 : vector<1x32xf32> to vector<32xf32>
    %cst_199 = arith.constant dense<0.000000e+00> : vector<8xf32>
    %565 = vector.multi_reduction <add>, %560, %cst_199 [1] : vector<8x32xf32> to vector<8xf32>
    %566 = vector.shape_cast %565 : vector<8xf32> to vector<8x1xf32>
    %cst_200 = arith.constant 3.200000e+01 : f32
    %567 = vector.broadcast %cst_200 : f32 to vector<8x1xf32>
    %568 = arith.divf %566, %567 : vector<8x1xf32>
    %569 = vector.broadcast %568 : vector<8x1xf32> to vector<8x32xf32>
    %570 = arith.subf %560, %569 : vector<8x32xf32>
    %571 = arith.mulf %570, %570 : vector<8x32xf32>
    %cst_201 = arith.constant dense<0.000000e+00> : vector<8xf32>
    %572 = vector.multi_reduction <add>, %571, %cst_201 [1] : vector<8x32xf32> to vector<8xf32>
    %573 = vector.shape_cast %572 : vector<8xf32> to vector<8x1xf32>
    %cst_202 = arith.constant 3.200000e+01 : f32
    %574 = vector.broadcast %cst_202 : f32 to vector<8x1xf32>
    %575 = arith.divf %573, %574 : vector<8x1xf32>
    %576 = vector.broadcast %568 : vector<8x1xf32> to vector<8x32xf32>
    %577 = arith.subf %560, %576 : vector<8x32xf32>
    %cst_203 = arith.constant 9.99999974E-6 : f32
    %578 = vector.broadcast %cst_203 : f32 to vector<8x1xf32>
    %579 = arith.addf %575, %578 : vector<8x1xf32>
    %580 = math.rsqrt %579 : vector<8x1xf32>
    %581 = vector.broadcast %580 : vector<8x1xf32> to vector<8x32xf32>
    %582 = arith.mulf %577, %581 : vector<8x32xf32>
    %583 = vector.shape_cast %562 : vector<32xf32> to vector<1x32xf32>
    %584 = vector.broadcast %583 : vector<1x32xf32> to vector<8x32xf32>
    %585 = arith.mulf %582, %584 : vector<8x32xf32>
    %586 = vector.shape_cast %564 : vector<32xf32> to vector<1x32xf32>
    %587 = vector.broadcast %586 : vector<1x32xf32> to vector<8x32xf32>
    %588 = arith.addf %585, %587 : vector<8x32xf32>
    %c1_204 = arith.constant 1 : index
    %c0_205 = arith.constant 0 : index
    %c0_206 = arith.constant 0 : index
    %589 = vector.load %arg15[%c1_204, %c0_205, %c0_206] : memref<2x32x64xf32, #tpu.memory_space<vmem>>, vector<1x32x64xf32>
    %590 = vector.shape_cast %589 : vector<1x32x64xf32> to vector<32x64xf32>
    %cst_207 = arith.constant dense<0.000000e+00> : vector<8x64xf32>
    %591 = tpu.matmul %588, %590, %cst_207 {dimension_numbers = #tpu.dot_dimension_numbers<[1], [0], [0], [1], [0, 0, 1, 1], [], []>} : vector<8x32xf32>, vector<32x64xf32>, vector<8x64xf32> -> vector<8x64xf32>
    %c1_208 = arith.constant 1 : index
    %c0_209 = arith.constant 0 : index
    %592 = vector.load %arg16[%c1_208, %c0_209] : memref<2x64xf32, #tpu.memory_space<vmem>>, vector<1x64xf32>
    %593 = vector.shape_cast %592 : vector<1x64xf32> to vector<64xf32>
    %594 = vector.shape_cast %593 : vector<64xf32> to vector<1x64xf32>
    %595 = vector.broadcast %594 : vector<1x64xf32> to vector<8x64xf32>
    %596 = arith.addf %591, %595 : vector<8x64xf32>
    %cst_210 = arith.constant 0.000000e+00 : f32
    %597 = vector.broadcast %cst_210 : f32 to vector<8x64xf32>
    %598 = arith.maximumf %596, %597 : vector<8x64xf32>
    %c1_211 = arith.constant 1 : index
    %c0_212 = arith.constant 0 : index
    %c0_213 = arith.constant 0 : index
    %599 = vector.load %arg17[%c1_211, %c0_212, %c0_213] : memref<2x64x32xf32, #tpu.memory_space<vmem>>, vector<1x64x32xf32>
    %600 = vector.shape_cast %599 : vector<1x64x32xf32> to vector<64x32xf32>
    %cst_214 = arith.constant dense<0.000000e+00> : vector<8x32xf32>
    %601 = tpu.matmul %598, %600, %cst_214 {dimension_numbers = #tpu.dot_dimension_numbers<[1], [0], [0], [1], [0, 0, 1, 1], [], []>} : vector<8x64xf32>, vector<64x32xf32>, vector<8x32xf32> -> vector<8x32xf32>
    %602 = arith.addf %560, %601 : vector<8x32xf32>
    %c1_215 = arith.constant 1 : index
    %c0_216 = arith.constant 0 : index
    %603 = vector.load %arg18[%c1_215, %c0_216] : memref<2x32xf32, #tpu.memory_space<vmem>>, vector<1x32xf32>
    %604 = vector.shape_cast %603 : vector<1x32xf32> to vector<32xf32>
    %605 = vector.shape_cast %604 : vector<32xf32> to vector<1x32xf32>
    %606 = vector.broadcast %605 : vector<1x32xf32> to vector<8x32xf32>
    %607 = arith.addf %602, %606 : vector<8x32xf32>
    %c0_217 = arith.constant 0 : index
    %c0_218 = arith.constant 0 : index
    %608 = vector.load %arg21[%c0_217, %c0_218] : memref<1x32xf32, #tpu.memory_space<vmem>>, vector<1x32xf32>
    %609 = vector.shape_cast %608 : vector<1x32xf32> to vector<32xf32>
    %c0_219 = arith.constant 0 : index
    %c0_220 = arith.constant 0 : index
    %610 = vector.load %arg22[%c0_219, %c0_220] : memref<1x32xf32, #tpu.memory_space<vmem>>, vector<1x32xf32>
    %611 = vector.shape_cast %610 : vector<1x32xf32> to vector<32xf32>
    %cst_221 = arith.constant dense<0.000000e+00> : vector<8xf32>
    %612 = vector.multi_reduction <add>, %607, %cst_221 [1] : vector<8x32xf32> to vector<8xf32>
    %613 = vector.shape_cast %612 : vector<8xf32> to vector<8x1xf32>
    %cst_222 = arith.constant 3.200000e+01 : f32
    %614 = vector.broadcast %cst_222 : f32 to vector<8x1xf32>
    %615 = arith.divf %613, %614 : vector<8x1xf32>
    %616 = vector.broadcast %615 : vector<8x1xf32> to vector<8x32xf32>
    %617 = arith.subf %607, %616 : vector<8x32xf32>
    %618 = arith.mulf %617, %617 : vector<8x32xf32>
    %cst_223 = arith.constant dense<0.000000e+00> : vector<8xf32>
    %619 = vector.multi_reduction <add>, %618, %cst_223 [1] : vector<8x32xf32> to vector<8xf32>
    %620 = vector.shape_cast %619 : vector<8xf32> to vector<8x1xf32>
    %cst_224 = arith.constant 3.200000e+01 : f32
    %621 = vector.broadcast %cst_224 : f32 to vector<8x1xf32>
    %622 = arith.divf %620, %621 : vector<8x1xf32>
    %623 = vector.broadcast %615 : vector<8x1xf32> to vector<8x32xf32>
    %624 = arith.subf %607, %623 : vector<8x32xf32>
    %cst_225 = arith.constant 9.99999974E-6 : f32
    %625 = vector.broadcast %cst_225 : f32 to vector<8x1xf32>
    %626 = arith.addf %622, %625 : vector<8x1xf32>
    %627 = math.rsqrt %626 : vector<8x1xf32>
    %628 = vector.broadcast %627 : vector<8x1xf32> to vector<8x32xf32>
    %629 = arith.mulf %624, %628 : vector<8x32xf32>
    %630 = vector.shape_cast %609 : vector<32xf32> to vector<1x32xf32>
    %631 = vector.broadcast %630 : vector<1x32xf32> to vector<8x32xf32>
    %632 = arith.mulf %629, %631 : vector<8x32xf32>
    %633 = vector.shape_cast %611 : vector<32xf32> to vector<1x32xf32>
    %634 = vector.broadcast %633 : vector<1x32xf32> to vector<8x32xf32>
    %635 = arith.addf %632, %634 : vector<8x32xf32>
    %c0_226 = arith.constant 0 : index
    %c0_227 = arith.constant 0 : index
    %c0_228 = arith.constant 0 : index
    %636 = vector.load %arg23[%c0_226, %c0_227, %c0_228] : memref<1x8x32xf32, #tpu.memory_space<vmem>>, vector<1x8x32xf32>
    %637 = vector.shape_cast %636 : vector<1x8x32xf32> to vector<8x32xf32>
    %638 = vector.shape_cast %635 : vector<8x32xf32> to vector<1x8x32xf32>
    tpu.vector_store %arg23[%c0_226, %c0_227, %c0_228], %638 {strides = array<i32>} : memref<1x8x32xf32, #tpu.memory_space<vmem>>, vector<1x8x32xf32>,
    return
  }
  func.func @transform_0(%arg0: i32) -> (i32, i32, i32) {
    %c0_i32 = arith.constant 0 : i32
    %c0_i32_0 = arith.constant 0 : i32
    %c0_i32_1 = arith.constant 0 : i32
    return %arg0, %c0_i32, %c0_i32_0 : i32, i32, i32
  }
  func.func @transform_1(%arg0: i32) -> (i32, i32, i32) {
    %c0_i32 = arith.constant 0 : i32
    %c0_i32_0 = arith.constant 0 : i32
    %c0_i32_1 = arith.constant 0 : i32
    return %arg0, %c0_i32, %c0_i32_0 : i32, i32, i32
  }
  func.func @transform_2(%arg0: i32) -> (i32, i32, i32) {
    %c0_i32 = arith.constant 0 : i32
    %c0_i32_0 = arith.constant 0 : i32
    %c0_i32_1 = arith.constant 0 : i32
    return %arg0, %c0_i32, %c0_i32_0 : i32, i32, i32
  }
  func.func @transform_3(%arg0: i32) -> (i32, i32, i32) {
    %c0_i32 = arith.constant 0 : i32
    %c0_i32_0 = arith.constant 0 : i32
    %c0_i32_1 = arith.constant 0 : i32
    return %arg0, %c0_i32, %c0_i32_0 : i32, i32, i32
  }
  func.func @transform_4(%arg0: i32) -> (i32, i32, i32) {
    %c0_i32 = arith.constant 0 : i32
    %c0_i32_0 = arith.constant 0 : i32
    %c0_i32_1 = arith.constant 0 : i32
    %c0_i32_2 = arith.constant 0 : i32
    return %c0_i32, %c0_i32_0, %c0_i32_1 : i32, i32, i32
  }
  func.func @transform_5(%arg0: i32) -> (i32, i32) {
    %c0_i32 = arith.constant 0 : i32
    %c0_i32_0 = arith.constant 0 : i32
    %c0_i32_1 = arith.constant 0 : i32
    return %c0_i32, %c0_i32_0 : i32, i32
  }
  func.func @transform_6(%arg0: i32) -> (i32, i32, i32) {
    %c0_i32 = arith.constant 0 : i32
    %c0_i32_0 = arith.constant 0 : i32
    %c0_i32_1 = arith.constant 0 : i32
    %c0_i32_2 = arith.constant 0 : i32
    return %c0_i32, %c0_i32_0, %c0_i32_1 : i32, i32, i32
  }
  func.func @transform_7(%arg0: i32) -> (i32, i32) {
    %c0_i32 = arith.constant 0 : i32
    %c0_i32_0 = arith.constant 0 : i32
    %c0_i32_1 = arith.constant 0 : i32
    return %c0_i32, %c0_i32_0 : i32, i32
  }
  func.func @transform_8(%arg0: i32) -> (i32, i32, i32) {
    %c0_i32 = arith.constant 0 : i32
    %c0_i32_0 = arith.constant 0 : i32
    %c0_i32_1 = arith.constant 0 : i32
    %c0_i32_2 = arith.constant 0 : i32
    return %c0_i32, %c0_i32_0, %c0_i32_1 : i32, i32, i32
  }
  func.func @transform_9(%arg0: i32) -> (i32, i32) {
    %c0_i32 = arith.constant 0 : i32
    %c0_i32_0 = arith.constant 0 : i32
    %c0_i32_1 = arith.constant 0 : i32
    return %c0_i32, %c0_i32_0 : i32, i32
  }
  func.func @transform_10(%arg0: i32) -> (i32, i32, i32) {
    %c0_i32 = arith.constant 0 : i32
    %c0_i32_0 = arith.constant 0 : i32
    %c0_i32_1 = arith.constant 0 : i32
    %c0_i32_2 = arith.constant 0 : i32
    return %c0_i32, %c0_i32_0, %c0_i32_1 : i32, i32, i32
  }
  func.func @transform_11(%arg0: i32) -> (i32, i32) {
    %c0_i32 = arith.constant 0 : i32
    %c0_i32_0 = arith.constant 0 : i32
    %c0_i32_1 = arith.constant 0 : i32
    return %c0_i32, %c0_i32_0 : i32, i32
  }
  func.func @transform_12(%arg0: i32) -> (i32, i32, i32) {
    %c0_i32 = arith.constant 0 : i32
    %c0_i32_0 = arith.constant 0 : i32
    %c0_i32_1 = arith.constant 0 : i32
    %c0_i32_2 = arith.constant 0 : i32
    return %c0_i32, %c0_i32_0, %c0_i32_1 : i32, i32, i32
  }
  func.func @transform_13(%arg0: i32) -> (i32, i32) {
    %c0_i32 = arith.constant 0 : i32
    %c0_i32_0 = arith.constant 0 : i32
    %c0_i32_1 = arith.constant 0 : i32
    return %c0_i32, %c0_i32_0 : i32, i32
  }
  func.func @transform_14(%arg0: i32) -> (i32, i32, i32) {
    %c0_i32 = arith.constant 0 : i32
    %c0_i32_0 = arith.constant 0 : i32
    %c0_i32_1 = arith.constant 0 : i32
    %c0_i32_2 = arith.constant 0 : i32
    return %c0_i32, %c0_i32_0, %c0_i32_1 : i32, i32, i32
  }
  func.func @transform_15(%arg0: i32) -> (i32, i32) {
    %c0_i32 = arith.constant 0 : i32
    %c0_i32_0 = arith.constant 0 : i32
    %c0_i32_1 = arith.constant 0 : i32
    return %c0_i32, %c0_i32_0 : i32, i32
  }
  func.func @transform_16(%arg0: i32) -> (i32, i32, i32) {
    %c0_i32 = arith.constant 0 : i32
    %c0_i32_0 = arith.constant 0 : i32
    %c0_i32_1 = arith.constant 0 : i32
    %c0_i32_2 = arith.constant 0 : i32
    return %c0_i32, %c0_i32_0, %c0_i32_1 : i32, i32, i32
  }
  func.func @transform_17(%arg0: i32) -> (i32, i32) {
    %c0_i32 = arith.constant 0 : i32
    %c0_i32_0 = arith.constant 0 : i32
    %c0_i32_1 = arith.constant 0 : i32
    return %c0_i32, %c0_i32_0 : i32, i32
  }
  func.func @transform_18(%arg0: i32) -> (i32, i32, i32) {
    %c0_i32 = arith.constant 0 : i32
    %c0_i32_0 = arith.constant 0 : i32
    %c0_i32_1 = arith.constant 0 : i32
    %c0_i32_2 = arith.constant 0 : i32
    return %c0_i32, %c0_i32_0, %c0_i32_1 : i32, i32, i32
  }
  func.func @transform_19(%arg0: i32) -> (i32, i32, i32) {
    %c0_i32 = arith.constant 0 : i32
    %c0_i32_0 = arith.constant 0 : i32
    %c0_i32_1 = arith.constant 0 : i32
    %c0_i32_2 = arith.constant 0 : i32
    return %c0_i32, %c0_i32_0, %c0_i32_1 : i32, i32, i32
  }
  func.func @transform_20(%arg0: i32) -> (i32, i32) {
    %c0_i32 = arith.constant 0 : i32
    %c0_i32_0 = arith.constant 0 : i32
    %c0_i32_1 = arith.constant 0 : i32
    return %c0_i32, %c0_i32_0 : i32, i32
  }
  func.func @transform_21(%arg0: i32) -> (i32, i32) {
    %c0_i32 = arith.constant 0 : i32
    %c0_i32_0 = arith.constant 0 : i32
    %c0_i32_1 = arith.constant 0 : i32
    return %c0_i32, %c0_i32_0 : i32, i32
  }
  func.func @transform_22(%arg0: i32) -> (i32, i32, i32) {
    %c0_i32 = arith.constant 0 : i32
    %c0_i32_0 = arith.constant 0 : i32
    %c0_i32_1 = arith.constant 0 : i32
    return %arg0, %c0_i32, %c0_i32_0 : i32, i32, i32
  }
}

</mosaic_0001>

<bundles_post_ra>
// kernel: decoder_forward.1
= control target key start
LH: loop header
LB: loop body
LE: loop exit
PB: predicated region body
PF: predicated region fallthrough
CT: control target
= control target key end

     0   :  { %s4758_s0 = inlined_call_operand.hbm [shape: f32[2,8,32], index: 0, kind: input, shape index: {}]   ;;  %s4759_s1 = inlined_call_operand.hbm [shape: f32[2,8,32], index: 1, kind: input, shape index: {}]   ;;  %s4760_s2 = inlined_call_operand.vmem [shape: f32[2,8,8], index: 2, kind: input, shape index: {}]   ;;  %s4761_s3 = inlined_call_operand.vmem [shape: f32[2,8,8], index: 3, kind: input, shape index: {}]   ;;  %s4762_s4 = inlined_call_operand.vmem [shape: f32[2,32,96], index: 4, kind: input, shape index: {}]   ;;  %s4763_s5 = inlined_call_operand.hbm [shape: f32[2,96], index: 5, kind: input, shape index: {}]   ;;  %s4764_s6 = inlined_call_operand.vmem [shape: f32[2,32,32], index: 6, kind: input, shape index: {}]   ;;  %s4765_s7 = inlined_call_operand.hbm [shape: f32[2,32], index: 7, kind: input, shape index: {}]   ;;  %s4766_s8 = inlined_call_operand.vmem [shape: f32[2,32,32], index: 8, kind: input, shape index: {}]   ;;  %s4767_s9 = inlined_call_operand.hbm [shape: f32[2,32], index: 9, kind: input, shape index: {}]   ;;  %s4768_s10 = inlined_call_operand.hbm [shape: f32[2,32,64], index: 10, kind: input, shape index: {}]   ;;  %s4769_s11 = inlined_call_operand.hbm [shape: f32[2,64], index: 11, kind: input, shape index: {}]   ;;  %s4770_s12 = inlined_call_operand.hbm [shape: f32[2,32,32], index: 12, kind: input, shape index: {}]   ;;  %s4771_s13 = inlined_call_operand.hbm [shape: f32[2,32], index: 13, kind: input, shape index: {}]   ;;  %s4772_s14 = inlined_call_operand.hbm [shape: f32[2,32,64], index: 14, kind: input, shape index: {}]   ;;  %s4773_s15 = inlined_call_operand.hbm [shape: f32[2,64], index: 15, kind: input, shape index: {}]   ;;  %s4774_s16 = inlined_call_operand.vmem [shape: f32[2,64,32], index: 16, kind: input, shape index: {}]   ;;  %s4775_s17 = inlined_call_operand.hbm [shape: f32[2,32], index: 17, kind: input, shape index: {}]   ;;  %s4776_s18 = inlined_call_operand.vmem [shape: f32[2,3,32], index: 18, kind: input, shape index: {}]   ;;  %s4777_s19 = inlined_call_operand.vmem [shape: f32[2,3,32], index: 19, kind: input, shape index: {}]   ;;  %s4778_s20 = inlined_call_operand.hbm [shape: f32[1,32], index: 20, kind: input, shape index: {}]   ;;  %s4779_s21 = inlined_call_operand.hbm [shape: f32[1,32], index: 21, kind: input, shape index: {}]   ;;  %s4780_s22 = inlined_call_operand.hbm [shape: f32[2,8,32], index: 22, kind: output, shape index: {}]  }
   0x1   :  { %4821 = sst [smem:[#allocation38_spill]] %s4758_s0 }
   0x2   :  { %4822 = sst [smem:[#allocation39_spill]] %s4759_s1 }
   0x3   :  { %4823 = sst [smem:[#allocation40_spill]] %s4760_s2 }
   0x4   :  { %4824 = sst [smem:[#allocation41_spill]] %s4761_s3 }
   0x5   :  { %4825 = sst [smem:[#allocation42_spill]] %s4762_s4 }
   0x6   :  { %4826 = sst [smem:[#allocation43_spill]] %s4763_s5 }
   0x7   :  { %4827 = sst [smem:[#allocation44_spill]] %s4764_s6 }
   0x8   :  { %4828 = sst [smem:[#allocation45_spill]] %s4765_s7 }
   0x9   :  { %4829 = sst [smem:[#allocation46_spill]] %s4766_s8 }
   0xa   :  { %4830 = sst [smem:[#allocation47_spill]] %s4767_s9 }
   0xb   :  { %4831 = sst [smem:[#allocation48_spill]] %s4768_s10 }
   0xc   :  { %4832 = sst [smem:[#allocation49_spill]] %s4769_s11 }
   0xd   :  { %4833 = sst [smem:[#allocation50_spill]] %s4770_s12 }
   0xe   :  { %4834 = sst [smem:[#allocation51_spill]] %s4771_s13 }
   0xf   :  { %4835 = sst [smem:[#allocation52_spill]] %s4772_s14 }
  0x10   :  { %4836 = sst [smem:[#allocation53_spill]] %s4773_s15 }
  0x11   :  { %4837 = sst [smem:[#allocation54_spill]] %s4774_s16 }
  0x12   :  { %4838 = sst [smem:[#allocation55_spill]] %s4775_s17 }
  0x13   :  { %4839 = sst [smem:[#allocation56_spill]] %s4776_s18 }
  0x14   :  { %4840 = sst [smem:[#allocation57_spill]] %s4777_s19 }
  0x15   :  { %4841 = sst [smem:[#allocation58_spill]] %s4778_s20 }
  0x16   :  { %4842 = sst [smem:[#allocation59_spill]] %s4779_s21 }
  0x17   :  { %4843 = sst [smem:[#allocation60_spill]] %s4780_s22 }
  0x18   :  { %27 = vsyncpa [#allocation3], 0 }
  0x19   :  { %29 = vsyncpa [#allocation3 + $0x1], 0 }
  0x1a   :  { %30 = vsyncpa [#allocation6], 0 }
  0x1b   :  { %32 = vsyncpa [#allocation6 + $0x1], 0 }
  0x1c   :  { %33 = vsyncpa [#allocation9], 0 }
  0x1d   :  { %34 = vsyncpa [#allocation12], 0 }
  0x1e   :  { %35 = vsyncpa [#allocation15], 0 }
  0x1f   :  { %36 = vsyncpa [#allocation18], 0 }
  0x20   :  { %37 = vsyncpa [#allocation21], 0 }
  0x21   :  { %38 = vsyncpa [#allocation24], 0 }
  0x22   :  { %39 = vsyncpa [#allocation4], 0 }
  0x23   :  { %41 = vsyncpa [#allocation4 + $0x1], 0  ;;  %s4044_s3 = smov 0   ;;  %s4046_s28 = smov 0  }
  0x24   :  { %s4048_s29 = smov 0   ;;  %s4050_s30 = smov 0  }
  0x25 LB: > { %s4844_s23 = sld [smem:[#allocation43_spill]]  ;;  %s4068_s5 = sadd.s32 4294967295, %s3898_s30   ;;  %s3898_s30 = sphi %s4050_s30, %s4897_s30   ;;  %s3894_s29 = sphi %s4048_s29, %s4896_s29   ;;  %s3890_s28 = sphi %s4046_s28, %s4895_s28   ;;  %s3886_s3 = sphi %s4044_s3, %s4894_s3  }
  0x26   : > { %p2971_p0 = scmp.ge.s32.totalorder %s3898_s30, 1  ;;  %p68_p1 = scmp.eq.s32.totalorder %s4068_s5, 0 }
  0x27   : > { %p560_p2 = scmp.lt.s32.totalorder %s3898_s30, 3  ;;  %s3900_s6 = smov [#allocation7]  }
  0x28   : > { %s577_s25 = sshll.u32 %s3900_s6, 4  ;;  %s4847_s7 = sld [smem:[#allocation45_spill]]  ;;  %s578_s25 = int_to_ptr.vmem [resolvable:$true] %s577_s25 }
  0x29   : > { %p4073_p3 = pnand %p2971_p0, %p560_p2  ;;  %s3901_s0 = smov [#allocation8]  }
  0x2a   : > { %s4849_s10 = sld [smem:[#allocation48_spill]]  ;;  %s3902_s26 = smov [#allocation11]  }
  0x2b   : > { %s575_s1 = sshll.u32 %s4844_s23, 4  ;;  %p3149_p5 = pneg %p4073_p3  ;;  %s576_s1 = int_to_ptr.hbm [resolvable:$true] %s575_s1 }
  0x2c   : > { %s4845_s24 = scalar_select %p4073_p3, 1, 0 }
  0x2d   : > { %p4085_p6 = pnand %p3149_p5, %p68_p1  ;;  %s592_s23 = sshll.u32 %s3901_s0, 4  ;;  %s593_s23 = int_to_ptr.vmem [resolvable:$true] %s592_s23 }
  0x2e   : > { %4846 = sst [smem:[#allocation36_spill]] %s4845_s24  ;;  %s590_s27 = sshll.u32 %s4847_s7, 4  ;;  %s591_s27 = int_to_ptr.hbm [resolvable:$true] %s590_s27 }
  0x2f   : > { %3152 = dma.hbm_to_vmem [thread:$0]  (!%p4085_p6), %s576_s1, 32, %s578_s25, [#allocation6]  }
  0x30   : > { %s616_s16 = sshll.u32 %s4849_s10, 4  ;;  %s618_s2 = sshll.u32 %s3902_s26, 4  ;;  %s617_s16 = int_to_ptr.hbm [resolvable:$true] %s616_s16  ;;  %s619_s2 = int_to_ptr.vmem [resolvable:$true] %s618_s2 }
  0x31   : > { %3155 = dma.hbm_to_vmem [thread:$0]  (!%p4085_p6), %s591_s27, 32, %s593_s23, [#allocation9]  }
  0x32   : > { %s4850_s12 = sld [smem:[#allocation50_spill]]  ;;  %s3903_s0 = smov 128  }
  0x33   : > { %s3904_s18 = smov 8   ;;  %s3905_s22 = smov [#allocation14]  }
  0x34   : > { %3161 = dma.hbm_to_vmem [thread:$0]  (!%p4085_p6), %s617_s16, 1024, %s619_s2, [#allocation12], %s3903_s0, %s3903_s0, %s3904_s18  }
  0x35   : > { %s644_s6 = sshll.u32 %s3905_s22, 4  ;;  %s4851_s14 = sld [smem:[#allocation52_spill]]  ;;  %s645_s6 = int_to_ptr.vmem [resolvable:$true] %s644_s6 }
  0x36   : > { %s4852_s17 = sld [smem:[#allocation55_spill]]  ;;  %s3906_s27 = smov [#allocation17]  }
  0x37   : > { %s670_s23 = sshll.u32 %s3906_s27, 4  ;;  %s3907_s16 = smov [#allocation20]   ;;  %s671_s23 = int_to_ptr.vmem [resolvable:$true] %s670_s23 }
  0x38   : > { %s642_s19 = sshll.u32 %s4850_s12, 4  ;;  %s700_s26 = sshll.u32 %s3907_s16, 4  ;;  %s643_s19 = int_to_ptr.hbm [resolvable:$true] %s642_s19  ;;  %s701_s26 = int_to_ptr.vmem [resolvable:$true] %s700_s26 }
  0x39   : > { %3167 = dma.hbm_to_vmem [thread:$0]  (!%p4085_p6), %s643_s19, 1024, %s645_s6, [#allocation15], %s3903_s0, %s3903_s0, %s3904_s18  }
  0x3a   : > { %s4853_s9 = sld [smem:[#allocation47_spill]]  ;;  %s3908_s25 = smov [#allocation10]  }
  0x3b   : > { %s668_s1 = sshll.u32 %s4851_s14, 4  ;;  %s4854_s11 = sld [smem:[#allocation49_spill]]  ;;  %s669_s1 = int_to_ptr.hbm [resolvable:$true] %s668_s1 }
  0x3c   : > { %s698_s8 = sshll.u32 %s4852_s17, 4  ;;  %s607_s7 = sshll.u32 %s3908_s25, 4  ;;  %s699_s8 = int_to_ptr.hbm [resolvable:$true] %s698_s8  ;;  %s608_s7 = int_to_ptr.vmem [resolvable:$true] %s607_s7 }
  0x3d   : > { %3173 = dma.hbm_to_vmem [thread:$0]  (!%p4085_p6), %s669_s1, 1024, %s671_s23, [#allocation18], %s3903_s0, %s3903_s0, %s3904_s18  }
  0x3e   : > { %3179 = dma.hbm_to_vmem [thread:$0]  (!%p4085_p6), %s699_s8, 32, %s701_s26, [#allocation21]  }
  0x3f   : > { %s3909_s18 = smov [#allocation13]   ;;  %s4855_s13 = sld [smem:[#allocation51_spill]] }
  0x40   : > { %s605_s2 = sshll.u32 %s4853_s9, 4  ;;  %s633_s0 = sshll.u32 %s3909_s18, 4  ;;  %s606_s2 = int_to_ptr.hbm [resolvable:$true] %s605_s2  ;;  %s634_s0 = int_to_ptr.vmem [resolvable:$true] %s633_s0 }
  0x41   : > { %s631_s6 = sshll.u32 %s4854_s11, 4  ;;  %s4856_s15 = sld [smem:[#allocation53_spill]]  ;;  %s632_s6 = int_to_ptr.hbm [resolvable:$true] %s631_s6 }
  0x42   : > { %3158 = dma.hbm_to_vmem [thread:$0]  (!%p4085_p6), %s606_s2, 32, %s608_s7, [#allocation9]  }
  0x43   : > { %3164 = dma.hbm_to_vmem [thread:$0]  (!%p4085_p6), %s632_s6, 32, %s634_s0, [#allocation12]  }
  0x44   : > { %s3910_s10 = smov [#allocation16]   ;;  %s3911_s2 = smov [#allocation19]  }
  0x45   : > { %s657_s23 = sshll.u32 %s4855_s13, 4  ;;  %s659_s24 = sshll.u32 %s3910_s10, 4  ;;  %s658_s23 = int_to_ptr.hbm [resolvable:$true] %s657_s23  ;;  %s660_s24 = int_to_ptr.vmem [resolvable:$true] %s659_s24 }
  0x46   : > { %3170 = dma.hbm_to_vmem [thread:$0]  (!%p4085_p6), %s658_s23, 32, %s660_s24, [#allocation15]  }
  0x47   : > { %s683_s26 = sshll.u32 %s4856_s15, 4  ;;  %s685_s19 = sshll.u32 %s3911_s2, 4  ;;  %s684_s26 = int_to_ptr.hbm [resolvable:$true] %s683_s26  ;;  %s686_s19 = int_to_ptr.vmem [resolvable:$true] %s685_s19 }
  0x48   : > { %s4857_s20 = sld [smem:[#allocation58_spill]]  ;;  %s3912_s1 = smov [#allocation22]  }
  0x49   : > { %3176 = dma.hbm_to_vmem [thread:$0]  (!%p4085_p6), %s684_s26, 32, %s686_s19, [#allocation18]  }
  0x4a   : > { %s4858_s21 = sld [smem:[#allocation59_spill]]  ;;  %s718_s27 = sshll.u32 %s3912_s1, 4  ;;  %s719_s27 = int_to_ptr.vmem [resolvable:$true] %s718_s27 }
  0x4b   : > { %s3913_s23 = smov [#allocation23]   ;;  %s2970_s16 = sadd.s32 4294967294, %s3898_s30  }
  0x4c   : > { %s730_s8 = sshll.u32 %s3913_s23, 4  ;;  %s4145_s26 = sadd.s32 1, %s3898_s30   ;;  %s731_s8 = int_to_ptr.vmem [resolvable:$true] %s730_s8 }
  0x4d   : > { %s51_s10 = ssub.s32 %s3898_s30, %s4145_s26  ;;  %s54_s24 = sadd.s32 1, %s3894_s29 }
  0x4e   : > { %s716_s6 = sshll.u32 %s4857_s20, 4  ;;  %p52_p7 = scmp.eq.s32.totalorder %s51_s10, 0  ;;  %s717_s6 = int_to_ptr.hbm [resolvable:$true] %s716_s6 }
  0x4f   : > { %3182 = dma.hbm_to_vmem [thread:$0]  (!%p4085_p6), %s717_s6, 16, %s719_s27, [#allocation21]  }
  0x50   : > { %s728_s0 = sshll.u32 %s4858_s21, 4  ;;  %p61_p8 = scmp.ne.s32.totalorder %s3894_s29, %s3890_s28  ;;  %s729_s0 = int_to_ptr.hbm [resolvable:$true] %s728_s0 }
  0x51   : > { %3185 = dma.hbm_to_vmem [thread:$0]  (!%p4085_p6), %s729_s0, 16, %s731_s8, [#allocation24]  }
  0x52   : > { %p62_p9 = scmp.eq.s32.totalorder %s3898_s30, 0  ;;  %p67_p10 = scmp.ne.s32.totalorder %s3890_s28, %s3886_s3 }
  0x53   : > { %s4156_s2 = scalar_select %p52_p7, %s3894_s29, %s54_s24  }
  0x54   : > { %p4158_p11 = por %p62_p9, %p61_p8  ;;  %p4164_p12 = por %p68_p1, %p67_p10 }
  0x55   : > { %4859 = sst [smem:[#allocation37_spill]] %s4156_s2  ;;  %p547_p13 = scmp.eq.s32.totalorder %s4068_s5, 1 }
  0x56   : > { %p553_p0 = scmp.eq.s32.totalorder %s2970_s16, 1  ;;  %p3209_p2 = scmp.lt.s32.totalorder %s3898_s30, 2 }
  0x57   : > { %s741_s22 = sand.u32 1, %s3894_s29   ;;  %p4171_p5 = por %p547_p13, %p61_p8 }
  0x58   : > { %p4175_p6 = por %p553_p0, %p67_p10  ;;  %s4179_s7 = sshll.u32 %s741_s22, 3 }
  0x59   : > { %s2986_s18 = sshll.u32 %s3898_s30, 3  ;;  %s4864_s27 = sld [smem:[#allocation38_spill]] }
  0x5a   : > { %s745_s8 = scalar_lea.vmem [#allocation2], %s4179_s7  ;;  %p4188_p7 = pnand %p3209_p2, %p4158_p11 }
  0x5b   : > { %s753_s16 = sshll.u32 %s745_s8, 4  ;;  %s4866_s12 = sld [smem:[#allocation39_spill]]  ;;  %s754_s16 = int_to_ptr.vmem [resolvable:$true] %s753_s16 }
  0x5c   : > { %s760_s14 = sand.u32 1, %s3898_s30   ;;  %s742_s15 = scalar_lea.sflag [#allocation3], %s741_s22 }
  0x5d   : > { %p3744_p9 = pneg %p4188_p7 }
  0x5f   : > { %s749_s23 = scalar_lea.hbm %s4864_s27, %s2986_s18  ;;  %s3747_s8 = scalar_lea.hbm %s4864_s27, 16 }
  0x60   : > { %s751_s10 = sshll.u32 %s749_s23, 4  ;;  %s752_s10 = int_to_ptr.hbm [resolvable:$true] %s751_s10 }
  0x61   : > { %s768_s13 = scalar_lea.hbm %s4866_s12, %s2986_s18  ;;  %s3740_s0 = sshra.s32 %s752_s10, 4  ;;  %s3741_s0 = int_to_ptr.hbm [resolvable:$true] %s3740_s0 }
  0x62   : > { %s3742_s1 = scalar_lea.hbm %s3741_s0, 8  ;;  %p3748_p13 = scmp.lt.s32.totalorder %s3741_s0, %s4864_s27 }
  0x63   : > { %p3743_p8 = scmp.ne.s32.totalorder %s3741_s0, %s3742_s1  ;;  %p3749_p0 = scmp.lt.s32.totalorder %s3747_s8, %s3742_s1 }
  0x65   : > { %p3745_p10 = pnand %p3744_p9, %p3743_p8  ;;  %p3750_p2 = por %p3749_p0, %p3748_p13 }
  0x67   : > { %p3746_p11 = pneg %p3745_p10 }
  0x69   : > { %p3751_p4 = pnand %p3750_p2, %p3746_p11 }
  0x6b   : > { %3754 = shalt.err (!%p3751_p4)
}
  0x6c   : > { %3189 = dma.hbm_to_vmem [thread:$0]  (!%p4188_p7), %s752_s10, 128, %s754_s16, %s742_s15  }
  0x6d   : > { %s770_s22 = sshll.u32 %s768_s13, 4  ;;  %s764_s18 = scalar_lea.vmem [#allocation5], %s4179_s7  ;;  %s771_s22 = int_to_ptr.hbm [resolvable:$true] %s770_s22 }
  0x6e   : > { %s772_s17 = sshll.u32 %s764_s18, 4  ;;  %s761_s19 = scalar_lea.sflag [#allocation6], %s760_s14  ;;  %s773_s17 = int_to_ptr.vmem [resolvable:$true] %s772_s17 }
  0x6f   : > { %s3770_s23 = sshra.s32 %s771_s22, 4  ;;  %s3777_s8 = scalar_lea.hbm %s4866_s12, 16  ;;  %s3771_s23 = int_to_ptr.hbm [resolvable:$true] %s3770_s23 }
  0x70   : > { %s3772_s20 = scalar_lea.hbm %s3771_s23, 8  ;;  %p3778_p4 = scmp.lt.s32.totalorder %s3771_s23, %s4866_s12 }
  0x71   : > { %p3773_p8 = scmp.ne.s32.totalorder %s3771_s23, %s3772_s20  ;;  %p3779_p13 = scmp.lt.s32.totalorder %s3777_s8, %s3772_s20 }
  0x73   : > { %p3775_p10 = pnand %p3773_p8, %p3744_p9  ;;  %p3780_p0 = por %p3779_p13, %p3778_p4 }
  0x75   : > { %p3776_p11 = pneg %p3775_p10 }
  0x77   : > { %p3781_p2 = pnand %p3780_p0, %p3776_p11 }
  0x79   : > { %3784 = shalt.err (!%p3781_p2)
}
  0x7a   : > { %3192 = dma.hbm_to_vmem [thread:$0]  (!%p4188_p7), %s771_s22, 128, %s773_s17, %s761_s19  }
  0x7b   : > { %795 = sbr.rel (%p4073_p3) target bundleno = 7081 (0x1ba9), region = 108  ;;  %s4224_s14 = sand.u32 (!%p4073_p3), 1, %s3890_s28  }
  0x7c   : > { %s4227_s7 = sshll.u32 (!%p4073_p3), %s4224_s14, 3  ;;  %s798_s16 = scalar_lea.sflag (!%p4073_p3), [#allocation3], %s4224_s14 }
  0x7d   : > { %s801_s20 = scalar_lea.vmem (!%p4073_p3), [#allocation2], %s4227_s7 }
  0x80   : > { %3845 = dma.done.wait (%p4164_p12), %s798_s16, 128  }
  0x81   : > { %3847 = vsyncadd (%p4164_p12), %s798_s16, 4294967168  ;;  %s807_s17 = sand.u32 1, %s4068_s5   ;;  %s811_s24 = scalar_lea.vmem [#allocation5], %s4227_s7 }
  0x82   : > { %s808_s10 = scalar_lea.sflag [#allocation6], %s807_s17 }
  0x83   : > { %3849 = dma.done.wait (%p4164_p12), %s808_s10, 128  }
  0x84   : > { %3851 = vsyncadd (%p4164_p12), %s808_s10, 4294967168 }
  0x85   : > { %3853 = dma.done.wait (%p68_p1), [#allocation6], 32  }
  0x86   : > { %3855 = vsyncadd (%p68_p1), [#allocation6], 4294967264 }
  0x87   : > { %3857 = dma.done.wait (%p68_p1), [#allocation9], 64  }
  0x88   : > { %3859 = vsyncadd (%p68_p1), [#allocation9], 4294967232 }
  0x89   : > { %3861 = dma.done.wait (%p68_p1), [#allocation12], 1056  }
  0x8a   : > { %3863 = vsyncadd (%p68_p1), [#allocation12], 4294966240 }
  0x8b   : > { %3865 = dma.done.wait (%p68_p1), [#allocation15], 1056  }
  0x8c   : > { %3867 = vsyncadd (%p68_p1), [#allocation15], 4294966240 }
  0x8d   : > { %3869 = dma.done.wait (%p68_p1), [#allocation18], 1056  }
  0x8e   : > { %3871 = vsyncadd (%p68_p1), [#allocation18], 4294966240 }
  0x8f   : > { %3873 = dma.done.wait (%p68_p1), [#allocation21], 48  }
  0x90   : > { %3875 = vsyncadd (%p68_p1), [#allocation21], 4294967248 }
  0x91   : > { %3877 = dma.done.wait (%p68_p1), [#allocation24], 16  }
  0x92   : > { %3879 = vsyncadd (%p68_p1), [#allocation24], 4294967280  ;;  %vm960_vm0 = vcmask 261120   ;;  %v4269_v0 = vld [vmem:[%s801_s20] sm:$0xff]  ;;  %v3914_v2 = vmov 32.0   ;;  %s4868_s22 = sld [smem:[#allocation42_spill]] }
  0x93   : > { %v961_v1 = vsel %vm960_vm0, %v4269_v0, 0.0  ;;  %3300 = vrcp.f32 %v3914_v2  ;;  %s4869_s13 = sld [smem:[#allocation56_spill]]  ;;  %v3284_v35 = vld [vmem:[#allocation7] ss:$0 sm:$0xff]  ;;  %s4797_s10 = smov 72   ;;  %vm1026_vm5 = vcmask 64512  }
  0x94   : > { %962 = vadd.xlane.f32.xlu0 %v961_v1  ;;  %s4870_s17 = sld [smem:[#allocation57_spill]]  ;;  %s4814_s4 = smov 120   ;;  %vm1304_vm6 = vcmask 130048   ;;  %vm1306_vm7 = vcmask 195584   ;;  %vm1799_vm14 = vcmask 523264  }
  0x95   : > { %s4801_s11 = smov 96   ;;  %s4799_s18 = smov 80  }
  0x96   : > { %s4795_s19 = smov 88   ;;  %s4808_s23 = smov 104  }
  0x97   : > { %s4812_s0 = smov 112   ;;  %p946_p1 = scmp.lt.s32.totalorder %s4068_s5, 1 }
  0x98   : > { %v997_v14 = vld [vmem:[%s4868_s22 + $0x18] sm:$0xff]  ;;  %v996_v15 = vld [vmem:[%s4868_s22 + $0x10] sm:$0xff]  ;;  %v995_v16 = vld [vmem:[%s4868_s22 + $0x8] sm:$0xff]  ;;  %s4871_s16 = sld [smem:[#allocation40_spill]]  ;;  %s4794_s9 = smov 64  }
  0x99   : > { %v3301_v3 = vpop.eup %3300  ;;  %1015 = vmatpush.msra.mxu0 %v997_v14  ;;  %v994_v17 = vld [vmem:[%s4868_s22] sm:$0xff]  ;;  %s4331_s1 = scalar_select %p946_p1, %s4068_s5, 1 }
  0x9a   : > { %v965_v4 = vmul.f32 32.0, %v3301_v3  ;;  %vm969_vm1 = vweird.f32 %v3301_v3  ;;  %v4294_v26 = vld [vmem:[%s4869_s13] sm:$0x7]  ;;  %s4792_s15 = smov 40   ;;  %s4884_s2 = smov 64  }
  0x9b   : > { %1016 = vmatpush.msra.mxu0 %v996_v15  ;;  %v4299_v28 = vld [vmem:[%s4870_s17] sm:$0x7]  ;;  %v990_v29 = vperm.slane %v4294_v26, 0  ;;  %s4803_s8 = sshll.u32 %s4331_s1, 3  ;;  %s4885_s27 = smov 120  }
  0x9c   : > { %v966_v5 = vsub.f32 1.0, %v965_v4  ;;  %v992_v32 = vperm.slane %v4299_v28, 0  ;;  %s4890_s12 = smov 24  }
  0x9d   : > { %1017 = vmatpush.msra.mxu0 %v995_v16 }
  0x9e   : > { %v967_v6 = vmul.f32 %v3301_v3, %v966_v5  ;;  %s949_s20 = scalar_lea.vmem %s4871_s16, %s4803_s8  ;;  %s4793_s16 = smov 56  }
  0x9f   : > { %1018 = vmatpush.msra.mxu0 %v994_v17  ;;  %v4339_v46 = vld [vmem:[%s949_s20] sm:$0xff]  ;;  %s4791_s20 = smov 48   ;;  %s4882_s8 = smov 8  }
  0xa0   : > { %v968_v7 = vadd.f32 %v3301_v3, %v967_v6 }
  0xa2   : > { %v4273_v8 = vsel %vm969_vm1, %v3301_v3, %v968_v7 }
 0x107   : > { %v963_v9 = vpop.xlane.xlu0 %962 }
 0x108   : > { %v971_v10 = vmul.f32 %v4273_v8, %v963_v9 }
 0x10a   : > { %v972_v11 = vsub.f32 %v4269_v0, %v971_v10 }
 0x10c   : > { %v973_v12 = vmul.f32 %v972_v11, %v972_v11 }
 0x10e   : > { %v974_v13 = vsel %vm960_vm0, %v973_v12, 0.0 }
 0x10f   : > { %975 = vadd.xlane.f32.xlu0 %v974_v13 }
 0x182   : > { %v976_v18 = vpop.xlane.xlu0 %975 }
 0x183   : > { %v977_v19 = vmul.f32 %v976_v18, %v4273_v8 }
 0x185   : > { %v978_v20 = vadd.f32 1e-05, %v977_v19 }
 0x187   : > { %3302 = vrsqrt.f32 %v978_v20  ;;  %vm985_vm3 = vweird.f32 %v978_v20 }
 0x18d   : > { %v3303_v21 = vpop.eup %3302 }
 0x18e   : > { %v980_v22 = vmul.f32 %v3303_v21, %v978_v20  ;;  %vm986_vm2 = vweird.f32 %v3303_v21 }
 0x18f   : > { %vm987_vm4 = vmor %vm985_vm3, %vm986_vm2 }
 0x190   : > { %v981_v23 = vmul.f32 %v3303_v21, %v980_v22 }
 0x192   : > { %v982_v24 = vmul.f32 0.5, %v981_v23 }
 0x194   : > { %v983_v25 = vsub.f32 1.5, %v982_v24 }
 0x196   : > { %v984_v27 = vmul.f32 %v3303_v21, %v983_v25 }
 0x198   : > { %v988_v30 = vsel %vm987_vm4, %v3303_v21, %v984_v27 }
 0x199   : > { %v989_v31 = vmul.f32 %v988_v30, %v972_v11 }
 0x19b   : > { %v991_v33 = vmul.f32 %v990_v29, %v989_v31 }
 0x19d   : > { %v993_v34 = vadd.f32 %v992_v32, %v991_v33 }
 0x19f   : > { %3007 = vmatmul.msk.f32.vlgmr.msra.gmra.mxu0 %vm960_vm0, %v993_v34 }
 0x21c   : > { %v1020_v36 = vpop.f32.mrf.mxu0 }
 0x21d   : > { %v4304_v37 = vadd.f32 %v3284_v35, %v1020_v36 }
 0x21f   : > { %1226 = vrot.lane.b32.xlu0 %v4304_v37, %s4797_s10  ;;  %1090 = vrot.lane.b32.xlu2 %v4304_v37, %s4814_s4  ;;  %s4872_s10 = sld [smem:[#allocation44_spill]] }
 0x220   : > { %1024 = vrot.lane.b32.xlu1 %v4304_v37, %s4801_s11  ;;  %s4874_s11 = smov 104  }
 0x227   : > { %1159 = vrot.lane.b32.xlu2 %v4304_v37, %s4799_s18  ;;  %s4875_s18 = sshll.u32 %s4331_s1, 3  ;;  %s4877_s1 = smov 96  }
 0x228   : > { %1092 = vrot.lane.b32.xlu1 %v4304_v37, %s4795_s19  ;;  %s4873_s19 = sld [smem:[#allocation46_spill]] }
 0x22f   : > { %1224 = vrot.lane.b32.xlu2 %v4304_v37, %s4808_s23  ;;  %s4881_s23 = smov 16  }
 0x230   : > { %1157 = vrot.lane.b32.xlu1 %v4304_v37, %s4812_s0 }
 0x279   : > { %v1091_v38 = vpop.permute.xlu2 %1090 }
 0x281   : > { %v1160_v40 = vpop.permute.xlu2 %1159 }
 0x289   : > { %v1225_v44 = vpop.permute.xlu2 %1224 }
 0x291   : > { %v1227_v42 = vpop.permute.xlu0 %1226 }
 0x292   : > { %v1025_v39 = vpop.permute.xlu1 %1024 }
 0x293   : > { %3008 = vmatpush.xpose.msk.msra.mxu1 %vm1026_vm5, %v1025_v39 }
 0x296   : > { %3009 = vmatmul.msk.f32.vlgmr.msra.gmra.mxu1 %vm1026_vm5, %v4304_v37 }
 0x297   : > { %3014 = vmatpush.xpose.msk.msrb.mxu1 %vm1026_vm5, %v1160_v40 }
 0x29a   : > { %v1093_v41 = vpop.permute.xlu1 %1092 }
 0x29b   : > { %3011 = vmatpush.xpose.msk.msrb.mxu0 %vm1026_vm5, %v1093_v41 }
 0x29e   : > { %3012 = vmatmul.msk.f32.vlgmr.msrb.gmra.mxu0 %vm1026_vm5, %v1091_v38 }
 0x29f   : > { %3017 = vmatpush.xpose.msk.msra.mxu0 %vm1026_vm5, %v1227_v42  ;;  %v1311_v42 = vld [vmem:[%s4872_s10 + $0x18] sm:$0xff] }
 0x2a0   : > { %1327 = vmatpush.msra.mxu1 %v1311_v42 }
 0x2a2   : > { %v1158_v43 = vpop.permute.xlu1 %1157 }
 0x2a3   : > { %3015 = vmatmul.msk.f32.vlgmr.msrb.gmra.mxu1 %vm1026_vm5, %v1158_v43  ;;  %v1310_v43 = vld [vmem:[%s4872_s10 + $0x10] sm:$0xff] }
 0x2a4   : > { %1328 = vmatpush.msra.mxu1 %v1310_v43 }
 0x2a6   : > { %3018 = vmatmul.msk.f32.vlgmr.msra.gmra.mxu0 %vm1026_vm5, %v1225_v44  ;;  %v1309_v44 = vld [vmem:[%s4872_s10 + $0x8] sm:$0xff] }
 0x2a7   : > { %1329 = vmatpush.msra.mxu1 %v1309_v44 }
 0x313   : > { %v1048_v45 = vpop.f32.mrf.mxu1 }
 0x314   : > { %v1051_v47 = vmul.f32 0.35355338, %v1048_v45  ;;  %v1308_v45 = vld [vmem:[%s4872_s10] sm:$0xff] }
 0x315   : > { %1330 = vmatpush.msra.mxu1 %v1308_v45 }
 0x316   : > { %v1052_v48 = vadd.f32 %v1051_v47, %v4339_v46 }
 0x318   : > { %v1053_v49 = vsel %vm1026_vm5, %v1052_v48, -inf }
 0x319   : > { %1054 = vmax.xlane.f32.xlu1 %v1053_v49 }
 0x31b   : > { %v1115_v50 = vpop.f32.mrf.mxu0 }
 0x31c   : > { %v1118_v51 = vmul.f32 0.35355338, %v1115_v50 }
 0x31e   : > { %v1119_v52 = vadd.f32 %v1118_v51, %v4339_v46 }
 0x320   : > { %v1182_v53 = vpop.f32.mrf.mxu1  ;;  %v1120_v54 = vsel %vm1026_vm5, %v1119_v52, -inf }
 0x321   : > { %v1185_v55 = vmul.f32 0.35355338, %v1182_v53  ;;  %1121 = vmax.xlane.f32.xlu2 %v1120_v54  ;;  %v3285_v53 = vld [vmem:[#allocation8] ss:$0 sm:$0xff] }
 0x323   : > { %v1249_v56 = vpop.f32.mrf.mxu0  ;;  %v1186_v57 = vadd.f32 %v1185_v55, %v4339_v46 }
 0x324   : > { %v1252_v58 = vmul.f32 0.35355338, %v1249_v56 }
 0x325   : > { %v1187_v59 = vsel %vm1026_vm5, %v1186_v57, -inf }
 0x326   : > { %1188 = vmax.xlane.f32.xlu0 %v1187_v59  ;;  %v1253_v60 = vadd.f32 %v1252_v58, %v4339_v46  ;;  %v1397_v58 = vld [vmem:[#allocation11 + $0x18] sm:$0xff]  ;;  %v1396_v59 = vld [vmem:[#allocation11 + $0x10] sm:$0xff] }
 0x327   : > { %1415 = vmatpush.msrb.mxu0 %v1397_v58 }
 0x328   : > { %v1254_v61 = vsel %vm1026_vm5, %v1253_v60, -inf }
 0x329   : > { %1255 = vmax.xlane.f32.xlu2 %v1254_v61  ;;  %1416 = vmatpush.msrb.mxu0 %v1396_v59 }
 0x332   : > { %1064 = vrot.lane.b32.xlu1 %v4304_v37, %s4794_s9  ;;  %s4876_s9 = sld [smem:[#allocation41_spill]] }
 0x38c   : > { %v1055_v62 = vpop.xlane.xlu1 %1054 }
 0x38d   : > { %v1056_v63 = vsub.f32 %v1052_v48, %v1055_v62 }
 0x38f   : > { %v1057_v1 = vmul.f32 1.442695, %v1056_v63 }
 0x391   : > { %3304 = vpow2.f32 %v1057_v1 }
 0x394   : > { %v1122_v2 = vpop.xlane.xlu2 %1121 }
 0x395   : > { %v1123_v3 = vsub.f32 %v1119_v52, %v1122_v2  ;;  %v1394_v2 = vld [vmem:[#allocation11] sm:$0xff] }
 0x397   : > { %v3305_v4 = vpop.eup %3304  ;;  %v1124_v5 = vmul.f32 1.442695, %v1123_v3  ;;  %v4394_v3 = vld [vmem:[%s811_s24] sm:$0xff]  ;;  %s4879_s24 = smov 72  }
 0x398   : > { %v1059_v6 = vsel %vm1026_vm5, %v3305_v4, 0.0 }
 0x399   : > { %3306 = vpow2.f32 %v1124_v5  ;;  %v1189_v7 = vpop.xlane.xlu0 %1188  ;;  %1060 = vadd.xlane.f32.xlu1 %v1059_v6  ;;  %v1367_v5 = vld [vmem:[%s4873_s19 + $0x10] sm:$0xff]  ;;  %v1366_v6 = vld [vmem:[%s4873_s19 + $0x8] sm:$0xff] }
 0x39a   : > { %v1190_v9 = vsub.f32 %v1186_v57, %v1189_v7  ;;  %v1365_v7 = vld [vmem:[%s4873_s19] sm:$0xff] }
 0x39c   : > { %v1191_v10 = vmul.f32 1.442695, %v1190_v9  ;;  %v1256_v11 = vpop.xlane.xlu2 %1255 }
 0x39d   : > { %v1257_v12 = vsub.f32 %v1253_v60, %v1256_v11  ;;  %v1395_v60 = vld [vmem:[#allocation11 + $0x8] sm:$0xff] }
 0x39e   : > { %3308 = vpow2.f32 %v1191_v10  ;;  %1417 = vmatpush.msrb.mxu0 %v1395_v60 }
 0x39f   : > { %v3307_v13 = vpop.eup %3306  ;;  %v1258_v14 = vmul.f32 1.442695, %v1257_v12 }
 0x3a0   : > { %v1126_v15 = vsel %vm1026_vm5, %v3307_v13, 0.0  ;;  %1418 = vmatpush.msrb.mxu0 %v1394_v2 }
 0x3a1   : > { %3310 = vpow2.f32 %v1258_v14  ;;  %1127 = vadd.xlane.f32.xlu2 %v1126_v15  ;;  %3022 = vmatmul.msk.f32.vlgmr.msrb.gmra.mxu0 %vm960_vm0, %v4394_v3 }
 0x3a4   : > { %v3309_v16 = vpop.eup %3308  ;;  %v1065_v17 = vpop.permute.xlu1 %1064 }
 0x3a5   : > { %1085 = vmatpush.msra.mxu2 %v1065_v17  ;;  %v1193_v18 = vsel %vm1026_vm5, %v3309_v16, 0.0 }
 0x3a6   : > { %1194 = vadd.xlane.f32.xlu0 %v1193_v18  ;;  %v1361_v18 = vperm.slane %v4294_v26, 1 }
 0x3a7   : > { %v3311_v19 = vpop.eup %3310 }
 0x3a8   : > { %v1260_v20 = vsel %vm1026_vm5, %v3311_v19, 0.0 }
 0x3a9   : > { %1261 = vadd.xlane.f32.xlu2 %v1260_v20 }
 0x3b2   : > { %1265 = vrot.lane.b32.xlu1 %v4304_v37, %s4792_s15  ;;  %s4806_s15 = smov 8  }
 0x3ba   : > { %1131 = vrot.lane.b32.xlu0 %v4304_v37, %s4793_s16  ;;  %s4810_s16 = smov 24  }
 0x3c1   : > { %1198 = vrot.lane.b32.xlu2 %v4304_v37, %s4791_s20  ;;  %s4804_s20 = smov 16  }
 0x40c   : > { %v1061_v21 = vpop.xlane.xlu1 %1060 }
 0x40d   : > { %3312 = vrcp.f32 %v1061_v21  ;;  %v1363_v21 = vperm.slane %v4299_v28, 1 }
 0x413   : > { %v3313_v22 = vpop.eup %3312 }
 0x414   : > { %v1128_v23 = vpop.xlane.xlu2 %1127  ;;  %v1063_v24 = vmul.f32 %v3313_v22, %v3305_v4  ;;  %v1368_v4 = vld [vmem:[%s4873_s19 + $0x18] sm:$0xff] }
 0x416   : > { %3010 = vmatmul.msk.f32.vlgmr.msra.gmra.mxu2 %vm1026_vm5, %v1063_v24  ;;  %v3286_v24 = vld [vmem:[#allocation13] ss:$0 sm:$0xff] }
 0x419   : > { %v1195_v25 = vpop.xlane.xlu0 %1194 }
 0x41a   : > { %3314 = vrcp.f32 %v1195_v25 }
 0x41b   : > { %3316 = vrcp.f32 %v1128_v23 }
 0x41c   : > { %v1262_v27 = vpop.xlane.xlu2 %1261 }
 0x41d   : > { %3318 = vrcp.f32 %v1262_v27 }
 0x41e   : > { %v1420_v25 = vpop.f32.mrf.mxu0 }
 0x41f   : > { %v4414_v27 = vadd.f32 %v3286_v24, %v1420_v25 }
 0x420   : > { %v3315_v29 = vpop.eup %3314 }
 0x421   : > { %v1197_v31 = vmul.f32 %v3315_v29, %v3309_v16  ;;  %v3317_v32 = vpop.eup %3316  ;;  %v3287_v29 = vld [vmem:[#allocation10] ss:$0 sm:$0xff] }
 0x422   : > { %v1130_v34 = vmul.f32 %v3317_v32, %v3307_v13 }
 0x423   : > { %v3319_v36 = vpop.eup %3318 }
 0x424   : > { %v1199_v30 = vpop.permute.xlu2 %1198  ;;  %v1266_v35 = vpop.permute.xlu1 %1265  ;;  %v1264_v37 = vmul.f32 %v3319_v36, %v3311_v19 }
 0x425   : > { %1219 = vmatpush.msra.mxu3 %v1199_v30 }
 0x426   : > { %3016 = vmatmul.msk.f32.vlgmr.msra.gmra.mxu3 %vm1026_vm5, %v1197_v31 }
 0x427   : > { %1386 = vmatpush.msrb.mxu3 %v1368_v4 }
 0x429   : > { %1387 = vmatpush.msrb.mxu3 %v1367_v5 }
 0x42b   : > { %1388 = vmatpush.msrb.mxu3 %v1366_v6 }
 0x42c   : > { %v1132_v33 = vpop.permute.xlu0 %1131 }
 0x42d   : > { %1152 = vmatpush.msrb.mxu2 %v1132_v33  ;;  %1389 = vmatpush.msrb.mxu3 %v1365_v7 }
 0x42e   : > { %3013 = vmatmul.msk.f32.vlgmr.msrb.gmra.mxu2 %vm1026_vm5, %v1130_v34 }
 0x42f   : > { %1286 = vmatpush.msra.mxu2 %v1266_v35 }
 0x431   : > { %3023 = vmatpush.xpose.msk.msrb.mxu2 %vm1026_vm5, %v4414_v27 }
 0x436   : > { %3019 = vmatmul.msk.f32.vlgmr.msra.gmra.mxu2 %vm1026_vm5, %v1264_v37 }
 0x499   : > { %v1087_v38 = vpop.f32.mrf.mxu2 }
 0x4a9   : > { %v1221_v39 = vpop.f32.mrf.mxu3 }
 0x4aa   : > { %1296 = vrot.lane.b32.xlu1 %v1221_v39, %s4804_s20  ;;  %s4878_s20 = smov 80  }
 0x4b1   : > { %v1154_v40 = vpop.f32.mrf.mxu2 }
 0x4b2   : > { %1292 = vrot.lane.b32.xlu0 %v1154_v40, %s4806_s15  ;;  %s953_s15 = scalar_lea.vmem %s4876_s9, %s4875_s18  ;;  %s4880_s18 = smov 88  }
 0x4b3   : > { %v4439_v39 = vld [vmem:[%s953_s15] sm:$0xff]  ;;  %s4888_s9 = smov 40   ;;  %s4889_s15 = smov 48  }
 0x4b9   : > { %v1288_v41 = vpop.f32.mrf.mxu2 }
 0x4ba   : > { %1300 = vrot.lane.b32.xlu2 %v1288_v41, %s4810_s16 }
 0x4c2   : > { %1490 = vrot.lane.b32.xlu2 %v4414_v27, %s4814_s4 }
 0x4ca   : > { %1557 = vrot.lane.b32.xlu2 %v4414_v27, %s4812_s0 }
 0x4d2   : > { %1624 = vrot.lane.b32.xlu2 %v4414_v27, %s4874_s11 }
 0x514   : > { %v1301_v50 = vpop.permute.xlu2 %1300 }
 0x51c   : > { %v1297_v48 = vpop.permute.xlu1 %1296  ;;  %v1491_v32 = vpop.permute.xlu2 %1490 }
 0x51d   : > { %3026 = vmatpush.xpose.msk.msra.mxu3 %vm1026_vm5, %v1491_v32 }
 0x524   : > { %v1293_v47 = vpop.permute.xlu0 %1292  ;;  %v1558_v33 = vpop.permute.xlu2 %1557 }
 0x525   : > { %v1303_v49 = vsel %vm1026_vm5, %v1087_v38, %v1293_v47  ;;  %3029 = vmatpush.xpose.msk.msra.mxu2 %vm1026_vm5, %v1558_v33 }
 0x526   : > { %v1305_v51 = vsel %vm1304_vm6, %v1303_v49, %v1297_v48 }
 0x527   : > { %v1307_v52 = vsel %vm1306_vm7, %v1305_v51, %v1301_v50 }
 0x528   : > { %3020 = vmatmul.msk.f32.vlgmr.msra.gmra.mxu1 %vm960_vm0, %v1307_v52 }
 0x52c   : > { %v1625_v34 = vpop.permute.xlu2 %1624 }
 0x5a5   : > { %v1332_v54 = vpop.f32.mrf.mxu1 }
 0x5a6   : > { %v1335_v55 = vadd.f32 %v1332_v54, %v4269_v0 }
 0x5a8   : > { %v4385_v56 = vadd.f32 %v3285_v53, %v1335_v55 }
 0x5aa   : > { %v1339_v57 = vsel %vm960_vm0, %v4385_v56, 0.0 }
 0x5ab   : > { %1340 = vadd.xlane.f32.xlu0 %v1339_v57 }
 0x61e   : > { %v1341_v61 = vpop.xlane.xlu0 %1340 }
 0x61f   : > { %v1342_v62 = vmul.f32 %v1341_v61, %v4273_v8 }
 0x621   : > { %v1343_v63 = vsub.f32 %v4385_v56, %v1342_v62 }
 0x623   : > { %v1344_v1 = vmul.f32 %v1343_v63, %v1343_v63 }
 0x625   : > { %v1345_v0 = vsel %vm960_vm0, %v1344_v1, 0.0 }
 0x626   : > { %1346 = vadd.xlane.f32.xlu1 %v1345_v0 }
 0x699   : > { %v1347_v9 = vpop.xlane.xlu1 %1346 }
 0x69a   : > { %v1348_v10 = vmul.f32 %v1347_v9, %v4273_v8 }
 0x69c   : > { %v1349_v11 = vadd.f32 1e-05, %v1348_v10 }
 0x69e   : > { %3320 = vrsqrt.f32 %v1349_v11  ;;  %vm1356_vm9 = vweird.f32 %v1349_v11 }
 0x6a4   : > { %v3321_v12 = vpop.eup %3320 }
 0x6a5   : > { %v1351_v13 = vmul.f32 %v3321_v12, %v1349_v11  ;;  %vm1357_vm8 = vweird.f32 %v3321_v12 }
 0x6a6   : > { %vm1358_vm10 = vmor %vm1356_vm9, %vm1357_vm8 }
 0x6a7   : > { %v1352_v14 = vmul.f32 %v3321_v12, %v1351_v13 }
 0x6a9   : > { %v1353_v15 = vmul.f32 0.5, %v1352_v14 }
 0x6ab   : > { %v1354_v16 = vsub.f32 1.5, %v1353_v15 }
 0x6ad   : > { %v1355_v17 = vmul.f32 %v3321_v12, %v1354_v16 }
 0x6af   : > { %v1359_v19 = vsel %vm1358_vm10, %v3321_v12, %v1355_v17 }
 0x6b0   : > { %v1360_v20 = vmul.f32 %v1359_v19, %v1343_v63 }
 0x6b2   : > { %v1362_v22 = vmul.f32 %v1361_v18, %v1360_v20 }
 0x6b4   : > { %v1364_v23 = vadd.f32 %v1363_v21, %v1362_v22 }
 0x6b6   : > { %3021 = vmatmul.msk.f32.vlgmr.msrb.gmra.mxu3 %vm960_vm0, %v1364_v23 }
 0x6b7   : > { %3032 = vmatpush.xpose.msk.msrb.mxu3 %vm1026_vm5, %v1625_v34 }
 0x739   : > { %v1391_v30 = vpop.f32.mrf.mxu3 }
 0x73a   : > { %v1392_v31 = vadd.f32 %v3287_v29, %v1391_v30 }
 0x73c   : > { %1622 = vrot.lane.b32.xlu0 %v1392_v31, %s4874_s11  ;;  %1488 = vrot.lane.b32.xlu2 %v1392_v31, %s4814_s4  ;;  %s4886_s4 = smov 112  }
 0x73d   : > { %3024 = vmatmul.msk.f32.vlgmr.msrb.gmra.mxu2 %vm1026_vm5, %v1392_v31 }
 0x744   : > { %1555 = vrot.lane.b32.xlu2 %v1392_v31, %s4812_s0  ;;  %s4887_s0 = smov 56  }
 0x796   : > { %v1489_v35 = vpop.permute.xlu2 %1488 }
 0x797   : > { %3027 = vmatmul.msk.f32.vlgmr.msra.gmra.mxu3 %vm1026_vm5, %v1489_v35 }
 0x79e   : > { %v1556_v36 = vpop.permute.xlu2 %1555 }
 0x79f   : > { %3030 = vmatmul.msk.f32.vlgmr.msra.gmra.mxu2 %vm1026_vm5, %v1556_v36 }
 0x7ae   : > { %v1623_v37 = vpop.permute.xlu0 %1622 }
 0x7af   : > { %3033 = vmatmul.msk.f32.vlgmr.msrb.gmra.mxu3 %vm1026_vm5, %v1623_v37  ;;  %v1707_v37 = vld [vmem:[#allocation14 + $0x18] sm:$0xff] }
 0x7b0   : > { %1723 = vmatpush.msrb.mxu2 %v1707_v37 }
 0x7c0   : > { %v1446_v38 = vpop.f32.mrf.mxu2 }
 0x7c1   : > { %v1449_v40 = vmul.f32 0.35355338, %v1446_v38  ;;  %v1706_v38 = vld [vmem:[#allocation14 + $0x10] sm:$0xff] }
 0x7c2   : > { %1724 = vmatpush.msrb.mxu2 %v1706_v38  ;;  %v3043_v38 = vld [vmem:[%s4868_s22 + $0x38] sm:$0xff] }
 0x7c3   : > { %v1450_v41 = vadd.f32 %v1449_v40, %v4439_v39  ;;  %v1705_v40 = vld [vmem:[#allocation14 + $0x8] sm:$0xff] }
 0x7c4   : > { %1725 = vmatpush.msrb.mxu2 %v1705_v40  ;;  %v3042_v40 = vld [vmem:[%s4868_s22 + $0x30] sm:$0xff] }
 0x7c5   : > { %v1451_v42 = vsel %vm1026_vm5, %v1450_v41, -inf }
 0x7c6   : > { %1452 = vmax.xlane.f32.xlu1 %v1451_v42 }
 0x81a   : > { %v1513_v43 = vpop.f32.mrf.mxu3 }
 0x81b   : > { %v1516_v44 = vmul.f32 0.35355338, %v1513_v43 }
 0x81d   : > { %v1517_v45 = vadd.f32 %v1516_v44, %v4439_v39 }
 0x81f   : > { %v1518_v47 = vsel %vm1026_vm5, %v1517_v45, -inf }
 0x820   : > { %1519 = vmax.xlane.f32.xlu2 %v1518_v47 }
 0x822   : > { %v1580_v48 = vpop.f32.mrf.mxu2 }
 0x823   : > { %v1583_v49 = vmul.f32 0.35355338, %v1580_v48 }
 0x825   : > { %v1584_v50 = vadd.f32 %v1583_v49, %v4439_v39  ;;  %v3288_v49 = vld [vmem:[#allocation16] ss:$0 sm:$0xff] }
 0x827   : > { %v1585_v51 = vsel %vm1026_vm5, %v1584_v50, -inf }
 0x828   : > { %1586 = vmax.xlane.f32.xlu1 %v1585_v51 }
 0x832   : > { %v1647_v52 = vpop.f32.mrf.mxu3 }
 0x833   : > { %v1650_v53 = vmul.f32 0.35355338, %v1647_v52 }
 0x835   : > { %v1651_v54 = vadd.f32 %v1650_v53, %v4439_v39 }
 0x837   : > { %v1652_v55 = vsel %vm1026_vm5, %v1651_v54, -inf }
 0x838   : > { %1653 = vmax.xlane.f32.xlu1 %v1652_v55 }
 0x839   : > { %v1453_v57 = vpop.xlane.xlu1 %1452 }
 0x83a   : > { %v1454_v58 = vsub.f32 %v1450_v41, %v1453_v57  ;;  %v1704_v41 = vld [vmem:[#allocation14] sm:$0xff] }
 0x83b   : > { %1726 = vmatpush.msrb.mxu2 %v1704_v41  ;;  %v3041_v41 = vld [vmem:[%s4868_s22 + $0x28] sm:$0xff] }
 0x83c   : > { %v1455_v59 = vmul.f32 1.442695, %v1454_v58 }
 0x83e   : > { %3322 = vpow2.f32 %v1455_v59 }
 0x844   : > { %v3323_v60 = vpop.eup %3322 }
 0x845   : > { %v1457_v61 = vsel %vm1026_vm5, %v3323_v60, 0.0 }
 0x846   : > { %1458 = vadd.xlane.f32.xlu0 %v1457_v61  ;;  %v1763_v61 = vld [vmem:[#allocation17 + $0x10] sm:$0xff] }
 0x851   : > { %1462 = vrot.lane.b32.xlu1 %v4414_v27, %s4877_s1 }
 0x85a   : > { %1596 = vrot.lane.b32.xlu0 %v4414_v27, %s4878_s20 }
 0x893   : > { %v1520_v62 = vpop.xlane.xlu2 %1519 }
 0x894   : > { %v1521_v63 = vsub.f32 %v1517_v45, %v1520_v62  ;;  %v1762_v62 = vld [vmem:[#allocation17 + $0x8] sm:$0xff] }
 0x896   : > { %v1522_v1 = vmul.f32 1.442695, %v1521_v63  ;;  %v1761_v63 = vld [vmem:[#allocation17] sm:$0xff] }
 0x898   : > { %3324 = vpow2.f32 %v1522_v1 }
 0x89b   : > { %v1587_v0 = vpop.xlane.xlu1 %1586 }
 0x89c   : > { %v1588_v2 = vsub.f32 %v1584_v50, %v1587_v0 }
 0x89e   : > { %v3325_v4 = vpop.eup %3324  ;;  %v1589_v5 = vmul.f32 1.442695, %v1588_v2 }
 0x89f   : > { %v1524_v6 = vsel %vm1026_vm5, %v3325_v4, 0.0 }
 0x8a0   : > { %3326 = vpow2.f32 %v1589_v5  ;;  %1525 = vadd.xlane.f32.xlu1 %v1524_v6 }
 0x8a6   : > { %v3327_v7 = vpop.eup %3326 }
 0x8a7   : > { %v1591_v9 = vsel %vm1026_vm5, %v3327_v7, 0.0 }
 0x8a8   : > { %1592 = vadd.xlane.f32.xlu1 %v1591_v9 }
 0x8ab   : > { %v1654_v10 = vpop.xlane.xlu1 %1653 }
 0x8ac   : > { %v1655_v11 = vsub.f32 %v1651_v54, %v1654_v10 }
 0x8ae   : > { %v1656_v12 = vmul.f32 1.442695, %v1655_v11 }
 0x8b0   : > { %3328 = vpow2.f32 %v1656_v12 }
 0x8b6   : > { %v3329_v13 = vpop.eup %3328 }
 0x8b7   : > { %v1658_v14 = vsel %vm1026_vm5, %v3329_v13, 0.0 }
 0x8b8   : > { %1659 = vadd.xlane.f32.xlu2 %v1658_v14 }
 0x8b9   : > { %v1459_v15 = vpop.xlane.xlu0 %1458 }
 0x8ba   : > { %3330 = vrcp.f32 %v1459_v15  ;;  %v1757_v15 = vperm.slane %v4294_v26, 2 }
 0x8c0   : > { %v3331_v16 = vpop.eup %3330 }
 0x8c1   : > { %1663 = vrot.lane.b32.xlu1 %v4414_v27, %s4879_s24  ;;  %v1461_v17 = vmul.f32 %v3331_v16, %v3323_v60  ;;  %v1764_v60 = vld [vmem:[#allocation17 + $0x18] sm:$0xff] }
 0x8c3   : > { %v1463_v18 = vpop.permute.xlu1 %1462 }
 0x8c4   : > { %1483 = vmatpush.msrb.mxu1 %v1463_v18 }
 0x8c5   : > { %3025 = vmatmul.msk.f32.vlgmr.msrb.gmra.mxu1 %vm1026_vm5, %v1461_v17  ;;  %v1759_v17 = vperm.slane %v4299_v28, 2  ;;  %v3289_v28 = vld [vmem:[#allocation19] ss:$0 sm:$0xff] }
 0x8cc   : > { %v1597_v19 = vpop.permute.xlu0 %1596 }
 0x8cd   : > { %1617 = vmatpush.msra.mxu1 %v1597_v19 }
 0x8cf   : > { %1782 = vmatpush.msrb.mxu1 %v1764_v60 }
 0x8d0   : > { %1529 = vrot.lane.b32.xlu2 %v4414_v27, %s4880_s18 }
 0x8d1   : > { %1783 = vmatpush.msrb.mxu1 %v1763_v61 }
 0x8d3   : > { %1784 = vmatpush.msrb.mxu1 %v1762_v62  ;;  %v3291_v62 = vld [vmem:[#allocation7 + $0x1] ss:$0 sm:$0xff] }
 0x8d5   : > { %1785 = vmatpush.msrb.mxu1 %v1761_v63 }
 0x913   : > { %v1526_v20 = vpop.xlane.xlu1 %1525 }
 0x91b   : > { %v1593_v21 = vpop.xlane.xlu1 %1592 }
 0x91c   : > { %3332 = vrcp.f32 %v1593_v21 }
 0x91d   : > { %3334 = vrcp.f32 %v1526_v20 }
 0x922   : > { %v3333_v22 = vpop.eup %3332 }
 0x923   : > { %v1595_v23 = vmul.f32 %v3333_v22, %v3327_v7  ;;  %v3335_v25 = vpop.eup %3334 }
 0x924   : > { %v1528_v29 = vmul.f32 %v3335_v25, %v3325_v4 }
 0x925   : > { %3031 = vmatmul.msk.f32.vlgmr.msra.gmra.mxu1 %vm1026_vm5, %v1595_v23 }
 0x92b   : > { %v1660_v24 = vpop.xlane.xlu2 %1659 }
 0x92c   : > { %3336 = vrcp.f32 %v1660_v24 }
 0x932   : > { %v3337_v32 = vpop.eup %3336 }
 0x933   : > { %v1530_v30 = vpop.permute.xlu2 %1529  ;;  %v1664_v31 = vpop.permute.xlu1 %1663  ;;  %v1662_v27 = vmul.f32 %v3337_v32, %v3329_v13 }
 0x934   : > { %1550 = vmatpush.msra.mxu0 %v1530_v30 }
 0x935   : > { %3028 = vmatmul.msk.f32.vlgmr.msra.gmra.mxu0 %vm1026_vm5, %v1528_v29  ;;  %v3290_v29 = vld [vmem:[#allocation20] ss:$0 sm:$0xff] }
 0x936   : > { %1684 = vmatpush.msrb.mxu0 %v1664_v31 }
 0x938   : > { %1879 = vmatpush.msra.mxu0 %v3043_v38 }
 0x93a   : > { %1880 = vmatpush.msra.mxu0 %v3042_v40 }
 0x93c   : > { %1881 = vmatpush.msra.mxu0 %v3041_v41 }
 0x93d   : > { %3034 = vmatmul.msk.f32.vlgmr.msrb.gmra.mxu0 %vm1026_vm5, %v1662_v27 }
 0x942   : > { %v1485_v33 = vpop.f32.mrf.mxu1 }
 0x9a2   : > { %v1619_v34 = vpop.f32.mrf.mxu1 }
 0x9a3   : > { %1694 = vrot.lane.b32.xlu2 %v1619_v34, %s4881_s23 }
 0x9b2   : > { %v1552_v35 = vpop.f32.mrf.mxu0 }
 0x9b3   : > { %1690 = vrot.lane.b32.xlu1 %v1552_v35, %s4882_s8 }
 0x9ba   : > { %v1686_v36 = vpop.f32.mrf.mxu0 }
 0x9bb   : > { %1698 = vrot.lane.b32.xlu0 %v1686_v36, %s4810_s16  ;;  %s4883_s16 = sld [smem:[#allocation54_spill]] }
 0x9c1   : > { %v1797_v1 = vld [vmem:[%s4883_s16 + $0x30] sm:$0xff]  ;;  %v1796_v0 = vld [vmem:[%s4883_s16 + $0x28] sm:$0xff]  ;;  %v1795_v5 = vld [vmem:[%s4883_s16 + $0x20] sm:$0xff] }
 0x9c2   : > { %v1794_v7 = vld [vmem:[%s4883_s16 + $0x18] sm:$0xff]  ;;  %v1793_v21 = vld [vmem:[%s4883_s16 + $0x10] sm:$0xff]  ;;  %v1792_v22 = vld [vmem:[%s4883_s16 + $0x8] sm:$0xff] }
 0x9c3   : > { %v1791_v26 = vld [vmem:[%s4883_s16] sm:$0xff] }
 0x9fd   : > { %v1695_v44 = vpop.permute.xlu2 %1694 }
 0xa25   : > { %v1691_v42 = vpop.permute.xlu1 %1690 }
 0xa26   : > { %v1701_v43 = vsel %vm1026_vm5, %v1485_v33, %v1691_v42  ;;  %v3040_v42 = vld [vmem:[%s4868_s22 + $0x20] sm:$0xff] }
 0xa27   : > { %v1702_v47 = vsel %vm1304_vm6, %v1701_v43, %v1695_v44  ;;  %1882 = vmatpush.msra.mxu0 %v3040_v42 }
 0xa2d   : > { %v1699_v45 = vpop.permute.xlu0 %1698 }
 0xa2e   : > { %v1703_v48 = vsel %vm1306_vm7, %v1702_v47, %v1699_v45 }
 0xa2f   : > { %3035 = vmatmul.msk.f32.vlgmr.msrb.gmra.mxu2 %vm960_vm0, %v1703_v48 }
 0xab2   : > { %v1728_v50 = vpop.f32.mrf.mxu2 }
 0xab3   : > { %v1731_v51 = vadd.f32 %v1728_v50, %v4385_v56  ;;  %v1798_v56 = vld [vmem:[%s4883_s16 + $0x38] sm:$0xff] }
 0xab4   : > { %1811 = vmatpush.msra.mxu3 %v1798_v56 }
 0xab5   : > { %v1734_v52 = vadd.f32 %v3288_v49, %v1731_v51  ;;  %v4528_v51 = vld [vmem:[%s4869_s13 + $0x4] sm:$0x7] }
 0xab6   : > { %1812 = vmatpush.msra.mxu3 %v1797_v1 }
 0xab7   : > { %v1735_v53 = vsel %vm960_vm0, %v1734_v52, 0.0 }
 0xab8   : > { %1736 = vadd.xlane.f32.xlu1 %v1735_v53  ;;  %1813 = vmatpush.msra.mxu3 %v1796_v0 }
 0xaba   : > { %1814 = vmatpush.msra.mxu3 %v1795_v5 }
 0xabc   : > { %1815 = vmatpush.msra.mxu3 %v1794_v7 }
 0xabe   : > { %1816 = vmatpush.msra.mxu3 %v1793_v21 }
 0xac0   : > { %1817 = vmatpush.msra.mxu3 %v1792_v22 }
 0xac2   : > { %1818 = vmatpush.msra.mxu3 %v1791_v26 }
 0xb2b   : > { %v1737_v54 = vpop.xlane.xlu1 %1736 }
 0xb2c   : > { %v1738_v55 = vmul.f32 %v1737_v54, %v4273_v8  ;;  %v4533_v54 = vld [vmem:[%s4870_s17 + $0x4] sm:$0x7] }
 0xb2e   : > { %v1739_v57 = vsub.f32 %v1734_v52, %v1738_v55  ;;  %v1853_v55 = vperm.slane %v4528_v51, 0 }
 0xb30   : > { %v1740_v58 = vmul.f32 %v1739_v57, %v1739_v57 }
 0xb32   : > { %v1741_v59 = vsel %vm960_vm0, %v1740_v58, 0.0 }
 0xb33   : > { %1742 = vadd.xlane.f32.xlu2 %v1741_v59  ;;  %v1855_v59 = vperm.slane %v4533_v54, 0 }
 0xba6   : > { %v1743_v2 = vpop.xlane.xlu2 %1742 }
 0xba7   : > { %v1744_v4 = vmul.f32 %v1743_v2, %v4273_v8 }
 0xba9   : > { %v1745_v6 = vadd.f32 1e-05, %v1744_v4 }
 0xbab   : > { %3338 = vrsqrt.f32 %v1745_v6  ;;  %vm1752_vm12 = vweird.f32 %v1745_v6 }
 0xbb1   : > { %v3339_v9 = vpop.eup %3338 }
 0xbb2   : > { %v1747_v10 = vmul.f32 %v3339_v9, %v1745_v6  ;;  %vm1753_vm11 = vweird.f32 %v3339_v9 }
 0xbb3   : > { %vm1754_vm13 = vmor %vm1752_vm12, %vm1753_vm11 }
 0xbb4   : > { %v1748_v11 = vmul.f32 %v3339_v9, %v1747_v10 }
 0xbb6   : > { %v1749_v12 = vmul.f32 0.5, %v1748_v11 }
 0xbb8   : > { %v1750_v13 = vsub.f32 1.5, %v1749_v12 }
 0xbba   : > { %v1751_v14 = vmul.f32 %v3339_v9, %v1750_v13 }
 0xbbc   : > { %v1755_v16 = vsel %vm1754_vm13, %v3339_v9, %v1751_v14 }
 0xbbd   : > { %v1756_v18 = vmul.f32 %v1755_v16, %v1739_v57 }
 0xbbf   : > { %v1758_v19 = vmul.f32 %v1757_v15, %v1756_v18 }
 0xbc1   : > { %v1760_v20 = vadd.f32 %v1759_v17, %v1758_v19 }
 0xbc3   : > { %3036 = vmatmul.msk.f32.vlgmr.msrb.gmra.mxu1 %vm960_vm0, %v1760_v20 }
 0xc40   : > { %v1787_v23 = vpop.f32.mrf.mxu1 }
 0xc41   : > { %v1788_v24 = vadd.f32 %v3289_v28, %v1787_v23 }
 0xc43   : > { %v1790_v25 = vmax.f32 %v1788_v24, 0.0 }
 0xc45   : > { %3037 = vmatmul.msk.f32.vlgmr.msra.gmra.mxu3 %vm1799_vm14, %v1790_v25 }
 0xcc8   : > { %v1820_v30 = vpop.f32.mrf.mxu3 }
 0xcc9   : > { %v1823_v31 = vadd.f32 %v1820_v30, %v1734_v52 }
 0xccb   : > { %v4505_v32 = vadd.f32 %v3290_v29, %v1823_v31 }
 0xccd   : > { %v1831_v27 = vsel %vm960_vm0, %v4505_v32, 0.0 }
 0xcce   : > { %1832 = vadd.xlane.f32.xlu0 %v1831_v27 }
 0xd41   : > { %v1833_v33 = vpop.xlane.xlu0 %1832 }
 0xd42   : > { %v1834_v34 = vmul.f32 %v1833_v33, %v4273_v8 }
 0xd44   : > { %v1835_v35 = vsub.f32 %v4505_v32, %v1834_v34 }
 0xd46   : > { %v1836_v36 = vmul.f32 %v1835_v35, %v1835_v35 }
 0xd48   : > { %v1837_v37 = vsel %vm960_vm0, %v1836_v36, 0.0 }
 0xd49   : > { %1838 = vadd.xlane.f32.xlu1 %v1837_v37 }
 0xdbc   : > { %v1839_v43 = vpop.xlane.xlu1 %1838 }
 0xdbd   : > { %v1840_v44 = vmul.f32 %v1839_v43, %v4273_v8 }
 0xdbf   : > { %v1841_v45 = vadd.f32 1e-05, %v1840_v44 }
 0xdc1   : > { %3340 = vrsqrt.f32 %v1841_v45  ;;  %vm1848_vm1 = vweird.f32 %v1841_v45 }
 0xdc7   : > { %v3341_v47 = vpop.eup %3340 }
 0xdc8   : > { %v1843_v48 = vmul.f32 %v3341_v47, %v1841_v45  ;;  %vm1849_vm15 = vweird.f32 %v3341_v47 }
 0xdc9   : > { %vm1850_vm2 = vmor %vm1848_vm1, %vm1849_vm15 }
 0xdca   : > { %v1844_v49 = vmul.f32 %v3341_v47, %v1843_v48 }
 0xdcc   : > { %v1845_v50 = vmul.f32 0.5, %v1844_v49 }
 0xdce   : > { %v1846_v52 = vsub.f32 1.5, %v1845_v50 }
 0xdd0   : > { %v1847_v53 = vmul.f32 %v3341_v47, %v1846_v52 }
 0xdd2   : > { %v1851_v57 = vsel %vm1850_vm2, %v3341_v47, %v1847_v53 }
 0xdd3   : > { %v1852_v58 = vmul.f32 %v1851_v57, %v1835_v35 }
 0xdd5   : > { %v1854_v60 = vmul.f32 %v1853_v55, %v1852_v58 }
 0xdd7   : > { %v1856_v61 = vadd.f32 %v1855_v59, %v1854_v60 }
 0xdd9   : > { %3044 = vmatmul.msk.f32.vlgmr.msra.gmra.mxu0 %vm960_vm0, %v1856_v61 }
 0xe56   : > { %v1884_v63 = vpop.f32.mrf.mxu0 }
 0xe57   : > { %v4538_v56 = vadd.f32 %v3291_v62, %v1884_v63 }
 0xe59   : > { %1927 = vrot.lane.b32.xlu1 %v4538_v56, %s4884_s2  ;;  %1888 = vrot.lane.b32.xlu2 %v4538_v56, %s4877_s1 }
 0xe61   : > { %1953 = vrot.lane.b32.xlu2 %v4538_v56, %s4885_s27 }
 0xe69   : > { %2022 = vrot.lane.b32.xlu2 %v4538_v56, %s4878_s20 }
 0xe71   : > { %2087 = vrot.lane.b32.xlu2 %v4538_v56, %s4874_s11 }
 0xeb3   : > { %v1889_v1 = vpop.permute.xlu2 %1888 }
 0xeb4   : > { %3045 = vmatpush.xpose.msk.msra.mxu2 %vm1026_vm5, %v1889_v1 }
 0xeb7   : > { %3046 = vmatmul.msk.f32.vlgmr.msra.gmra.mxu2 %vm1026_vm5, %v4538_v56 }
 0xebb   : > { %v1954_v0 = vpop.permute.xlu2 %1953 }
 0xec3   : > { %v2023_v4 = vpop.permute.xlu2 %2022 }
 0xecb   : > { %v1928_v2 = vpop.permute.xlu1 %1927  ;;  %v2088_v17 = vpop.permute.xlu2 %2087 }
 0xecc   : > { %1948 = vmatpush.msra.mxu1 %v1928_v2 }
 0xece   : > { %3051 = vmatpush.xpose.msk.msrb.mxu1 %vm1026_vm5, %v2023_v4 }
 0xf3a   : > { %v1911_v5 = vpop.f32.mrf.mxu2 }
 0xf3b   : > { %v1914_v6 = vmul.f32 0.35355338, %v1911_v5 }
 0xf3d   : > { %v1915_v7 = vadd.f32 %v1914_v6, %v4339_v46  ;;  %v3060_v6 = vld [vmem:[%s4872_s10 + $0x38] sm:$0xff] }
 0xf3f   : > { %v1916_v9 = vsel %vm1026_vm5, %v1915_v7, -inf }
 0xf40   : > { %1917 = vmax.xlane.f32.xlu0 %v1916_v9 }
 0xf54   : > { %1955 = vrot.lane.b32.xlu0 %v4538_v56, %s4880_s18 }
 0xf5c   : > { %2089 = vrot.lane.b32.xlu0 %v4538_v56, %s4879_s24 }
 0xfb3   : > { %v1918_v10 = vpop.xlane.xlu0 %1917 }
 0xfb4   : > { %v1919_v11 = vsub.f32 %v1915_v7, %v1918_v10  ;;  %v3058_v7 = vld [vmem:[%s4872_s10 + $0x28] sm:$0xff]  ;;  %v3057_v10 = vld [vmem:[%s4872_s10 + $0x20] sm:$0xff] }
 0xfb6   : > { %v1920_v12 = vmul.f32 1.442695, %v1919_v11 }
 0xfb8   : > { %3342 = vpow2.f32 %v1920_v12 }
 0xfbe   : > { %v3343_v13 = vpop.eup %3342 }
 0xfbf   : > { %v1922_v14 = vsel %vm1026_vm5, %v3343_v13, 0.0 }
 0xfc0   : > { %1923 = vadd.xlane.f32.xlu1 %v1922_v14 }
 0xfc6   : > { %v1956_v15 = vpop.permute.xlu0 %1955 }
 0xfc7   : > { %3048 = vmatpush.xpose.msk.msrb.mxu0 %vm1026_vm5, %v1956_v15 }
 0xfca   : > { %3049 = vmatmul.msk.f32.vlgmr.msrb.gmra.mxu0 %vm1026_vm5, %v1954_v0 }
 0xfce   : > { %v2090_v16 = vpop.permute.xlu0 %2089 }
 0xfcf   : > { %3054 = vmatpush.xpose.msk.msra.mxu0 %vm1026_vm5, %v2090_v16 }
 0xfd2   : > { %3055 = vmatmul.msk.f32.vlgmr.msra.gmra.mxu0 %vm1026_vm5, %v2088_v17  ;;  %v3292_v17 = vld [vmem:[#allocation8 + $0x1] ss:$0 sm:$0xff] }
 0xfd9   : > { %2020 = vrot.lane.b32.xlu1 %v4538_v56, %s4886_s4 }
0x1033   : > { %v1924_v18 = vpop.xlane.xlu1 %1923 }
0x1034   : > { %3344 = vrcp.f32 %v1924_v18 }
0x103a   : > { %v3345_v19 = vpop.eup %3344 }
0x103b   : > { %v1926_v20 = vmul.f32 %v3345_v19, %v3343_v13 }
0x103d   : > { %3047 = vmatmul.msk.f32.vlgmr.msra.gmra.mxu1 %vm1026_vm5, %v1926_v20 }
0x103e   : > { %2189 = vmatpush.msra.mxu1 %v3060_v6 }
0x1047   : > { %v1978_v21 = vpop.f32.mrf.mxu0 }
0x1048   : > { %v1981_v22 = vmul.f32 0.35355338, %v1978_v21 }
0x104a   : > { %v1982_v26 = vadd.f32 %v1981_v22, %v4339_v46  ;;  %v2261_v22 = vld [vmem:[#allocation11 + $0x38] sm:$0xff] }
0x104b   : > { %v2021_v28 = vpop.permute.xlu1 %2020  ;;  %2276 = vmatpush.msrb.mxu0 %v2261_v22 }
0x104c   : > { %3052 = vmatmul.msk.f32.vlgmr.msrb.gmra.mxu1 %vm1026_vm5, %v2021_v28  ;;  %v1983_v23 = vsel %vm1026_vm5, %v1982_v26, -inf  ;;  %v2259_v28 = vld [vmem:[#allocation11 + $0x28] sm:$0xff] }
0x104d   : > { %1984 = vmax.xlane.f32.xlu0 %v1983_v23  ;;  %v2258_v23 = vld [vmem:[#allocation11 + $0x20] sm:$0xff] }
0x104f   : > { %v2112_v24 = vpop.f32.mrf.mxu0 }
0x1050   : > { %v2115_v25 = vmul.f32 0.35355338, %v2112_v24 }
0x1052   : > { %v2116_v29 = vadd.f32 %v2115_v25, %v4339_v46 }
0x1054   : > { %v2117_v30 = vsel %vm1026_vm5, %v2116_v29, -inf }
0x1055   : > { %2118 = vmax.xlane.f32.xlu2 %v2117_v30 }
0x10ba   : > { %v4573_v27 = vpop.f32.mrf.mxu1 }
0x10c0   : > { %v1985_v31 = vpop.xlane.xlu0 %1984 }
0x10c1   : > { %v1986_v33 = vsub.f32 %v1982_v26, %v1985_v31  ;;  %v2260_v26 = vld [vmem:[#allocation11 + $0x30] sm:$0xff] }
0x10c2   : > { %2277 = vmatpush.msrb.mxu0 %v2260_v26  ;;  %v3065_v31 = vld [vmem:[%s4873_s19 + $0x38] sm:$0xff] }
0x10c3   : > { %v1987_v34 = vmul.f32 1.442695, %v1986_v33  ;;  %v3062_v33 = vld [vmem:[%s4873_s19 + $0x20] sm:$0xff] }
0x10c4   : > { %2278 = vmatpush.msrb.mxu0 %v2259_v28 }
0x10c5   : > { %3346 = vpow2.f32 %v1987_v34  ;;  %v3293_v34 = vld [vmem:[#allocation13 + $0x1] ss:$0 sm:$0xff] }
0x10c6   : > { %2279 = vmatpush.msrb.mxu0 %v2258_v23 }
0x10c7   : > { %3067 = vmatmul.msk.f32.vlgmr.msrb.gmra.mxu0 %vm960_vm0, %v4394_v3  ;;  %v3063_v3 = vld [vmem:[%s4873_s19 + $0x28] sm:$0xff] }
0x10c8   : > { %v2119_v35 = vpop.xlane.xlu2 %2118 }
0x10c9   : > { %v2120_v36 = vsub.f32 %v2116_v29, %v2119_v35  ;;  %v2045_v37 = vpop.f32.mrf.mxu1 }
0x10ca   : > { %v2048_v38 = vmul.f32 0.35355338, %v2045_v37 }
0x10cb   : > { %v3347_v40 = vpop.eup %3346  ;;  %v2121_v41 = vmul.f32 1.442695, %v2120_v36 }
0x10cc   : > { %v1989_v42 = vsel %vm1026_vm5, %v3347_v40, 0.0  ;;  %v2049_v43 = vadd.f32 %v2048_v38, %v4339_v46 }
0x10cd   : > { %3348 = vpow2.f32 %v2121_v41  ;;  %1990 = vadd.xlane.f32.xlu0 %v1989_v42 }
0x10ce   : > { %v2050_v44 = vsel %vm1026_vm5, %v2049_v43, -inf }
0x10cf   : > { %2051 = vmax.xlane.f32.xlu1 %v2050_v44 }
0x10d3   : > { %v3349_v45 = vpop.eup %3348 }
0x10d4   : > { %v2123_v47 = vsel %vm1026_vm5, %v3349_v45, 0.0 }
0x10d5   : > { %2124 = vadd.xlane.f32.xlu2 %v2123_v47 }
0x10e1   : > { %1994 = vrot.lane.b32.xlu0 %v4538_v56, %s4887_s0 }
0x10ed   : > { %2128 = vrot.lane.b32.xlu2 %v4538_v56, %s4888_s9  ;;  %s3092_s9 = sshll.u32 %s4068_s5, 3  ;;  %s2724_s5 = scalar_lea.sflag [#allocation4], %s4224_s14 }
0x1140   : > { %v1991_v52 = vpop.xlane.xlu0 %1990 }
0x1142   : > { %v2052_v48 = vpop.xlane.xlu1 %2051 }
0x1143   : > { %v2053_v49 = vsub.f32 %v2049_v43, %v2052_v48  ;;  %v2223_v48 = vperm.slane %v4528_v51, 1 }
0x1144   : > { %v2281_v35 = vpop.f32.mrf.mxu0 }
0x1145   : > { %v2054_v50 = vmul.f32 1.442695, %v2053_v49  ;;  %v4631_v36 = vadd.f32 %v3293_v34, %v2281_v35 }
0x1147   : > { %3350 = vpow2.f32 %v2054_v50 }
0x1148   : > { %3352 = vrcp.f32 %v1991_v52  ;;  %v2125_v46 = vpop.xlane.xlu2 %2124  ;;  %v2225_v52 = vperm.slane %v4533_v54, 1 }
0x1149   : > { %3354 = vrcp.f32 %v2125_v46 }
0x114d   : > { %v3351_v53 = vpop.eup %3350 }
0x114e   : > { %v2056_v55 = vsel %vm1026_vm5, %v3351_v53, 0.0  ;;  %v3353_v57 = vpop.eup %3352 }
0x114f   : > { %2057 = vadd.xlane.f32.xlu1 %v2056_v55  ;;  %v1993_v58 = vmul.f32 %v3353_v57, %v3347_v40  ;;  %v3355_v61 = vpop.eup %3354 }
0x1150   : > { %v2129_v60 = vpop.permute.xlu2 %2128  ;;  %v2127_v62 = vmul.f32 %v3355_v61, %v3349_v45 }
0x1153   : > { %v1995_v59 = vpop.permute.xlu0 %1994 }
0x1154   : > { %2015 = vmatpush.msrb.mxu2 %v1995_v59 }
0x1155   : > { %3050 = vmatmul.msk.f32.vlgmr.msrb.gmra.mxu2 %vm1026_vm5, %v1993_v58  ;;  %v3294_v58 = vld [vmem:[#allocation10 + $0x1] ss:$0 sm:$0xff] }
0x1156   : > { %2149 = vmatpush.msra.mxu2 %v2129_v60 }
0x1158   : > { %3068 = vmatpush.xpose.msk.msrb.mxu2 %vm1026_vm5, %v4631_v36 }
0x115d   : > { %3056 = vmatmul.msk.f32.vlgmr.msra.gmra.mxu2 %vm1026_vm5, %v2127_v62 }
0x1168   : > { %2061 = vrot.lane.b32.xlu1 %v4538_v56, %s4889_s15  ;;  %v3059_v56 = vld [vmem:[%s4872_s10 + $0x30] sm:$0xff] }
0x1169   : > { %2190 = vmatpush.msra.mxu1 %v3059_v56 }
0x116b   : > { %2191 = vmatpush.msra.mxu1 %v3058_v7 }
0x116d   : > { %2192 = vmatpush.msra.mxu1 %v3057_v10 }
0x11c2   : > { %v2058_v63 = vpop.xlane.xlu1 %2057 }
0x11c3   : > { %3356 = vrcp.f32 %v2058_v63 }
0x11c9   : > { %v3357_v1 = vpop.eup %3356 }
0x11ca   : > { %v2060_v2 = vmul.f32 %v3357_v1, %v3351_v53 }
0x11d8   : > { %v2017_v0 = vpop.f32.mrf.mxu2 }
0x11d9   : > { %2155 = vrot.lane.b32.xlu0 %v2017_v0, %s4882_s8 }
0x11da   : > { %v2062_v4 = vpop.permute.xlu1 %2061 }
0x11db   : > { %2082 = vmatpush.msrb.mxu3 %v2062_v4 }
0x11dc   : > { %3053 = vmatmul.msk.f32.vlgmr.msrb.gmra.mxu3 %vm1026_vm5, %v2060_v2 }
0x11dd   : > { %2249 = vmatpush.msra.mxu3 %v3065_v31 }
0x11e0   : > { %v2151_v5 = vpop.f32.mrf.mxu2 }
0x11e1   : > { %2163 = vrot.lane.b32.xlu1 %v2151_v5, %s4890_s12 }
0x11e9   : > { %2351 = vrot.lane.b32.xlu1 %v4631_v36, %s4885_s27 }
0x11f1   : > { %2418 = vrot.lane.b32.xlu1 %v4631_v36, %s4886_s4 }
0x11f9   : > { %2485 = vrot.lane.b32.xlu1 %v4631_v36, %s4874_s11 }
0x124b   : > { %v2156_v11 = vpop.permute.xlu0 %2155 }
0x124c   : > { %v2166_v12 = vsel %vm1026_vm5, %v4573_v27, %v2156_v11  ;;  %v3064_v27 = vld [vmem:[%s4873_s19 + $0x30] sm:$0xff] }
0x124d   : > { %2250 = vmatpush.msra.mxu3 %v3064_v27 }
0x124f   : > { %2251 = vmatpush.msra.mxu3 %v3063_v3 }
0x1251   : > { %2252 = vmatpush.msra.mxu3 %v3062_v33 }
0x1253   : > { %v2164_v14 = vpop.permute.xlu1 %2163 }
0x125b   : > { %v2352_v55 = vpop.permute.xlu1 %2351 }
0x125c   : > { %3071 = vmatpush.xpose.msk.msrb.mxu3 %vm1026_vm5, %v2352_v55 }
0x125f   : > { %v2084_v9 = vpop.f32.mrf.mxu3 }
0x1260   : > { %2159 = vrot.lane.b32.xlu0 %v2084_v9, %s4881_s23 }
0x1263   : > { %v2419_v57 = vpop.permute.xlu1 %2418 }
0x1264   : > { %3074 = vmatpush.xpose.msk.msra.mxu2 %vm1026_vm5, %v2419_v57 }
0x126b   : > { %v2486_v61 = vpop.permute.xlu1 %2485 }
0x12d2   : > { %v2160_v13 = vpop.permute.xlu0 %2159 }
0x12d3   : > { %v2167_v15 = vsel %vm1304_vm6, %v2166_v12, %v2160_v13 }
0x12d4   : > { %v2168_v16 = vsel %vm1306_vm7, %v2167_v15, %v2164_v14 }
0x12d5   : > { %3061 = vmatmul.msk.f32.vlgmr.msra.gmra.mxu1 %vm960_vm0, %v2168_v16 }
0x1352   : > { %v2194_v18 = vpop.f32.mrf.mxu1 }
0x1353   : > { %v2197_v19 = vadd.f32 %v2194_v18, %v4505_v32 }
0x1355   : > { %v4610_v20 = vadd.f32 %v3292_v17, %v2197_v19 }
0x1357   : > { %v2201_v21 = vsel %vm960_vm0, %v4610_v20, 0.0 }
0x1358   : > { %2202 = vadd.xlane.f32.xlu2 %v2201_v21 }
0x13cb   : > { %v2203_v24 = vpop.xlane.xlu2 %2202 }
0x13cc   : > { %v2204_v32 = vmul.f32 %v2203_v24, %v4273_v8 }
0x13ce   : > { %v2205_v25 = vsub.f32 %v4610_v20, %v2204_v32 }
0x13d0   : > { %v2206_v29 = vmul.f32 %v2205_v25, %v2205_v25 }
0x13d2   : > { %v2207_v30 = vsel %vm960_vm0, %v2206_v29, 0.0 }
0x13d3   : > { %2208 = vadd.xlane.f32.xlu0 %v2207_v30 }
0x1446   : > { %v2209_v37 = vpop.xlane.xlu0 %2208 }
0x1447   : > { %v2210_v38 = vmul.f32 %v2209_v37, %v4273_v8 }
0x1449   : > { %v2211_v40 = vadd.f32 1e-05, %v2210_v38 }
0x144b   : > { %3358 = vrsqrt.f32 %v2211_v40  ;;  %vm2218_vm4 = vweird.f32 %v2211_v40 }
0x1451   : > { %v3359_v41 = vpop.eup %3358 }
0x1452   : > { %v2213_v42 = vmul.f32 %v3359_v41, %v2211_v40  ;;  %vm2219_vm3 = vweird.f32 %v3359_v41 }
0x1453   : > { %vm2220_vm8 = vmor %vm2218_vm4, %vm2219_vm3 }
0x1454   : > { %v2214_v43 = vmul.f32 %v3359_v41, %v2213_v42 }
0x1456   : > { %v2215_v44 = vmul.f32 0.5, %v2214_v43 }
0x1458   : > { %v2216_v45 = vsub.f32 1.5, %v2215_v44 }
0x145a   : > { %v2217_v47 = vmul.f32 %v3359_v41, %v2216_v45 }
0x145c   : > { %v2221_v49 = vsel %vm2220_vm8, %v3359_v41, %v2217_v47 }
0x145d   : > { %v2222_v50 = vmul.f32 %v2221_v49, %v2205_v25 }
0x145f   : > { %v2224_v46 = vmul.f32 %v2223_v48, %v2222_v50 }
0x1461   : > { %v2226_v53 = vadd.f32 %v2225_v52, %v2224_v46 }
0x1463   : > { %3066 = vmatmul.msk.f32.vlgmr.msra.gmra.mxu3 %vm960_vm0, %v2226_v53 }
0x1464   : > { %3077 = vmatpush.xpose.msk.msra.mxu3 %vm1026_vm5, %v2486_v61  ;;  %v2569_v61 = vld [vmem:[#allocation14 + $0x38] sm:$0xff] }
0x14e6   : > { %v2254_v59 = vpop.f32.mrf.mxu3 }
0x14e7   : > { %v2255_v60 = vadd.f32 %v3294_v58, %v2254_v59 }
0x14e9   : > { %2483 = vrot.lane.b32.xlu2 %v2255_v60, %s4874_s11  ;;  %2349 = vrot.lane.b32.xlu1 %v2255_v60, %s4885_s27 }
0x14ea   : > { %3069 = vmatmul.msk.f32.vlgmr.msrb.gmra.mxu2 %vm1026_vm5, %v2255_v60 }
0x14eb   : > { %2585 = vmatpush.msrb.mxu2 %v2569_v61 }
0x14f1   : > { %2416 = vrot.lane.b32.xlu1 %v2255_v60, %s4886_s4 }
0x1543   : > { %v2484_v63 = vpop.permute.xlu2 %2483 }
0x155b   : > { %v2350_v62 = vpop.permute.xlu1 %2349 }
0x155c   : > { %3072 = vmatmul.msk.f32.vlgmr.msrb.gmra.mxu3 %vm1026_vm5, %v2350_v62  ;;  %v2568_v62 = vld [vmem:[#allocation14 + $0x30] sm:$0xff] }
0x155d   : > { %2586 = vmatpush.msrb.mxu2 %v2568_v62 }
0x1563   : > { %v2417_v1 = vpop.permute.xlu1 %2416 }
0x1564   : > { %3075 = vmatmul.msk.f32.vlgmr.msra.gmra.mxu2 %vm1026_vm5, %v2417_v1  ;;  %3078 = vmatmul.msk.f32.vlgmr.msra.gmra.mxu3 %vm1026_vm5, %v2484_v63  ;;  %v2567_v63 = vld [vmem:[#allocation14 + $0x28] sm:$0xff]  ;;  %v2566_v1 = vld [vmem:[#allocation14 + $0x20] sm:$0xff] }
0x1565   : > { %2587 = vmatpush.msrb.mxu2 %v2567_v63 }
0x1567   : > { %2588 = vmatpush.msrb.mxu2 %v2566_v1 }
0x156d   : > { %v2307_v0 = vpop.f32.mrf.mxu2 }
0x156e   : > { %v2310_v2 = vmul.f32 0.35355338, %v2307_v0 }
0x1570   : > { %v2311_v4 = vadd.f32 %v2310_v2, %v4439_v39 }
0x1572   : > { %v2312_v5 = vsel %vm1026_vm5, %v2311_v4, -inf }
0x1573   : > { %2313 = vmax.xlane.f32.xlu0 %v2312_v5 }
0x15df   : > { %v2374_v6 = vpop.f32.mrf.mxu3 }
0x15e0   : > { %v2377_v56 = vmul.f32 0.35355338, %v2374_v6 }
0x15e2   : > { %v2378_v7 = vadd.f32 %v2377_v56, %v4439_v39 }
0x15e4   : > { %v2379_v9 = vsel %vm1026_vm5, %v2378_v7, -inf }
0x15e5   : > { %2380 = vmax.xlane.f32.xlu1 %v2379_v9 }
0x15e6   : > { %v2314_v10 = vpop.xlane.xlu0 %2313 }
0x15e7   : > { %v2315_v11 = vsub.f32 %v2311_v4, %v2314_v10  ;;  %v2441_v12 = vpop.f32.mrf.mxu2  ;;  %v2508_v15 = vpop.f32.mrf.mxu3 }
0x15e8   : > { %v2444_v13 = vmul.f32 0.35355338, %v2441_v12  ;;  %v2511_v17 = vmul.f32 0.35355338, %v2508_v15 }
0x15e9   : > { %v2316_v14 = vmul.f32 1.442695, %v2315_v11 }
0x15ea   : > { %v2445_v16 = vadd.f32 %v2444_v13, %v4439_v39  ;;  %v2512_v19 = vadd.f32 %v2511_v17, %v4439_v39 }
0x15eb   : > { %3360 = vpow2.f32 %v2316_v14 }
0x15ec   : > { %v2446_v18 = vsel %vm1026_vm5, %v2445_v16, -inf  ;;  %v2513_v26 = vsel %vm1026_vm5, %v2512_v19, -inf }
0x15ed   : > { %2447 = vmax.xlane.f32.xlu0 %v2446_v18  ;;  %v2627_v18 = vld [vmem:[#allocation17 + $0x38] sm:$0xff] }
0x15f1   : > { %v3361_v21 = vpop.eup %3360 }
0x15f2   : > { %v2318_v22 = vsel %vm1026_vm5, %v3361_v21, 0.0 }
0x15f3   : > { %2319 = vadd.xlane.f32.xlu2 %v2318_v22  ;;  %v2624_v22 = vld [vmem:[#allocation17 + $0x20] sm:$0xff] }
0x15f5   : > { %2514 = vmax.xlane.f32.xlu0 %v2513_v26  ;;  %v3088_v26 = vld [vmem:[%s4883_s16 + $0x70] sm:$0xff] }
0x1609   : > { %2323 = vrot.lane.b32.xlu0 %v4631_v36, %s4877_s1  ;;  %s4891_s1 = sld [smem:[#allocation60_spill]] }
0x160b   : > { %2457 = vrot.lane.b32.xlu2 %v4631_v36, %s4878_s20 }
0x160f   : > { %s2734_s20 = scalar_lea.hbm %s4891_s1, %s3092_s9 }
0x1658   : > { %v2381_v28 = vpop.xlane.xlu1 %2380 }
0x1659   : > { %v2382_v23 = vsub.f32 %v2378_v7, %v2381_v28  ;;  %v3295_v7 = vld [vmem:[#allocation16 + $0x1] ss:$0 sm:$0xff] }
0x165a   : > { %v3087_v28 = vld [vmem:[%s4883_s16 + $0x68] sm:$0xff] }
0x165b   : > { %v2383_v24 = vmul.f32 1.442695, %v2382_v23 }
0x165d   : > { %3362 = vpow2.f32 %v2383_v24 }
0x1660   : > { %v2448_v32 = vpop.xlane.xlu0 %2447 }
0x1661   : > { %v2449_v25 = vsub.f32 %v2445_v16, %v2448_v32  ;;  %v3086_v32 = vld [vmem:[%s4883_s16 + $0x60] sm:$0xff] }
0x1663   : > { %v3363_v39 = vpop.eup %3362  ;;  %v2450_v29 = vmul.f32 1.442695, %v2449_v25 }
0x1664   : > { %v2385_v30 = vsel %vm1026_vm5, %v3363_v39, 0.0 }
0x1665   : > { %3364 = vpow2.f32 %v2450_v29  ;;  %2386 = vadd.xlane.f32.xlu0 %v2385_v30 }
0x1666   : > { %v2320_v35 = vpop.xlane.xlu2 %2319 }
0x1668   : > { %v2515_v31 = vpop.xlane.xlu0 %2514 }
0x1669   : > { %v2516_v27 = vsub.f32 %v2512_v19, %v2515_v31  ;;  %v2626_v19 = vld [vmem:[#allocation17 + $0x30] sm:$0xff] }
0x166b   : > { %v3365_v3 = vpop.eup %3364  ;;  %v2517_v33 = vmul.f32 1.442695, %v2516_v27 }
0x166c   : > { %v2452_v34 = vsel %vm1026_vm5, %v3365_v3, 0.0 }
0x166d   : > { %3366 = vpow2.f32 %v2517_v33  ;;  %2453 = vadd.xlane.f32.xlu0 %v2452_v34  ;;  %v2619_v34 = vperm.slane %v4528_v51, 2  ;;  %v3082_v51 = vld [vmem:[%s4883_s16 + $0x40] sm:$0xff] }
0x166e   : > { %3368 = vrcp.f32 %v2320_v35  ;;  %v2458_v43 = vpop.permute.xlu2 %2457 }
0x1673   : > { %v3367_v37 = vpop.eup %3366 }
0x1674   : > { %v2519_v38 = vsel %vm1026_vm5, %v3367_v37, 0.0  ;;  %v3369_v40 = vpop.eup %3368 }
0x1675   : > { %2520 = vadd.xlane.f32.xlu1 %v2519_v38  ;;  %v2322_v41 = vmul.f32 %v3369_v40, %v3361_v21  ;;  %v2625_v21 = vld [vmem:[#allocation17 + $0x28] sm:$0xff]  ;;  %v2621_v38 = vperm.slane %v4533_v54, 2  ;;  %v3296_v54 = vld [vmem:[#allocation19 + $0x1] ss:$0 sm:$0xff] }
0x167b   : > { %v2324_v42 = vpop.permute.xlu0 %2323 }
0x167c   : > { %2344 = vmatpush.msrb.mxu1 %v2324_v42  ;;  %v3084_v42 = vld [vmem:[%s4883_s16 + $0x50] sm:$0xff] }
0x167d   : > { %3070 = vmatmul.msk.f32.vlgmr.msrb.gmra.mxu1 %vm1026_vm5, %v2322_v41 }
0x167e   : > { %2478 = vmatpush.msra.mxu1 %v2458_v43  ;;  %v3083_v43 = vld [vmem:[%s4883_s16 + $0x48] sm:$0xff] }
0x1680   : > { %2645 = vmatpush.msrb.mxu1 %v2627_v18 }
0x1681   : > { %2524 = vrot.lane.b32.xlu0 %v4631_v36, %s4879_s24  ;;  %s945_s24 = scalar_lea.vmem [#allocation25], %s4227_s7  ;;  %s3820_s7 = scalar_lea.hbm %s4891_s1, 16 }
0x1682   : > { %2646 = vmatpush.msrb.mxu1 %v2626_v19 }
0x1684   : > { %2647 = vmatpush.msrb.mxu1 %v2625_v21 }
0x1686   : > { %2648 = vmatpush.msrb.mxu1 %v2624_v22 }
0x168e   : > { %2390 = vrot.lane.b32.xlu1 %v4631_v36, %s4880_s18  ;;  %s2736_s18 = sshll.u32 %s945_s24, 4  ;;  %s2737_s18 = int_to_ptr.vmem [resolvable:$true] %s2736_s18 }
0x16d8   : > { %v2387_v44 = vpop.xlane.xlu0 %2386 }
0x16e0   : > { %v2454_v45 = vpop.xlane.xlu0 %2453 }
0x16e1   : > { %3370 = vrcp.f32 %v2454_v45 }
0x16e2   : > { %3372 = vrcp.f32 %v2387_v44 }
0x16e7   : > { %v3371_v47 = vpop.eup %3370 }
0x16e8   : > { %v2456_v48 = vmul.f32 %v3371_v47, %v3365_v3  ;;  %v2521_v49 = vpop.xlane.xlu1 %2520  ;;  %v3373_v50 = vpop.eup %3372 }
0x16e9   : > { %3374 = vrcp.f32 %v2521_v49  ;;  %v2389_v52 = vmul.f32 %v3373_v50, %v3363_v39  ;;  %v3085_v39 = vld [vmem:[%s4883_s16 + $0x58] sm:$0xff] }
0x16ea   : > { %3076 = vmatmul.msk.f32.vlgmr.msra.gmra.mxu1 %vm1026_vm5, %v2456_v48  ;;  %v3297_v48 = vld [vmem:[#allocation20 + $0x1] ss:$0 sm:$0xff] }
0x16ef   : > { %v3375_v55 = vpop.eup %3374 }
0x16f0   : > { %v2523_v36 = vmul.f32 %v3375_v55, %v3367_v37 }
0x16f3   : > { %v2525_v53 = vpop.permute.xlu0 %2524 }
0x16fa   : > { %v2346_v57 = vpop.f32.mrf.mxu1 }
0x1700   : > { %v2391_v46 = vpop.permute.xlu1 %2390 }
0x1701   : > { %2411 = vmatpush.msra.mxu0 %v2391_v46 }
0x1702   : > { %3073 = vmatmul.msk.f32.vlgmr.msra.gmra.mxu0 %vm1026_vm5, %v2389_v52 }
0x1703   : > { %2545 = vmatpush.msrb.mxu0 %v2525_v53 }
0x170a   : > { %3079 = vmatmul.msk.f32.vlgmr.msrb.gmra.mxu0 %vm1026_vm5, %v2523_v36 }
0x1767   : > { %v2480_v58 = vpop.f32.mrf.mxu1 }
0x1768   : > { %2555 = vrot.lane.b32.xlu1 %v2480_v58, %s4881_s23  ;;  %s2738_s23 = sshll.u32 %s2734_s20, 4  ;;  %s2739_s23 = int_to_ptr.hbm [resolvable:$true] %s2738_s23 }
0x177f   : > { %v2413_v59 = vpop.f32.mrf.mxu0 }
0x1780   : > { %2551 = vrot.lane.b32.xlu0 %v2413_v59, %s4882_s8  ;;  %s3814_s8 = sshra.s32 %s2739_s23, 4  ;;  %s3815_s8 = int_to_ptr.hbm [resolvable:$true] %s3814_s8 }
0x1781   : > { %s3816_s27 = scalar_lea.hbm %s3815_s8, 8  ;;  %p3821_p9 = scmp.lt.s32.totalorder %s3815_s8, %s4891_s1 }
0x1782   : > { %p3817_p3 = scmp.ne.s32.totalorder %s3815_s8, %s3816_s27  ;;  %p3822_p8 = scmp.lt.s32.totalorder %s3820_s7, %s3816_s27 }
0x1784   : > { %p3818_p12 = pnand %p3817_p3, %p4171_p5  ;;  %p3823_p10 = por %p3822_p8, %p3821_p9 }
0x1786   : > { %p3819_p7 = pneg %p3818_p12 }
0x1787   : > { %v2547_v60 = vpop.f32.mrf.mxu0 }
0x1788   : > { %2559 = vrot.lane.b32.xlu0 %v2547_v60, %s4890_s12  ;;  %p3824_p11 = pnand %p3823_p10, %p3819_p7 }
0x17da   : > { %v2556_v4 = vpop.permute.xlu1 %2555 }
0x17f2   : > { %v2552_v0 = vpop.permute.xlu0 %2551 }
0x17f3   : > { %v2562_v2 = vsel %vm1026_vm5, %v2346_v57, %v2552_v0 }
0x17f4   : > { %v2563_v6 = vsel %vm1304_vm6, %v2562_v2, %v2556_v4 }
0x17fa   : > { %v2560_v5 = vpop.permute.xlu0 %2559 }
0x17fb   : > { %v2564_v56 = vsel %vm1306_vm7, %v2563_v6, %v2560_v5  ;;  %v3298_v5 = vld [vmem:[#allocation22] ss:$0 sm:$0xff] }
0x17fc   : > { %3080 = vmatmul.msk.f32.vlgmr.msrb.gmra.mxu2 %vm960_vm0, %v2564_v56  ;;  %v3299_v56 = vld [vmem:[#allocation23] ss:$0 sm:$0xff] }
0x187f   : > { %v2590_v9 = vpop.f32.mrf.mxu2 }
0x1880   : > { %v2593_v10 = vadd.f32 %v2590_v9, %v4610_v20  ;;  %v3089_v20 = vld [vmem:[%s4883_s16 + $0x78] sm:$0xff] }
0x1881   : > { %2674 = vmatpush.msrb.mxu3 %v3089_v20 }
0x1882   : > { %v2596_v11 = vadd.f32 %v3295_v7, %v2593_v10 }
0x1883   : > { %2675 = vmatpush.msrb.mxu3 %v3088_v26 }
0x1884   : > { %v2597_v12 = vsel %vm960_vm0, %v2596_v11, 0.0 }
0x1885   : > { %2598 = vadd.xlane.f32.xlu2 %v2597_v12  ;;  %2676 = vmatpush.msrb.mxu3 %v3087_v28 }
0x1887   : > { %2677 = vmatpush.msrb.mxu3 %v3086_v32 }
0x1889   : > { %2678 = vmatpush.msrb.mxu3 %v3085_v39 }
0x188b   : > { %2679 = vmatpush.msrb.mxu3 %v3084_v42 }
0x188d   : > { %2680 = vmatpush.msrb.mxu3 %v3083_v43 }
0x188f   : > { %2681 = vmatpush.msrb.mxu3 %v3082_v51 }
0x18f8   : > { %v2599_v13 = vpop.xlane.xlu2 %2598 }
0x18f9   : > { %v2600_v14 = vmul.f32 %v2599_v13, %v4273_v8 }
0x18fb   : > { %v2601_v15 = vsub.f32 %v2596_v11, %v2600_v14 }
0x18fd   : > { %v2602_v16 = vmul.f32 %v2601_v15, %v2601_v15 }
0x18ff   : > { %v2603_v17 = vsel %vm960_vm0, %v2602_v16, 0.0 }
0x1900   : > { %2604 = vadd.xlane.f32.xlu1 %v2603_v17 }
0x1973   : > { %v2605_v23 = vpop.xlane.xlu1 %2604 }
0x1974   : > { %v2606_v24 = vmul.f32 %v2605_v23, %v4273_v8 }
0x1976   : > { %v2607_v25 = vadd.f32 1e-05, %v2606_v24 }
0x1978   : > { %3376 = vrsqrt.f32 %v2607_v25  ;;  %vm2614_vm6 = vweird.f32 %v2607_v25 }
0x197e   : > { %v3377_v29 = vpop.eup %3376 }
0x197f   : > { %v2609_v30 = vmul.f32 %v3377_v29, %v2607_v25  ;;  %vm2615_vm5 = vweird.f32 %v3377_v29 }
0x1980   : > { %vm2616_vm7 = vmor %vm2614_vm6, %vm2615_vm5 }
0x1981   : > { %v2610_v31 = vmul.f32 %v3377_v29, %v2609_v30 }
0x1983   : > { %v2611_v27 = vmul.f32 0.5, %v2610_v31 }
0x1985   : > { %v2612_v3 = vsub.f32 1.5, %v2611_v27 }
0x1987   : > { %v2613_v33 = vmul.f32 %v3377_v29, %v2612_v3 }
0x1989   : > { %v2617_v35 = vsel %vm2616_vm7, %v3377_v29, %v2613_v33 }
0x198a   : > { %v2618_v37 = vmul.f32 %v2617_v35, %v2601_v15 }
0x198c   : > { %v2620_v40 = vmul.f32 %v2619_v34, %v2618_v37 }
0x198e   : > { %v2622_v41 = vadd.f32 %v2621_v38, %v2620_v40 }
0x1990   : > { %3081 = vmatmul.msk.f32.vlgmr.msrb.gmra.mxu1 %vm960_vm0, %v2622_v41 }
0x1a0d   : > { %v2650_v44 = vpop.f32.mrf.mxu1 }
0x1a0e   : > { %v2651_v45 = vadd.f32 %v3296_v54, %v2650_v44 }
0x1a10   : > { %v2653_v47 = vmax.f32 %v2651_v45, 0.0 }
0x1a12   : > { %3090 = vmatmul.msk.f32.vlgmr.msrb.gmra.mxu3 %vm1799_vm14, %v2653_v47 }
0x1a95   : > { %v2683_v49 = vpop.f32.mrf.mxu3 }
0x1a96   : > { %v2686_v50 = vadd.f32 %v2683_v49, %v2596_v11 }
0x1a98   : > { %v2689_v52 = vadd.f32 %v3297_v48, %v2686_v50 }
0x1a9a   : > { %v2692_v46 = vsel %vm960_vm0, %v2689_v52, 0.0 }
0x1a9b   : > { %2693 = vadd.xlane.f32.xlu0 %v2692_v46 }
0x1b0e   : > { %v2694_v53 = vpop.xlane.xlu0 %2693 }
0x1b0f   : > { %v2695_v55 = vmul.f32 %v2694_v53, %v4273_v8 }
0x1b11   : > { %v2696_v36 = vsub.f32 %v2689_v52, %v2695_v55 }
0x1b13   : > { %v2697_v57 = vmul.f32 %v2696_v36, %v2696_v36 }
0x1b15   : > { %v2698_v58 = vsel %vm960_vm0, %v2697_v57, 0.0 }
0x1b16   : > { %2699 = vadd.xlane.f32.xlu2 %v2698_v58 }
0x1b89   : > { %v2700_v59 = vpop.xlane.xlu2 %2699 }
0x1b8a   : > { %v2701_v60 = vmul.f32 %v2700_v59, %v4273_v8 }
0x1b8c   : > { %v2702_v61 = vadd.f32 1e-05, %v2701_v60 }
0x1b8e   : > { %3378 = vrsqrt.f32 %v2702_v61  ;;  %vm2709_vm10 = vweird.f32 %v2702_v61 }
0x1b94   : > { %v3379_v62 = vpop.eup %3378 }
0x1b95   : > { %v2704_v63 = vmul.f32 %v3379_v62, %v2702_v61  ;;  %vm2710_vm9 = vweird.f32 %v3379_v62 }
0x1b96   : > { %vm2711_vm11 = vmor %vm2709_vm10, %vm2710_vm9 }
0x1b97   : > { %v2705_v1 = vmul.f32 %v3379_v62, %v2704_v63 }
0x1b99   : > { %v2706_v0 = vmul.f32 0.5, %v2705_v1 }
0x1b9b   : > { %v2707_v2 = vsub.f32 1.5, %v2706_v0 }
0x1b9d   : > { %v2708_v4 = vmul.f32 %v3379_v62, %v2707_v2 }
0x1b9f   : > { %v2712_v8 = vsel %vm2711_vm11, %v3379_v62, %v2708_v4 }
0x1ba0   : > { %v2713_v6 = vmul.f32 %v2712_v8, %v2696_v36 }
0x1ba2   : > { %v2717_v7 = vmul.f32 %v3298_v5, %v2713_v6 }
0x1ba4   : > { %v2721_v9 = vadd.f32 %v3299_v56, %v2717_v7 }
0x1ba6   : > { %2722 = vst.msk [vmem:[%s945_s24] sm:$0xff] %vm960_vm0, %v2721_v9 }
0x1ba7   : > { %3827 = shalt.err (!%p3824_p11)
}
0x1ba8   : > { %3147 = dma.vmem_to_hbm [thread:$0]  (%p4171_p5), %s2737_s18, 128, %s2739_s23, %s2724_s5  }
0x1ba9 PF: > { %s2750_s14 = sand.u32 1, %s3886_s3   ;;  %p4892_p4 = scmp.ge.s32.totalorder %s3898_s30, 2 }
0x1baa   : > { %s2751_s17 = scalar_lea.sflag [#allocation4], %s2750_s14 }
0x1bab   : > { %p3194_p13 = pnand %p4892_p4, %p4175_p6 }
0x1bad   : > { %p3195_p0 = pneg %p3194_p13 }
0x1baf   : > { %3881 = dma.done.wait (%p3195_p0), %s2751_s17, 128  }
0x1bb0   : > { %3883 = vsyncadd (%p3195_p0), %s2751_s17, 4294967168  ;;  %s4893_s21 = sld [smem:[#allocation37_spill]]  ;;  %p44_p2 = scmp.ge.s32.totalorder %s4145_s26, 4  }
0x1bb1   : > { %s4894_s3 = smov %s3890_s28  ;;  %s4895_s28 = smov %s3894_s29 }
0x1bb2   : > { %s4897_s30 = smov %s4145_s26  ;;  %46 = sbr.rel (!%p44_p2) target bundleno = 37 (0x25), region = 229 }
0x1bb6   : > { %s4896_s29 = smov %s4893_s21 }
0x1bb7   :  { %2757 = vsyncpa [#allocation3], 1 }
0x1bb8   :  { %2759 = vsyncpa [#allocation3 + $0x1], 1 }
0x1bb9   :  { %2760 = vsyncpa [#allocation6], 1 }
0x1bba   :  { %2762 = vsyncpa [#allocation6 + $0x1], 1 }
0x1bbb   :  { %2763 = vsyncpa [#allocation9], 1 }
0x1bbc   :  { %2764 = vsyncpa [#allocation12], 1 }
0x1bbd   :  { %2765 = vsyncpa [#allocation15], 1 }
0x1bbe   :  { %2766 = vsyncpa [#allocation18], 1 }
0x1bbf   :  { %2767 = vsyncpa [#allocation21], 1 }
0x1bc0   :  { %2768 = vsyncpa [#allocation24], 1 }
0x1bc1   :  { %2769 = vsyncpa [#allocation4], 1 }
0x1bc2   :  { %2771 = vsyncpa [#allocation4 + $0x1], 1 }

</bundles_post_ra>
